<compile_context>
chip_gen: v5e
topology: v5e:2x2
jax: 0.10.0
libtpu: 0.0.40
codegen_flags: <defaults>
</compile_context>

<pallas_src>
import jax
import jax.numpy as jnp
from jax.experimental import pallas as pl
from jax.experimental.pallas import tpu as pltpu


# --------------------------- in-kernel helpers ------------------------------ #

def _scatter_rows_to_patches(y_ref, patch_ref, H, W, C, OH, OW,
                             kh=4, kw=4, stride=2, pad=1):
    """Scatter rows of a (H*W, C) activation (row-major spatial) into the
    im2col patch matrix (OH*OW, kh*kw*C) of the next conv layer.

    Fully unrolled at trace time (spatial dims are tiny at these shapes).
    Patch columns are ordered (kh, kw, c); slots corresponding to zero padding
    are simply never written (patch_ref is zero-initialised by the caller)."""
    for ih in range(H):
        for iw in range(W):
            row = None
            for i in range(kh):
                t = ih + pad - i
                if t < 0 or t % stride:
                    continue
                oh = t // stride
                if oh >= OH:
                    continue
                for j in range(kw):
                    u = iw + pad - j
                    if u < 0 or u % stride:
                        continue
                    ow = u // stride
                    if ow >= OW:
                        continue
                    if row is None:                       # load source row once
                        row = y_ref[pl.ds(ih * W + iw, 1), :]        # (1, C)
                    p = oh * OW + ow
                    col = (i * kw + j) * C
                    patch_ref[pl.ds(p, 1), pl.ds(col, C)] = row


def _make_disc_kernel(spat, chans, fs):
    """Build the fused per-image kernel body.

    spat  = [s1, s2, s3, s4]   output spatial size of each feature conv layer
    chans = [c0, c1, c2, c3, c4]   channel counts (input + 4 feature layers)
    fs    = classifier kernel size (= s4)
    """

    def conv_block(patch_bf16, w_ref, scale_ref, shift_ref, y_ref):
        # (P, K)bf16 @ (K, Cout)bf16 -> f32 acc, folded affine + LeakyReLU(0.2)
        acc = jnp.dot(patch_bf16, w_ref[...],
                      preferred_element_type=jnp.float32)
        y = acc * scale_ref[...] + shift_ref[...]
        y_ref[...] = jnp.where(y >= 0.0, y, 0.2 * y)

    def kernel(p1_ref,
               w1_ref, s1_ref, t1_ref,
               w2_ref, s2_ref, t2_ref,
               w3_ref, s3_ref, t3_ref,
               w4_ref, s4_ref, t4_ref,
               wc_ref, bc_ref,
               o_ref,
               y1_ref, p2_ref, y2_ref, p3_ref, y3_ref, p4_ref, y4_ref, pc_ref):
        # ---- layer 1: Conv(c0 -> c1) + LeakyReLU (patches built outside) ----
        conv_block(p1_ref[0], w1_ref, s1_ref, t1_ref, y1_ref)

        # ---- layer 2: Conv(c1 -> c2) + BN + LeakyReLU ----
        p2_ref[...] = jnp.zeros_like(p2_ref)
        _scatter_rows_to_patches(y1_ref, p2_ref, spat[0], spat[0], chans[1],
                                 spat[1], spat[1])
        conv_block(p2_ref[...].astype(jnp.bfloat16), w2_ref, s2_ref, t2_ref,
                   y2_ref)

        # ---- layer 3: Conv(c2 -> c3) + BN + LeakyReLU ----
        p3_ref[...] = jnp.zeros_like(p3_ref)
        _scatter_rows_to_patches(y2_ref, p3_ref, spat[1], spat[1], chans[2],
                                 spat[2], spat[2])
        conv_block(p3_ref[...].astype(jnp.bfloat16), w3_ref, s3_ref, t3_ref,
                   y3_ref)

        # ---- layer 4: Conv(c3 -> c4) + BN + LeakyReLU ----
        p4_ref[...] = jnp.zeros_like(p4_ref)
        _scatter_rows_to_patches(y3_ref, p4_ref, spat[2], spat[2], chans[3],
                                 spat[3], spat[3])
        conv_block(p4_ref[...].astype(jnp.bfloat16), w4_ref, s4_ref, t4_ref,
                   y4_ref)

        # ---- classifier: Conv(k=fs, s=1, p=0) -> Flatten -> Sigmoid ----
        for r in range(fs * fs):
            pc_ref[pl.ds(0, 1), pl.ds(r * chans[4], chans[4])] = \
                y4_ref[pl.ds(r, 1), :]
        logit = jnp.dot(pc_ref[...].astype(jnp.bfloat16), wc_ref[...],
                        preferred_element_type=jnp.float32) + bc_ref[...]
        o_ref[0] = jax.nn.sigmoid(logit)

    return kernel


# ------------------------------- XLA glue ----------------------------------- #

def _im2col_first_layer(x_nhwc, kh, kw, stride, pad):
    """im2col for the input layer only. Returns (N, OH*OW, kh*kw*C) with the K
    axis ordered (kh, kw, c), so no layout-hostile transpose is required."""
    N, H, W, C = x_nhwc.shape
    xp = jnp.pad(x_nhwc, ((0, 0), (pad, pad), (pad, pad), (0, 0)))
    OH = (H + 2 * pad - kh) // stride + 1
    OW = (W + 2 * pad - kw) // stride + 1
    cols = []
    for i in range(kh):
        for j in range(kw):
            cols.append(xp[:, i:i + stride * OH:stride,
                           j:j + stride * OW:stride, :])       # (N, OH, OW, C)
    patches = jnp.stack(cols, axis=3)                          # (N, OH, OW, kh*kw, C)
    return patches.reshape(N, OH * OW, kh * kw * C), OH, OW


def _flatten_conv_weight(w):
    # (OC, IC, KH, KW) -> (KH*KW*IC, OC), K ordered (kh, kw, ic)
    OC, IC, KH, KW = w.shape
    return jnp.transpose(w, (2, 3, 1, 0)).reshape(KH * KW * IC, OC)


def init_params(key, channels=3, image_size=16, features_d=8):
    keys = jax.random.split(key, 32)
    ki = 0

    def nxt():
        nonlocal ki
        k = keys[ki]
        ki += 1
        return k

    cfg = [(channels, features_d, False),
           (features_d, features_d * 2, True),
           (features_d * 2, features_d * 4, True),
           (features_d * 4, features_d * 8, True)]
    features = []
    for cin, cout, bn in cfg:
        layer = {
            "w": 0.02 * jax.random.normal(nxt(), (cout, cin, 4, 4), jnp.float32),
            "b": 0.02 * jax.random.normal(nxt(), (cout,), jnp.float32),
        }
        if bn:
            layer["gamma"] = 1.0 + 0.02 * jax.random.normal(nxt(), (cout,), jnp.float32)
            layer["beta"] = 0.02 * jax.random.normal(nxt(), (cout,), jnp.float32)
            layer["mean"] = jnp.zeros((cout,), jnp.float32)
            layer["var"] = jnp.ones((cout,), jnp.float32)
        features.append(layer)

    fs = image_size // 16
    classifier = {
        "w": 0.02 * jax.random.normal(nxt(), (1, features_d * 8, fs, fs), jnp.float32),
        "b": 0.02 * jax.random.normal(nxt(), (1,), jnp.float32),
    }
    return {"features": features, "classifier": classifier}


def discriminator_forward(img_nchw, params, eps=1e-5):
    # layout: input is NCHW (PyTorch convention); converted to NHWC internally.
    x = jnp.transpose(img_nchw, (0, 2, 3, 1)).astype(jnp.float32)
    N, H, W, C0 = x.shape
    feats = params["features"]

    chans = [C0] + [int(f["w"].shape[0]) for f in feats]
    spat = []
    s = H
    for _ in feats:
        s //= 2
        spat.append(s)
    fs = spat[-1]                               # classifier kernel size

    # Layer-1 patches (only layer whose input comes from HBM); bf16 for the MXU.
    p1, OH1, OW1 = _im2col_first_layer(x, 4, 4, stride=2, pad=1)
    p1 = p1.astype(jnp.bfloat16)

    ops = [p1]
    in_specs = [pl.BlockSpec((1, OH1 * OW1, 16 * C0), lambda b: (b, 0, 0))]

    for f in feats:
        w, b = f["w"], f["b"]
        OC = int(w.shape[0])
        wmat = _flatten_conv_weight(w).astype(jnp.bfloat16)
        if "gamma" in f:                        # fold conv bias + eval-mode BN
            scale = f["gamma"] / jnp.sqrt(f["var"] + eps)
            shift = (b - f["mean"]) * scale + f["beta"]
        else:
            scale = jnp.ones_like(b)
            shift = b
        ops += [wmat,
                scale.reshape(1, OC).astype(jnp.float32),
                shift.reshape(1, OC).astype(jnp.float32)]
        in_specs += [pl.BlockSpec(wmat.shape, lambda b: (0, 0)),
                     pl.BlockSpec((1, OC), lambda b: (0, 0)),
                     pl.BlockSpec((1, OC), lambda b: (0, 0))]

    wc = _flatten_conv_weight(params["classifier"]["w"]).astype(jnp.bfloat16)
    bc = params["classifier"]["b"].reshape(1, 1).astype(jnp.float32)
    ops += [wc, bc]
    in_specs += [pl.BlockSpec(wc.shape, lambda b: (0, 0)),
                 pl.BlockSpec((1, 1), lambda b: (0, 0))]

    c1, c2, c3, c4 = chans[1], chans[2], chans[3], chans[4]
    s1, s2, s3, s4 = spat
    scratch_shapes = [
        pltpu.VMEM((s1 * s1, c1), jnp.float32),        # y1
        pltpu.VMEM((s2 * s2, 16 * c1), jnp.float32),   # layer-2 patches
        pltpu.VMEM((s2 * s2, c2), jnp.float32),        # y2
        pltpu.VMEM((s3 * s3, 16 * c2), jnp.float32),   # layer-3 patches
        pltpu.VMEM((s3 * s3, c3), jnp.float32),        # y3
        pltpu.VMEM((s4 * s4, 16 * c3), jnp.float32),   # layer-4 patches
        pltpu.VMEM((s4 * s4, c4), jnp.float32),        # y4
        pltpu.VMEM((1, fs * fs * c4), jnp.float32),    # classifier patch
    ]

    out = pl.pallas_call(
        _make_disc_kernel(spat, chans, fs),
        out_shape=jax.ShapeDtypeStruct((N, 1, 1), jnp.float32),
        grid=(N,),
        in_specs=in_specs,
        out_specs=pl.BlockSpec((1, 1, 1), lambda b: (b, 0, 0)),
        scratch_shapes=scratch_shapes,
        compiler_params=pltpu.CompilerParams(
            dimension_semantics=("parallel",)),
    )(*ops)
    return out.reshape(N, 1)


if __name__ == "__main__":
    batch, channels, image_size, features_d = 2, 3, 16, 8
    key = jax.random.PRNGKey(0)
    k_img, k_par = jax.random.split(key)

    img = jax.random.normal(k_img, (batch, channels, image_size, image_size),
                            jnp.float32)
    params = init_params(k_par, channels=channels, image_size=image_size,
                         features_d=features_d)

    out = jax.jit(discriminator_forward)(img, params)
    out = jax.block_until_ready(out)

    assert out.shape == (batch, 1), out.shape
    assert bool(jnp.all((out >= 0.0) & (out <= 1.0))), "sigmoid out of range"
    assert bool(jnp.all(jnp.isfinite(out))), "non-finite output"
    print("KERNEL_OK")
</pallas_src>

<mosaic_0001>
module attributes {stable_mosaic.version = 11 : i64} {
  func.func @kernel(%arg0: i32, %arg1: memref<1x64x48xbf16, #tpu.memory_space<vmem>>, %arg2: memref<48x8xbf16, #tpu.memory_space<vmem>>, %arg3: memref<1x8xf32, #tpu.memory_space<vmem>>, %arg4: memref<1x8xf32, #tpu.memory_space<vmem>>, %arg5: memref<128x16xbf16, #tpu.memory_space<vmem>>, %arg6: memref<1x16xf32, #tpu.memory_space<vmem>>, %arg7: memref<1x16xf32, #tpu.memory_space<vmem>>, %arg8: memref<256x32xbf16, #tpu.memory_space<vmem>>, %arg9: memref<1x32xf32, #tpu.memory_space<vmem>>, %arg10: memref<1x32xf32, #tpu.memory_space<vmem>>, %arg11: memref<512x64xbf16, #tpu.memory_space<vmem>>, %arg12: memref<1x64xf32, #tpu.memory_space<vmem>>, %arg13: memref<1x64xf32, #tpu.memory_space<vmem>>, %arg14: memref<64x1xbf16, #tpu.memory_space<vmem>>, %arg15: memref<1x1xf32, #tpu.memory_space<vmem>>, %arg16: memref<1x1x1xf32, #tpu.memory_space<vmem>>, %arg17: memref<64x8xf32, #tpu.memory_space<vmem>>, %arg18: memref<16x128xf32, #tpu.memory_space<vmem>>, %arg19: memref<16x16xf32, #tpu.memory_space<vmem>>, %arg20: memref<4x256xf32, #tpu.memory_space<vmem>>, %arg21: memref<4x32xf32, #tpu.memory_space<vmem>>, %arg22: memref<1x512xf32, #tpu.memory_space<vmem>>, %arg23: memref<1x64xf32, #tpu.memory_space<vmem>>, %arg24: memref<1x64xf32, #tpu.memory_space<vmem>>) attributes {dimension_semantics = [#tpu.dimension_semantics<parallel>], iteration_bounds = array<i64: 2>, scalar_prefetch = 0 : i64, scratch_operands = 8 : i64, tpu.core_type = #tpu.core_type<tc>, window_params = [{transform_indices = @transform_0, window_bounds = array<i64: 1, 64, 48>}, {pipeline_mode = #tpu.pipeline_mode<synchronous>, transform_indices = @transform_1, window_bounds = array<i64: 48, 8>}, {pipeline_mode = #tpu.pipeline_mode<synchronous>, transform_indices = @transform_2, window_bounds = array<i64: 1, 8>}, {pipeline_mode = #tpu.pipeline_mode<synchronous>, transform_indices = @transform_3, window_bounds = array<i64: 1, 8>}, {pipeline_mode = #tpu.pipeline_mode<synchronous>, transform_indices = @transform_4, window_bounds = array<i64: 128, 16>}, {pipeline_mode = #tpu.pipeline_mode<synchronous>, transform_indices = @transform_5, window_bounds = array<i64: 1, 16>}, {pipeline_mode = #tpu.pipeline_mode<synchronous>, transform_indices = @transform_6, window_bounds = array<i64: 1, 16>}, {pipeline_mode = #tpu.pipeline_mode<synchronous>, transform_indices = @transform_7, window_bounds = array<i64: 256, 32>}, {pipeline_mode = #tpu.pipeline_mode<synchronous>, transform_indices = @transform_8, window_bounds = array<i64: 1, 32>}, {pipeline_mode = #tpu.pipeline_mode<synchronous>, transform_indices = @transform_9, window_bounds = array<i64: 1, 32>}, {pipeline_mode = #tpu.pipeline_mode<synchronous>, transform_indices = @transform_10, window_bounds = array<i64: 512, 64>}, {pipeline_mode = #tpu.pipeline_mode<synchronous>, transform_indices = @transform_11, window_bounds = array<i64: 1, 64>}, {pipeline_mode = #tpu.pipeline_mode<synchronous>, transform_indices = @transform_12, window_bounds = array<i64: 1, 64>}, {pipeline_mode = #tpu.pipeline_mode<synchronous>, transform_indices = @transform_13, window_bounds = array<i64: 64, 1>}, {pipeline_mode = #tpu.pipeline_mode<synchronous>, transform_indices = @transform_14, window_bounds = array<i64: 1, 1>}, {transform_indices = @transform_15, window_bounds = array<i64: 1, 1, 1>}]} {
    %c0 = arith.constant 0 : index
    %c0_0 = arith.constant 0 : index
    %c0_1 = arith.constant 0 : index
    %0 = vector.load %arg1[%c0, %c0_0, %c0_1] : memref<1x64x48xbf16, #tpu.memory_space<vmem>>, vector<1x64x48xbf16>
    %1 = vector.shape_cast %0 : vector<1x64x48xbf16> to vector<64x48xbf16>
    %c0_2 = arith.constant 0 : index
    %c0_3 = arith.constant 0 : index
    %2 = vector.load %arg2[%c0_2, %c0_3] : memref<48x8xbf16, #tpu.memory_space<vmem>>, vector<48x8xbf16>
    %cst = arith.constant dense<0.000000e+00> : vector<64x8xf32>
    %3 = tpu.matmul %1, %2, %cst {dimension_numbers = #tpu.dot_dimension_numbers<[1], [0], [0], [1], [0, 0, 1, 1], [], []>} : vector<64x48xbf16>, vector<48x8xbf16>, vector<64x8xf32> -> vector<64x8xf32>
    %c0_4 = arith.constant 0 : index
    %c0_5 = arith.constant 0 : index
    %4 = vector.load %arg3[%c0_4, %c0_5] : memref<1x8xf32, #tpu.memory_space<vmem>>, vector<1x8xf32>
    %5 = vector.broadcast %4 : vector<1x8xf32> to vector<64x8xf32>
    %6 = arith.mulf %3, %5 : vector<64x8xf32>
    %c0_6 = arith.constant 0 : index
    %c0_7 = arith.constant 0 : index
    %7 = vector.load %arg4[%c0_6, %c0_7] : memref<1x8xf32, #tpu.memory_space<vmem>>, vector<1x8xf32>
    %8 = vector.broadcast %7 : vector<1x8xf32> to vector<64x8xf32>
    %9 = arith.addf %6, %8 : vector<64x8xf32>
    %cst_8 = arith.constant 0.000000e+00 : f32
    %10 = vector.broadcast %cst_8 : f32 to vector<64x8xf32>
    %11 = arith.cmpf oge, %9, %10 : vector<64x8xf32>
    %cst_9 = arith.constant 2.000000e-01 : f32
    %12 = vector.broadcast %cst_9 : f32 to vector<64x8xf32>
    %13 = arith.mulf %12, %9 : vector<64x8xf32>
    %14 = arith.select %11, %9, %13 : vector<64x8xi1>, vector<64x8xf32>
    %c0_10 = arith.constant 0 : index
    %c0_11 = arith.constant 0 : index
    %15 = vector.load %arg17[%c0_10, %c0_11] : memref<64x8xf32, #tpu.memory_space<vmem>>, vector<64x8xf32>
    tpu.vector_store %arg17[%c0_10, %c0_11], %14 {strides = array<i32>} : memref<64x8xf32, #tpu.memory_space<vmem>>, vector<64x8xf32>,
    %cst_12 = arith.constant 0.000000e+00 : f32
    %16 = vector.broadcast %cst_12 : f32 to vector<16x128xf32>
    %c0_13 = arith.constant 0 : index
    %c0_14 = arith.constant 0 : index
    %17 = vector.load %arg18[%c0_13, %c0_14] : memref<16x128xf32, #tpu.memory_space<vmem>>, vector<16x128xf32>
    tpu.vector_store %arg18[%c0_13, %c0_14], %16 {strides = array<i32>} : memref<16x128xf32, #tpu.memory_space<vmem>>, vector<16x128xf32>,
    %c0_15 = arith.constant 0 : index
    %c0_16 = arith.constant 0 : index
    %18 = vector.load %arg17[%c0_15, %c0_16] : memref<64x8xf32, #tpu.memory_space<vmem>>, vector<1x8xf32>
    %c0_17 = arith.constant 0 : index
    %c40 = arith.constant 40 : index
    %19 = vector.load %arg18[%c0_17, %c40] : memref<16x128xf32, #tpu.memory_space<vmem>>, vector<1x8xf32>
    tpu.vector_store %arg18[%c0_17, %c40], %18 {strides = array<i32>} : memref<16x128xf32, #tpu.memory_space<vmem>>, vector<1x8xf32>,
    %c1 = arith.constant 1 : index
    %c0_18 = arith.constant 0 : index
    %20 = vector.load %arg17[%c1, %c0_18] : memref<64x8xf32, #tpu.memory_space<vmem>>, vector<1x8xf32>
    %c1_19 = arith.constant 1 : index
    %c32 = arith.constant 32 : index
    %21 = vector.load %arg18[%c1_19, %c32] : memref<16x128xf32, #tpu.memory_space<vmem>>, vector<1x8xf32>
    tpu.vector_store %arg18[%c1_19, %c32], %20 {strides = array<i32>} : memref<16x128xf32, #tpu.memory_space<vmem>>, vector<1x8xf32>,
    %c0_20 = arith.constant 0 : index
    %c48 = arith.constant 48 : index
    %22 = vector.load %arg18[%c0_20, %c48] : memref<16x128xf32, #tpu.memory_space<vmem>>, vector<1x8xf32>
    tpu.vector_store %arg18[%c0_20, %c48], %20 {strides = array<i32>} : memref<16x128xf32, #tpu.memory_space<vmem>>, vector<1x8xf32>,
    %c2 = arith.constant 2 : index
    %c0_21 = arith.constant 0 : index
    %23 = vector.load %arg17[%c2, %c0_21] : memref<64x8xf32, #tpu.memory_space<vmem>>, vector<1x8xf32>
    %c1_22 = arith.constant 1 : index
    %c40_23 = arith.constant 40 : index
    %24 = vector.load %arg18[%c1_22, %c40_23] : memref<16x128xf32, #tpu.memory_space<vmem>>, vector<1x8xf32>
    tpu.vector_store %arg18[%c1_22, %c40_23], %23 {strides = array<i32>} : memref<16x128xf32, #tpu.memory_space<vmem>>, vector<1x8xf32>,
    %c0_24 = arith.constant 0 : index
    %c56 = arith.constant 56 : index
    %25 = vector.load %arg18[%c0_24, %c56] : memref<16x128xf32, #tpu.memory_space<vmem>>, vector<1x8xf32>
    tpu.vector_store %arg18[%c0_24, %c56], %23 {strides = array<i32>} : memref<16x128xf32, #tpu.memory_space<vmem>>, vector<1x8xf32>,
    %c3 = arith.constant 3 : index
    %c0_25 = arith.constant 0 : index
    %26 = vector.load %arg17[%c3, %c0_25] : memref<64x8xf32, #tpu.memory_space<vmem>>, vector<1x8xf32>
    %c2_26 = arith.constant 2 : index
    %c32_27 = arith.constant 32 : index
    %27 = vector.load %arg18[%c2_26, %c32_27] : memref<16x128xf32, #tpu.memory_space<vmem>>, vector<1x8xf32>
    tpu.vector_store %arg18[%c2_26, %c32_27], %26 {strides = array<i32>} : memref<16x128xf32, #tpu.memory_space<vmem>>, vector<1x8xf32>,
    %c1_28 = arith.constant 1 : index
    %c48_29 = arith.constant 48 : index
    %28 = vector.load %arg18[%c1_28, %c48_29] : memref<16x128xf32, #tpu.memory_space<vmem>>, vector<1x8xf32>
    tpu.vector_store %arg18[%c1_28, %c48_29], %26 {strides = array<i32>} : memref<16x128xf32, #tpu.memory_space<vmem>>, vector<1x8xf32>,
    %c4 = arith.constant 4 : index
    %c0_30 = arith.constant 0 : index
    %29 = vector.load %arg17[%c4, %c0_30] : memref<64x8xf32, #tpu.memory_space<vmem>>, vector<1x8xf32>
    %c2_31 = arith.constant 2 : index
    %c40_32 = arith.constant 40 : index
    %30 = vector.load %arg18[%c2_31, %c40_32] : memref<16x128xf32, #tpu.memory_space<vmem>>, vector<1x8xf32>
    tpu.vector_store %arg18[%c2_31, %c40_32], %29 {strides = array<i32>} : memref<16x128xf32, #tpu.memory_space<vmem>>, vector<1x8xf32>,
    %c1_33 = arith.constant 1 : index
    %c56_34 = arith.constant 56 : index
    %31 = vector.load %arg18[%c1_33, %c56_34] : memref<16x128xf32, #tpu.memory_space<vmem>>, vector<1x8xf32>
    tpu.vector_store %arg18[%c1_33, %c56_34], %29 {strides = array<i32>} : memref<16x128xf32, #tpu.memory_space<vmem>>, vector<1x8xf32>,
    %c5 = arith.constant 5 : index
    %c0_35 = arith.constant 0 : index
    %32 = vector.load %arg17[%c5, %c0_35] : memref<64x8xf32, #tpu.memory_space<vmem>>, vector<1x8xf32>
    %c3_36 = arith.constant 3 : index
    %c32_37 = arith.constant 32 : index
    %33 = vector.load %arg18[%c3_36, %c32_37] : memref<16x128xf32, #tpu.memory_space<vmem>>, vector<1x8xf32>
    tpu.vector_store %arg18[%c3_36, %c32_37], %32 {strides = array<i32>} : memref<16x128xf32, #tpu.memory_space<vmem>>, vector<1x8xf32>,
    %c2_38 = arith.constant 2 : index
    %c48_39 = arith.constant 48 : index
    %34 = vector.load %arg18[%c2_38, %c48_39] : memref<16x128xf32, #tpu.memory_space<vmem>>, vector<1x8xf32>
    tpu.vector_store %arg18[%c2_38, %c48_39], %32 {strides = array<i32>} : memref<16x128xf32, #tpu.memory_space<vmem>>, vector<1x8xf32>,
    %c6 = arith.constant 6 : index
    %c0_40 = arith.constant 0 : index
    %35 = vector.load %arg17[%c6, %c0_40] : memref<64x8xf32, #tpu.memory_space<vmem>>, vector<1x8xf32>
    %c3_41 = arith.constant 3 : index
    %c40_42 = arith.constant 40 : index
    %36 = vector.load %arg18[%c3_41, %c40_42] : memref<16x128xf32, #tpu.memory_space<vmem>>, vector<1x8xf32>
    tpu.vector_store %arg18[%c3_41, %c40_42], %35 {strides = array<i32>} : memref<16x128xf32, #tpu.memory_space<vmem>>, vector<1x8xf32>,
    %c2_43 = arith.constant 2 : index
    %c56_44 = arith.constant 56 : index
    %37 = vector.load %arg18[%c2_43, %c56_44] : memref<16x128xf32, #tpu.memory_space<vmem>>, vector<1x8xf32>
    tpu.vector_store %arg18[%c2_43, %c56_44], %35 {strides = array<i32>} : memref<16x128xf32, #tpu.memory_space<vmem>>, vector<1x8xf32>,
    %c7 = arith.constant 7 : index
    %c0_45 = arith.constant 0 : index
    %38 = vector.load %arg17[%c7, %c0_45] : memref<64x8xf32, #tpu.memory_space<vmem>>, vector<1x8xf32>
    %c3_46 = arith.constant 3 : index
    %c48_47 = arith.constant 48 : index
    %39 = vector.load %arg18[%c3_46, %c48_47] : memref<16x128xf32, #tpu.memory_space<vmem>>, vector<1x8xf32>
    tpu.vector_store %arg18[%c3_46, %c48_47], %38 {strides = array<i32>} : memref<16x128xf32, #tpu.memory_space<vmem>>, vector<1x8xf32>,
    %c8 = arith.constant 8 : index
    %c0_48 = arith.constant 0 : index
    %40 = vector.load %arg17[%c8, %c0_48] : memref<64x8xf32, #tpu.memory_space<vmem>>, vector<1x8xf32>
    %c4_49 = arith.constant 4 : index
    %c8_50 = arith.constant 8 : index
    %41 = vector.load %arg18[%c4_49, %c8_50] : memref<16x128xf32, #tpu.memory_space<vmem>>, vector<1x8xf32>
    tpu.vector_store %arg18[%c4_49, %c8_50], %40 {strides = array<i32>} : memref<16x128xf32, #tpu.memory_space<vmem>>, vector<1x8xf32>,
    %c0_51 = arith.constant 0 : index
    %c72 = arith.constant 72 : index
    %42 = vector.load %arg18[%c0_51, %c72] : memref<16x128xf32, #tpu.memory_space<vmem>>, vector<1x8xf32>
    tpu.vector_store %arg18[%c0_51, %c72], %40 {strides = array<i32>} : memref<16x128xf32, #tpu.memory_space<vmem>>, vector<1x8xf32>,
    %c9 = arith.constant 9 : index
    %c0_52 = arith.constant 0 : index
    %43 = vector.load %arg17[%c9, %c0_52] : memref<64x8xf32, #tpu.memory_space<vmem>>, vector<1x8xf32>
    %c5_53 = arith.constant 5 : index
    %c0_54 = arith.constant 0 : index
    %44 = vector.load %arg18[%c5_53, %c0_54] : memref<16x128xf32, #tpu.memory_space<vmem>>, vector<1x8xf32>
    tpu.vector_store %arg18[%c5_53, %c0_54], %43 {strides = array<i32>} : memref<16x128xf32, #tpu.memory_space<vmem>>, vector<1x8xf32>,
    %c4_55 = arith.constant 4 : index
    %c16 = arith.constant 16 : index
    %45 = vector.load %arg18[%c4_55, %c16] : memref<16x128xf32, #tpu.memory_space<vmem>>, vector<1x8xf32>
    tpu.vector_store %arg18[%c4_55, %c16], %43 {strides = array<i32>} : memref<16x128xf32, #tpu.memory_space<vmem>>, vector<1x8xf32>,
    %c1_56 = arith.constant 1 : index
    %c64 = arith.constant 64 : index
    %46 = vector.load %arg18[%c1_56, %c64] : memref<16x128xf32, #tpu.memory_space<vmem>>, vector<1x8xf32>
    tpu.vector_store %arg18[%c1_56, %c64], %43 {strides = array<i32>} : memref<16x128xf32, #tpu.memory_space<vmem>>, vector<1x8xf32>,
    %c0_57 = arith.constant 0 : index
    %c80 = arith.constant 80 : index
    %47 = vector.load %arg18[%c0_57, %c80] : memref<16x128xf32, #tpu.memory_space<vmem>>, vector<1x8xf32>
    tpu.vector_store %arg18[%c0_57, %c80], %43 {strides = array<i32>} : memref<16x128xf32, #tpu.memory_space<vmem>>, vector<1x8xf32>,
    %c10 = arith.constant 10 : index
    %c0_58 = arith.constant 0 : index
    %48 = vector.load %arg17[%c10, %c0_58] : memref<64x8xf32, #tpu.memory_space<vmem>>, vector<1x8xf32>
    %c5_59 = arith.constant 5 : index
    %c8_60 = arith.constant 8 : index
    %49 = vector.load %arg18[%c5_59, %c8_60] : memref<16x128xf32, #tpu.memory_space<vmem>>, vector<1x8xf32>
    tpu.vector_store %arg18[%c5_59, %c8_60], %48 {strides = array<i32>} : memref<16x128xf32, #tpu.memory_space<vmem>>, vector<1x8xf32>,
    %c4_61 = arith.constant 4 : index
    %c24 = arith.constant 24 : index
    %50 = vector.load %arg18[%c4_61, %c24] : memref<16x128xf32, #tpu.memory_space<vmem>>, vector<1x8xf32>
    tpu.vector_store %arg18[%c4_61, %c24], %48 {strides = array<i32>} : memref<16x128xf32, #tpu.memory_space<vmem>>, vector<1x8xf32>,
    %c1_62 = arith.constant 1 : index
    %c72_63 = arith.constant 72 : index
    %51 = vector.load %arg18[%c1_62, %c72_63] : memref<16x128xf32, #tpu.memory_space<vmem>>, vector<1x8xf32>
    tpu.vector_store %arg18[%c1_62, %c72_63], %48 {strides = array<i32>} : memref<16x128xf32, #tpu.memory_space<vmem>>, vector<1x8xf32>,
    %c0_64 = arith.constant 0 : index
    %c88 = arith.constant 88 : index
    %52 = vector.load %arg18[%c0_64, %c88] : memref<16x128xf32, #tpu.memory_space<vmem>>, vector<1x8xf32>
    tpu.vector_store %arg18[%c0_64, %c88], %48 {strides = array<i32>} : memref<16x128xf32, #tpu.memory_space<vmem>>, vector<1x8xf32>,
    %c11 = arith.constant 11 : index
    %c0_65 = arith.constant 0 : index
    %53 = vector.load %arg17[%c11, %c0_65] : memref<64x8xf32, #tpu.memory_space<vmem>>, vector<1x8xf32>
    %c6_66 = arith.constant 6 : index
    %c0_67 = arith.constant 0 : index
    %54 = vector.load %arg18[%c6_66, %c0_67] : memref<16x128xf32, #tpu.memory_space<vmem>>, vector<1x8xf32>
    tpu.vector_store %arg18[%c6_66, %c0_67], %53 {strides = array<i32>} : memref<16x128xf32, #tpu.memory_space<vmem>>, vector<1x8xf32>,
    %c5_68 = arith.constant 5 : index
    %c16_69 = arith.constant 16 : index
    %55 = vector.load %arg18[%c5_68, %c16_69] : memref<16x128xf32, #tpu.memory_space<vmem>>, vector<1x8xf32>
    tpu.vector_store %arg18[%c5_68, %c16_69], %53 {strides = array<i32>} : memref<16x128xf32, #tpu.memory_space<vmem>>, vector<1x8xf32>,
    %c2_70 = arith.constant 2 : index
    %c64_71 = arith.constant 64 : index
    %56 = vector.load %arg18[%c2_70, %c64_71] : memref<16x128xf32, #tpu.memory_space<vmem>>, vector<1x8xf32>
    tpu.vector_store %arg18[%c2_70, %c64_71], %53 {strides = array<i32>} : memref<16x128xf32, #tpu.memory_space<vmem>>, vector<1x8xf32>,
    %c1_72 = arith.constant 1 : index
    %c80_73 = arith.constant 80 : index
    %57 = vector.load %arg18[%c1_72, %c80_73] : memref<16x128xf32, #tpu.memory_space<vmem>>, vector<1x8xf32>
    tpu.vector_store %arg18[%c1_72, %c80_73], %53 {strides = array<i32>} : memref<16x128xf32, #tpu.memory_space<vmem>>, vector<1x8xf32>,
    %c12 = arith.constant 12 : index
    %c0_74 = arith.constant 0 : index
    %58 = vector.load %arg17[%c12, %c0_74] : memref<64x8xf32, #tpu.memory_space<vmem>>, vector<1x8xf32>
    %c6_75 = arith.constant 6 : index
    %c8_76 = arith.constant 8 : index
    %59 = vector.load %arg18[%c6_75, %c8_76] : memref<16x128xf32, #tpu.memory_space<vmem>>, vector<1x8xf32>
    tpu.vector_store %arg18[%c6_75, %c8_76], %58 {strides = array<i32>} : memref<16x128xf32, #tpu.memory_space<vmem>>, vector<1x8xf32>,
    %c5_77 = arith.constant 5 : index
    %c24_78 = arith.constant 24 : index
    %60 = vector.load %arg18[%c5_77, %c24_78] : memref<16x128xf32, #tpu.memory_space<vmem>>, vector<1x8xf32>
    tpu.vector_store %arg18[%c5_77, %c24_78], %58 {strides = array<i32>} : memref<16x128xf32, #tpu.memory_space<vmem>>, vector<1x8xf32>,
    %c2_79 = arith.constant 2 : index
    %c72_80 = arith.constant 72 : index
    %61 = vector.load %arg18[%c2_79, %c72_80] : memref<16x128xf32, #tpu.memory_space<vmem>>, vector<1x8xf32>
    tpu.vector_store %arg18[%c2_79, %c72_80], %58 {strides = array<i32>} : memref<16x128xf32, #tpu.memory_space<vmem>>, vector<1x8xf32>,
    %c1_81 = arith.constant 1 : index
    %c88_82 = arith.constant 88 : index
    %62 = vector.load %arg18[%c1_81, %c88_82] : memref<16x128xf32, #tpu.memory_space<vmem>>, vector<1x8xf32>
    tpu.vector_store %arg18[%c1_81, %c88_82], %58 {strides = array<i32>} : memref<16x128xf32, #tpu.memory_space<vmem>>, vector<1x8xf32>,
    %c13 = arith.constant 13 : index
    %c0_83 = arith.constant 0 : index
    %63 = vector.load %arg17[%c13, %c0_83] : memref<64x8xf32, #tpu.memory_space<vmem>>, vector<1x8xf32>
    %c7_84 = arith.constant 7 : index
    %c0_85 = arith.constant 0 : index
    %64 = vector.load %arg18[%c7_84, %c0_85] : memref<16x128xf32, #tpu.memory_space<vmem>>, vector<1x8xf32>
    tpu.vector_store %arg18[%c7_84, %c0_85], %63 {strides = array<i32>} : memref<16x128xf32, #tpu.memory_space<vmem>>, vector<1x8xf32>,
    %c6_86 = arith.constant 6 : index
    %c16_87 = arith.constant 16 : index
    %65 = vector.load %arg18[%c6_86, %c16_87] : memref<16x128xf32, #tpu.memory_space<vmem>>, vector<1x8xf32>
    tpu.vector_store %arg18[%c6_86, %c16_87], %63 {strides = array<i32>} : memref<16x128xf32, #tpu.memory_space<vmem>>, vector<1x8xf32>,
    %c3_88 = arith.constant 3 : index
    %c64_89 = arith.constant 64 : index
    %66 = vector.load %arg18[%c3_88, %c64_89] : memref<16x128xf32, #tpu.memory_space<vmem>>, vector<1x8xf32>
    tpu.vector_store %arg18[%c3_88, %c64_89], %63 {strides = array<i32>} : memref<16x128xf32, #tpu.memory_space<vmem>>, vector<1x8xf32>,
    %c2_90 = arith.constant 2 : index
    %c80_91 = arith.constant 80 : index
    %67 = vector.load %arg18[%c2_90, %c80_91] : memref<16x128xf32, #tpu.memory_space<vmem>>, vector<1x8xf32>
    tpu.vector_store %arg18[%c2_90, %c80_91], %63 {strides = array<i32>} : memref<16x128xf32, #tpu.memory_space<vmem>>, vector<1x8xf32>,
    %c14 = arith.constant 14 : index
    %c0_92 = arith.constant 0 : index
    %68 = vector.load %arg17[%c14, %c0_92] : memref<64x8xf32, #tpu.memory_space<vmem>>, vector<1x8xf32>
    %c7_93 = arith.constant 7 : index
    %c8_94 = arith.constant 8 : index
    %69 = vector.load %arg18[%c7_93, %c8_94] : memref<16x128xf32, #tpu.memory_space<vmem>>, vector<1x8xf32>
    tpu.vector_store %arg18[%c7_93, %c8_94], %68 {strides = array<i32>} : memref<16x128xf32, #tpu.memory_space<vmem>>, vector<1x8xf32>,
    %c6_95 = arith.constant 6 : index
    %c24_96 = arith.constant 24 : index
    %70 = vector.load %arg18[%c6_95, %c24_96] : memref<16x128xf32, #tpu.memory_space<vmem>>, vector<1x8xf32>
    tpu.vector_store %arg18[%c6_95, %c24_96], %68 {strides = array<i32>} : memref<16x128xf32, #tpu.memory_space<vmem>>, vector<1x8xf32>,
    %c3_97 = arith.constant 3 : index
    %c72_98 = arith.constant 72 : index
    %71 = vector.load %arg18[%c3_97, %c72_98] : memref<16x128xf32, #tpu.memory_space<vmem>>, vector<1x8xf32>
    tpu.vector_store %arg18[%c3_97, %c72_98], %68 {strides = array<i32>} : memref<16x128xf32, #tpu.memory_space<vmem>>, vector<1x8xf32>,
    %c2_99 = arith.constant 2 : index
    %c88_100 = arith.constant 88 : index
    %72 = vector.load %arg18[%c2_99, %c88_100] : memref<16x128xf32, #tpu.memory_space<vmem>>, vector<1x8xf32>
    tpu.vector_store %arg18[%c2_99, %c88_100], %68 {strides = array<i32>} : memref<16x128xf32, #tpu.memory_space<vmem>>, vector<1x8xf32>,
    %c15 = arith.constant 15 : index
    %c0_101 = arith.constant 0 : index
    %73 = vector.load %arg17[%c15, %c0_101] : memref<64x8xf32, #tpu.memory_space<vmem>>, vector<1x8xf32>
    %c7_102 = arith.constant 7 : index
    %c16_103 = arith.constant 16 : index
    %74 = vector.load %arg18[%c7_102, %c16_103] : memref<16x128xf32, #tpu.memory_space<vmem>>, vector<1x8xf32>
    tpu.vector_store %arg18[%c7_102, %c16_103], %73 {strides = array<i32>} : memref<16x128xf32, #tpu.memory_space<vmem>>, vector<1x8xf32>,
    %c3_104 = arith.constant 3 : index
    %c80_105 = arith.constant 80 : index
    %75 = vector.load %arg18[%c3_104, %c80_105] : memref<16x128xf32, #tpu.memory_space<vmem>>, vector<1x8xf32>
    tpu.vector_store %arg18[%c3_104, %c80_105], %73 {strides = array<i32>} : memref<16x128xf32, #tpu.memory_space<vmem>>, vector<1x8xf32>,
    %c16_106 = arith.constant 16 : index
    %c0_107 = arith.constant 0 : index
    %76 = vector.load %arg17[%c16_106, %c0_107] : memref<64x8xf32, #tpu.memory_space<vmem>>, vector<1x8xf32>
    %c4_108 = arith.constant 4 : index
    %c40_109 = arith.constant 40 : index
    %77 = vector.load %arg18[%c4_108, %c40_109] : memref<16x128xf32, #tpu.memory_space<vmem>>, vector<1x8xf32>
    tpu.vector_store %arg18[%c4_108, %c40_109], %76 {strides = array<i32>} : memref<16x128xf32, #tpu.memory_space<vmem>>, vector<1x8xf32>,
    %c0_110 = arith.constant 0 : index
    %c104 = arith.constant 104 : index
    %78 = vector.load %arg18[%c0_110, %c104] : memref<16x128xf32, #tpu.memory_space<vmem>>, vector<1x8xf32>
    tpu.vector_store %arg18[%c0_110, %c104], %76 {strides = array<i32>} : memref<16x128xf32, #tpu.memory_space<vmem>>, vector<1x8xf32>,
    %c17 = arith.constant 17 : index
    %c0_111 = arith.constant 0 : index
    %79 = vector.load %arg17[%c17, %c0_111] : memref<64x8xf32, #tpu.memory_space<vmem>>, vector<1x8xf32>
    %c5_112 = arith.constant 5 : index
    %c32_113 = arith.constant 32 : index
    %80 = vector.load %arg18[%c5_112, %c32_113] : memref<16x128xf32, #tpu.memory_space<vmem>>, vector<1x8xf32>
    tpu.vector_store %arg18[%c5_112, %c32_113], %79 {strides = array<i32>} : memref<16x128xf32, #tpu.memory_space<vmem>>, vector<1x8xf32>,
    %c4_114 = arith.constant 4 : index
    %c48_115 = arith.constant 48 : index
    %81 = vector.load %arg18[%c4_114, %c48_115] : memref<16x128xf32, #tpu.memory_space<vmem>>, vector<1x8xf32>
    tpu.vector_store %arg18[%c4_114, %c48_115], %79 {strides = array<i32>} : memref<16x128xf32, #tpu.memory_space<vmem>>, vector<1x8xf32>,
    %c1_116 = arith.constant 1 : index
    %c96 = arith.constant 96 : index
    %82 = vector.load %arg18[%c1_116, %c96] : memref<16x128xf32, #tpu.memory_space<vmem>>, vector<1x8xf32>
    tpu.vector_store %arg18[%c1_116, %c96], %79 {strides = array<i32>} : memref<16x128xf32, #tpu.memory_space<vmem>>, vector<1x8xf32>,
    %c0_117 = arith.constant 0 : index
    %c112 = arith.constant 112 : index
    %83 = vector.load %arg18[%c0_117, %c112] : memref<16x128xf32, #tpu.memory_space<vmem>>, vector<1x8xf32>
    tpu.vector_store %arg18[%c0_117, %c112], %79 {strides = array<i32>} : memref<16x128xf32, #tpu.memory_space<vmem>>, vector<1x8xf32>,
    %c18 = arith.constant 18 : index
    %c0_118 = arith.constant 0 : index
    %84 = vector.load %arg17[%c18, %c0_118] : memref<64x8xf32, #tpu.memory_space<vmem>>, vector<1x8xf32>
    %c5_119 = arith.constant 5 : index
    %c40_120 = arith.constant 40 : index
    %85 = vector.load %arg18[%c5_119, %c40_120] : memref<16x128xf32, #tpu.memory_space<vmem>>, vector<1x8xf32>
    tpu.vector_store %arg18[%c5_119, %c40_120], %84 {strides = array<i32>} : memref<16x128xf32, #tpu.memory_space<vmem>>, vector<1x8xf32>,
    %c4_121 = arith.constant 4 : index
    %c56_122 = arith.constant 56 : index
    %86 = vector.load %arg18[%c4_121, %c56_122] : memref<16x128xf32, #tpu.memory_space<vmem>>, vector<1x8xf32>
    tpu.vector_store %arg18[%c4_121, %c56_122], %84 {strides = array<i32>} : memref<16x128xf32, #tpu.memory_space<vmem>>, vector<1x8xf32>,
    %c1_123 = arith.constant 1 : index
    %c104_124 = arith.constant 104 : index
    %87 = vector.load %arg18[%c1_123, %c104_124] : memref<16x128xf32, #tpu.memory_space<vmem>>, vector<1x8xf32>
    tpu.vector_store %arg18[%c1_123, %c104_124], %84 {strides = array<i32>} : memref<16x128xf32, #tpu.memory_space<vmem>>, vector<1x8xf32>,
    %c0_125 = arith.constant 0 : index
    %c120 = arith.constant 120 : index
    %88 = vector.load %arg18[%c0_125, %c120] : memref<16x128xf32, #tpu.memory_space<vmem>>, vector<1x8xf32>
    tpu.vector_store %arg18[%c0_125, %c120], %84 {strides = array<i32>} : memref<16x128xf32, #tpu.memory_space<vmem>>, vector<1x8xf32>,
    %c19 = arith.constant 19 : index
    %c0_126 = arith.constant 0 : index
    %89 = vector.load %arg17[%c19, %c0_126] : memref<64x8xf32, #tpu.memory_space<vmem>>, vector<1x8xf32>
    %c6_127 = arith.constant 6 : index
    %c32_128 = arith.constant 32 : index
    %90 = vector.load %arg18[%c6_127, %c32_128] : memref<16x128xf32, #tpu.memory_space<vmem>>, vector<1x8xf32>
    tpu.vector_store %arg18[%c6_127, %c32_128], %89 {strides = array<i32>} : memref<16x128xf32, #tpu.memory_space<vmem>>, vector<1x8xf32>,
    %c5_129 = arith.constant 5 : index
    %c48_130 = arith.constant 48 : index
    %91 = vector.load %arg18[%c5_129, %c48_130] : memref<16x128xf32, #tpu.memory_space<vmem>>, vector<1x8xf32>
    tpu.vector_store %arg18[%c5_129, %c48_130], %89 {strides = array<i32>} : memref<16x128xf32, #tpu.memory_space<vmem>>, vector<1x8xf32>,
    %c2_131 = arith.constant 2 : index
    %c96_132 = arith.constant 96 : index
    %92 = vector.load %arg18[%c2_131, %c96_132] : memref<16x128xf32, #tpu.memory_space<vmem>>, vector<1x8xf32>
    tpu.vector_store %arg18[%c2_131, %c96_132], %89 {strides = array<i32>} : memref<16x128xf32, #tpu.memory_space<vmem>>, vector<1x8xf32>,
    %c1_133 = arith.constant 1 : index
    %c112_134 = arith.constant 112 : index
    %93 = vector.load %arg18[%c1_133, %c112_134] : memref<16x128xf32, #tpu.memory_space<vmem>>, vector<1x8xf32>
    tpu.vector_store %arg18[%c1_133, %c112_134], %89 {strides = array<i32>} : memref<16x128xf32, #tpu.memory_space<vmem>>, vector<1x8xf32>,
    %c20 = arith.constant 20 : index
    %c0_135 = arith.constant 0 : index
    %94 = vector.load %arg17[%c20, %c0_135] : memref<64x8xf32, #tpu.memory_space<vmem>>, vector<1x8xf32>
    %c6_136 = arith.constant 6 : index
    %c40_137 = arith.constant 40 : index
    %95 = vector.load %arg18[%c6_136, %c40_137] : memref<16x128xf32, #tpu.memory_space<vmem>>, vector<1x8xf32>
    tpu.vector_store %arg18[%c6_136, %c40_137], %94 {strides = array<i32>} : memref<16x128xf32, #tpu.memory_space<vmem>>, vector<1x8xf32>,
    %c5_138 = arith.constant 5 : index
    %c56_139 = arith.constant 56 : index
    %96 = vector.load %arg18[%c5_138, %c56_139] : memref<16x128xf32, #tpu.memory_space<vmem>>, vector<1x8xf32>
    tpu.vector_store %arg18[%c5_138, %c56_139], %94 {strides = array<i32>} : memref<16x128xf32, #tpu.memory_space<vmem>>, vector<1x8xf32>,
    %c2_140 = arith.constant 2 : index
    %c104_141 = arith.constant 104 : index
    %97 = vector.load %arg18[%c2_140, %c104_141] : memref<16x128xf32, #tpu.memory_space<vmem>>, vector<1x8xf32>
    tpu.vector_store %arg18[%c2_140, %c104_141], %94 {strides = array<i32>} : memref<16x128xf32, #tpu.memory_space<vmem>>, vector<1x8xf32>,
    %c1_142 = arith.constant 1 : index
    %c120_143 = arith.constant 120 : index
    %98 = vector.load %arg18[%c1_142, %c120_143] : memref<16x128xf32, #tpu.memory_space<vmem>>, vector<1x8xf32>
    tpu.vector_store %arg18[%c1_142, %c120_143], %94 {strides = array<i32>} : memref<16x128xf32, #tpu.memory_space<vmem>>, vector<1x8xf32>,
    %c21 = arith.constant 21 : index
    %c0_144 = arith.constant 0 : index
    %99 = vector.load %arg17[%c21, %c0_144] : memref<64x8xf32, #tpu.memory_space<vmem>>, vector<1x8xf32>
    %c7_145 = arith.constant 7 : index
    %c32_146 = arith.constant 32 : index
    %100 = vector.load %arg18[%c7_145, %c32_146] : memref<16x128xf32, #tpu.memory_space<vmem>>, vector<1x8xf32>
    tpu.vector_store %arg18[%c7_145, %c32_146], %99 {strides = array<i32>} : memref<16x128xf32, #tpu.memory_space<vmem>>, vector<1x8xf32>,
    %c6_147 = arith.constant 6 : index
    %c48_148 = arith.constant 48 : index
    %101 = vector.load %arg18[%c6_147, %c48_148] : memref<16x128xf32, #tpu.memory_space<vmem>>, vector<1x8xf32>
    tpu.vector_store %arg18[%c6_147, %c48_148], %99 {strides = array<i32>} : memref<16x128xf32, #tpu.memory_space<vmem>>, vector<1x8xf32>,
    %c3_149 = arith.constant 3 : index
    %c96_150 = arith.constant 96 : index
    %102 = vector.load %arg18[%c3_149, %c96_150] : memref<16x128xf32, #tpu.memory_space<vmem>>, vector<1x8xf32>
    tpu.vector_store %arg18[%c3_149, %c96_150], %99 {strides = array<i32>} : memref<16x128xf32, #tpu.memory_space<vmem>>, vector<1x8xf32>,
    %c2_151 = arith.constant 2 : index
    %c112_152 = arith.constant 112 : index
    %103 = vector.load %arg18[%c2_151, %c112_152] : memref<16x128xf32, #tpu.memory_space<vmem>>, vector<1x8xf32>
    tpu.vector_store %arg18[%c2_151, %c112_152], %99 {strides = array<i32>} : memref<16x128xf32, #tpu.memory_space<vmem>>, vector<1x8xf32>,
    %c22 = arith.constant 22 : index
    %c0_153 = arith.constant 0 : index
    %104 = vector.load %arg17[%c22, %c0_153] : memref<64x8xf32, #tpu.memory_space<vmem>>, vector<1x8xf32>
    %c7_154 = arith.constant 7 : index
    %c40_155 = arith.constant 40 : index
    %105 = vector.load %arg18[%c7_154, %c40_155] : memref<16x128xf32, #tpu.memory_space<vmem>>, vector<1x8xf32>
    tpu.vector_store %arg18[%c7_154, %c40_155], %104 {strides = array<i32>} : memref<16x128xf32, #tpu.memory_space<vmem>>, vector<1x8xf32>,
    %c6_156 = arith.constant 6 : index
    %c56_157 = arith.constant 56 : index
    %106 = vector.load %arg18[%c6_156, %c56_157] : memref<16x128xf32, #tpu.memory_space<vmem>>, vector<1x8xf32>
    tpu.vector_store %arg18[%c6_156, %c56_157], %104 {strides = array<i32>} : memref<16x128xf32, #tpu.memory_space<vmem>>, vector<1x8xf32>,
    %c3_158 = arith.constant 3 : index
    %c104_159 = arith.constant 104 : index
    %107 = vector.load %arg18[%c3_158, %c104_159] : memref<16x128xf32, #tpu.memory_space<vmem>>, vector<1x8xf32>
    tpu.vector_store %arg18[%c3_158, %c104_159], %104 {strides = array<i32>} : memref<16x128xf32, #tpu.memory_space<vmem>>, vector<1x8xf32>,
    %c2_160 = arith.constant 2 : index
    %c120_161 = arith.constant 120 : index
    %108 = vector.load %arg18[%c2_160, %c120_161] : memref<16x128xf32, #tpu.memory_space<vmem>>, vector<1x8xf32>
    tpu.vector_store %arg18[%c2_160, %c120_161], %104 {strides = array<i32>} : memref<16x128xf32, #tpu.memory_space<vmem>>, vector<1x8xf32>,
    %c23 = arith.constant 23 : index
    %c0_162 = arith.constant 0 : index
    %109 = vector.load %arg17[%c23, %c0_162] : memref<64x8xf32, #tpu.memory_space<vmem>>, vector<1x8xf32>
    %c7_163 = arith.constant 7 : index
    %c48_164 = arith.constant 48 : index
    %110 = vector.load %arg18[%c7_163, %c48_164] : memref<16x128xf32, #tpu.memory_space<vmem>>, vector<1x8xf32>
    tpu.vector_store %arg18[%c7_163, %c48_164], %109 {strides = array<i32>} : memref<16x128xf32, #tpu.memory_space<vmem>>, vector<1x8xf32>,
    %c3_165 = arith.constant 3 : index
    %c112_166 = arith.constant 112 : index
    %111 = vector.load %arg18[%c3_165, %c112_166] : memref<16x128xf32, #tpu.memory_space<vmem>>, vector<1x8xf32>
    tpu.vector_store %arg18[%c3_165, %c112_166], %109 {strides = array<i32>} : memref<16x128xf32, #tpu.memory_space<vmem>>, vector<1x8xf32>,
    %c24_167 = arith.constant 24 : index
    %c0_168 = arith.constant 0 : index
    %112 = vector.load %arg17[%c24_167, %c0_168] : memref<64x8xf32, #tpu.memory_space<vmem>>, vector<1x8xf32>
    %c8_169 = arith.constant 8 : index
    %c8_170 = arith.constant 8 : index
    %113 = vector.load %arg18[%c8_169, %c8_170] : memref<16x128xf32, #tpu.memory_space<vmem>>, vector<1x8xf32>
    tpu.vector_store %arg18[%c8_169, %c8_170], %112 {strides = array<i32>} : memref<16x128xf32, #tpu.memory_space<vmem>>, vector<1x8xf32>,
    %c4_171 = arith.constant 4 : index
    %c72_172 = arith.constant 72 : index
    %114 = vector.load %arg18[%c4_171, %c72_172] : memref<16x128xf32, #tpu.memory_space<vmem>>, vector<1x8xf32>
    tpu.vector_store %arg18[%c4_171, %c72_172], %112 {strides = array<i32>} : memref<16x128xf32, #tpu.memory_space<vmem>>, vector<1x8xf32>,
    %c25 = arith.constant 25 : index
    %c0_173 = arith.constant 0 : index
    %115 = vector.load %arg17[%c25, %c0_173] : memref<64x8xf32, #tpu.memory_space<vmem>>, vector<1x8xf32>
    %c9_174 = arith.constant 9 : index
    %c0_175 = arith.constant 0 : index
    %116 = vector.load %arg18[%c9_174, %c0_175] : memref<16x128xf32, #tpu.memory_space<vmem>>, vector<1x8xf32>
    tpu.vector_store %arg18[%c9_174, %c0_175], %115 {strides = array<i32>} : memref<16x128xf32, #tpu.memory_space<vmem>>, vector<1x8xf32>,
    %c8_176 = arith.constant 8 : index
    %c16_177 = arith.constant 16 : index
    %117 = vector.load %arg18[%c8_176, %c16_177] : memref<16x128xf32, #tpu.memory_space<vmem>>, vector<1x8xf32>
    tpu.vector_store %arg18[%c8_176, %c16_177], %115 {strides = array<i32>} : memref<16x128xf32, #tpu.memory_space<vmem>>, vector<1x8xf32>,
    %c5_178 = arith.constant 5 : index
    %c64_179 = arith.constant 64 : index
    %118 = vector.load %arg18[%c5_178, %c64_179] : memref<16x128xf32, #tpu.memory_space<vmem>>, vector<1x8xf32>
    tpu.vector_store %arg18[%c5_178, %c64_179], %115 {strides = array<i32>} : memref<16x128xf32, #tpu.memory_space<vmem>>, vector<1x8xf32>,
    %c4_180 = arith.constant 4 : index
    %c80_181 = arith.constant 80 : index
    %119 = vector.load %arg18[%c4_180, %c80_181] : memref<16x128xf32, #tpu.memory_space<vmem>>, vector<1x8xf32>
    tpu.vector_store %arg18[%c4_180, %c80_181], %115 {strides = array<i32>} : memref<16x128xf32, #tpu.memory_space<vmem>>, vector<1x8xf32>,
    %c26 = arith.constant 26 : index
    %c0_182 = arith.constant 0 : index
    %120 = vector.load %arg17[%c26, %c0_182] : memref<64x8xf32, #tpu.memory_space<vmem>>, vector<1x8xf32>
    %c9_183 = arith.constant 9 : index
    %c8_184 = arith.constant 8 : index
    %121 = vector.load %arg18[%c9_183, %c8_184] : memref<16x128xf32, #tpu.memory_space<vmem>>, vector<1x8xf32>
    tpu.vector_store %arg18[%c9_183, %c8_184], %120 {strides = array<i32>} : memref<16x128xf32, #tpu.memory_space<vmem>>, vector<1x8xf32>,
    %c8_185 = arith.constant 8 : index
    %c24_186 = arith.constant 24 : index
    %122 = vector.load %arg18[%c8_185, %c24_186] : memref<16x128xf32, #tpu.memory_space<vmem>>, vector<1x8xf32>
    tpu.vector_store %arg18[%c8_185, %c24_186], %120 {strides = array<i32>} : memref<16x128xf32, #tpu.memory_space<vmem>>, vector<1x8xf32>,
    %c5_187 = arith.constant 5 : index
    %c72_188 = arith.constant 72 : index
    %123 = vector.load %arg18[%c5_187, %c72_188] : memref<16x128xf32, #tpu.memory_space<vmem>>, vector<1x8xf32>
    tpu.vector_store %arg18[%c5_187, %c72_188], %120 {strides = array<i32>} : memref<16x128xf32, #tpu.memory_space<vmem>>, vector<1x8xf32>,
    %c4_189 = arith.constant 4 : index
    %c88_190 = arith.constant 88 : index
    %124 = vector.load %arg18[%c4_189, %c88_190] : memref<16x128xf32, #tpu.memory_space<vmem>>, vector<1x8xf32>
    tpu.vector_store %arg18[%c4_189, %c88_190], %120 {strides = array<i32>} : memref<16x128xf32, #tpu.memory_space<vmem>>, vector<1x8xf32>,
    %c27 = arith.constant 27 : index
    %c0_191 = arith.constant 0 : index
    %125 = vector.load %arg17[%c27, %c0_191] : memref<64x8xf32, #tpu.memory_space<vmem>>, vector<1x8xf32>
    %c10_192 = arith.constant 10 : index
    %c0_193 = arith.constant 0 : index
    %126 = vector.load %arg18[%c10_192, %c0_193] : memref<16x128xf32, #tpu.memory_space<vmem>>, vector<1x8xf32>
    tpu.vector_store %arg18[%c10_192, %c0_193], %125 {strides = array<i32>} : memref<16x128xf32, #tpu.memory_space<vmem>>, vector<1x8xf32>,
    %c9_194 = arith.constant 9 : index
    %c16_195 = arith.constant 16 : index
    %127 = vector.load %arg18[%c9_194, %c16_195] : memref<16x128xf32, #tpu.memory_space<vmem>>, vector<1x8xf32>
    tpu.vector_store %arg18[%c9_194, %c16_195], %125 {strides = array<i32>} : memref<16x128xf32, #tpu.memory_space<vmem>>, vector<1x8xf32>,
    %c6_196 = arith.constant 6 : index
    %c64_197 = arith.constant 64 : index
    %128 = vector.load %arg18[%c6_196, %c64_197] : memref<16x128xf32, #tpu.memory_space<vmem>>, vector<1x8xf32>
    tpu.vector_store %arg18[%c6_196, %c64_197], %125 {strides = array<i32>} : memref<16x128xf32, #tpu.memory_space<vmem>>, vector<1x8xf32>,
    %c5_198 = arith.constant 5 : index
    %c80_199 = arith.constant 80 : index
    %129 = vector.load %arg18[%c5_198, %c80_199] : memref<16x128xf32, #tpu.memory_space<vmem>>, vector<1x8xf32>
    tpu.vector_store %arg18[%c5_198, %c80_199], %125 {strides = array<i32>} : memref<16x128xf32, #tpu.memory_space<vmem>>, vector<1x8xf32>,
    %c28 = arith.constant 28 : index
    %c0_200 = arith.constant 0 : index
    %130 = vector.load %arg17[%c28, %c0_200] : memref<64x8xf32, #tpu.memory_space<vmem>>, vector<1x8xf32>
    %c10_201 = arith.constant 10 : index
    %c8_202 = arith.constant 8 : index
    %131 = vector.load %arg18[%c10_201, %c8_202] : memref<16x128xf32, #tpu.memory_space<vmem>>, vector<1x8xf32>
    tpu.vector_store %arg18[%c10_201, %c8_202], %130 {strides = array<i32>} : memref<16x128xf32, #tpu.memory_space<vmem>>, vector<1x8xf32>,
    %c9_203 = arith.constant 9 : index
    %c24_204 = arith.constant 24 : index
    %132 = vector.load %arg18[%c9_203, %c24_204] : memref<16x128xf32, #tpu.memory_space<vmem>>, vector<1x8xf32>
    tpu.vector_store %arg18[%c9_203, %c24_204], %130 {strides = array<i32>} : memref<16x128xf32, #tpu.memory_space<vmem>>, vector<1x8xf32>,
    %c6_205 = arith.constant 6 : index
    %c72_206 = arith.constant 72 : index
    %133 = vector.load %arg18[%c6_205, %c72_206] : memref<16x128xf32, #tpu.memory_space<vmem>>, vector<1x8xf32>
    tpu.vector_store %arg18[%c6_205, %c72_206], %130 {strides = array<i32>} : memref<16x128xf32, #tpu.memory_space<vmem>>, vector<1x8xf32>,
    %c5_207 = arith.constant 5 : index
    %c88_208 = arith.constant 88 : index
    %134 = vector.load %arg18[%c5_207, %c88_208] : memref<16x128xf32, #tpu.memory_space<vmem>>, vector<1x8xf32>
    tpu.vector_store %arg18[%c5_207, %c88_208], %130 {strides = array<i32>} : memref<16x128xf32, #tpu.memory_space<vmem>>, vector<1x8xf32>,
    %c29 = arith.constant 29 : index
    %c0_209 = arith.constant 0 : index
    %135 = vector.load %arg17[%c29, %c0_209] : memref<64x8xf32, #tpu.memory_space<vmem>>, vector<1x8xf32>
    %c11_210 = arith.constant 11 : index
    %c0_211 = arith.constant 0 : index
    %136 = vector.load %arg18[%c11_210, %c0_211] : memref<16x128xf32, #tpu.memory_space<vmem>>, vector<1x8xf32>
    tpu.vector_store %arg18[%c11_210, %c0_211], %135 {strides = array<i32>} : memref<16x128xf32, #tpu.memory_space<vmem>>, vector<1x8xf32>,
    %c10_212 = arith.constant 10 : index
    %c16_213 = arith.constant 16 : index
    %137 = vector.load %arg18[%c10_212, %c16_213] : memref<16x128xf32, #tpu.memory_space<vmem>>, vector<1x8xf32>
    tpu.vector_store %arg18[%c10_212, %c16_213], %135 {strides = array<i32>} : memref<16x128xf32, #tpu.memory_space<vmem>>, vector<1x8xf32>,
    %c7_214 = arith.constant 7 : index
    %c64_215 = arith.constant 64 : index
    %138 = vector.load %arg18[%c7_214, %c64_215] : memref<16x128xf32, #tpu.memory_space<vmem>>, vector<1x8xf32>
    tpu.vector_store %arg18[%c7_214, %c64_215], %135 {strides = array<i32>} : memref<16x128xf32, #tpu.memory_space<vmem>>, vector<1x8xf32>,
    %c6_216 = arith.constant 6 : index
    %c80_217 = arith.constant 80 : index
    %139 = vector.load %arg18[%c6_216, %c80_217] : memref<16x128xf32, #tpu.memory_space<vmem>>, vector<1x8xf32>
    tpu.vector_store %arg18[%c6_216, %c80_217], %135 {strides = array<i32>} : memref<16x128xf32, #tpu.memory_space<vmem>>, vector<1x8xf32>,
    %c30 = arith.constant 30 : index
    %c0_218 = arith.constant 0 : index
    %140 = vector.load %arg17[%c30, %c0_218] : memref<64x8xf32, #tpu.memory_space<vmem>>, vector<1x8xf32>
    %c11_219 = arith.constant 11 : index
    %c8_220 = arith.constant 8 : index
    %141 = vector.load %arg18[%c11_219, %c8_220] : memref<16x128xf32, #tpu.memory_space<vmem>>, vector<1x8xf32>
    tpu.vector_store %arg18[%c11_219, %c8_220], %140 {strides = array<i32>} : memref<16x128xf32, #tpu.memory_space<vmem>>, vector<1x8xf32>,
    %c10_221 = arith.constant 10 : index
    %c24_222 = arith.constant 24 : index
    %142 = vector.load %arg18[%c10_221, %c24_222] : memref<16x128xf32, #tpu.memory_space<vmem>>, vector<1x8xf32>
    tpu.vector_store %arg18[%c10_221, %c24_222], %140 {strides = array<i32>} : memref<16x128xf32, #tpu.memory_space<vmem>>, vector<1x8xf32>,
    %c7_223 = arith.constant 7 : index
    %c72_224 = arith.constant 72 : index
    %143 = vector.load %arg18[%c7_223, %c72_224] : memref<16x128xf32, #tpu.memory_space<vmem>>, vector<1x8xf32>
    tpu.vector_store %arg18[%c7_223, %c72_224], %140 {strides = array<i32>} : memref<16x128xf32, #tpu.memory_space<vmem>>, vector<1x8xf32>,
    %c6_225 = arith.constant 6 : index
    %c88_226 = arith.constant 88 : index
    %144 = vector.load %arg18[%c6_225, %c88_226] : memref<16x128xf32, #tpu.memory_space<vmem>>, vector<1x8xf32>
    tpu.vector_store %arg18[%c6_225, %c88_226], %140 {strides = array<i32>} : memref<16x128xf32, #tpu.memory_space<vmem>>, vector<1x8xf32>,
    %c31 = arith.constant 31 : index
    %c0_227 = arith.constant 0 : index
    %145 = vector.load %arg17[%c31, %c0_227] : memref<64x8xf32, #tpu.memory_space<vmem>>, vector<1x8xf32>
    %c11_228 = arith.constant 11 : index
    %c16_229 = arith.constant 16 : index
    %146 = vector.load %arg18[%c11_228, %c16_229] : memref<16x128xf32, #tpu.memory_space<vmem>>, vector<1x8xf32>
    tpu.vector_store %arg18[%c11_228, %c16_229], %145 {strides = array<i32>} : memref<16x128xf32, #tpu.memory_space<vmem>>, vector<1x8xf32>,
    %c7_230 = arith.constant 7 : index
    %c80_231 = arith.constant 80 : index
    %147 = vector.load %arg18[%c7_230, %c80_231] : memref<16x128xf32, #tpu.memory_space<vmem>>, vector<1x8xf32>
    tpu.vector_store %arg18[%c7_230, %c80_231], %145 {strides = array<i32>} : memref<16x128xf32, #tpu.memory_space<vmem>>, vector<1x8xf32>,
    %c32_232 = arith.constant 32 : index
    %c0_233 = arith.constant 0 : index
    %148 = vector.load %arg17[%c32_232, %c0_233] : memref<64x8xf32, #tpu.memory_space<vmem>>, vector<1x8xf32>
    %c8_234 = arith.constant 8 : index
    %c40_235 = arith.constant 40 : index
    %149 = vector.load %arg18[%c8_234, %c40_235] : memref<16x128xf32, #tpu.memory_space<vmem>>, vector<1x8xf32>
    tpu.vector_store %arg18[%c8_234, %c40_235], %148 {strides = array<i32>} : memref<16x128xf32, #tpu.memory_space<vmem>>, vector<1x8xf32>,
    %c4_236 = arith.constant 4 : index
    %c104_237 = arith.constant 104 : index
    %150 = vector.load %arg18[%c4_236, %c104_237] : memref<16x128xf32, #tpu.memory_space<vmem>>, vector<1x8xf32>
    tpu.vector_store %arg18[%c4_236, %c104_237], %148 {strides = array<i32>} : memref<16x128xf32, #tpu.memory_space<vmem>>, vector<1x8xf32>,
    %c33 = arith.constant 33 : index
    %c0_238 = arith.constant 0 : index
    %151 = vector.load %arg17[%c33, %c0_238] : memref<64x8xf32, #tpu.memory_space<vmem>>, vector<1x8xf32>
    %c9_239 = arith.constant 9 : index
    %c32_240 = arith.constant 32 : index
    %152 = vector.load %arg18[%c9_239, %c32_240] : memref<16x128xf32, #tpu.memory_space<vmem>>, vector<1x8xf32>
    tpu.vector_store %arg18[%c9_239, %c32_240], %151 {strides = array<i32>} : memref<16x128xf32, #tpu.memory_space<vmem>>, vector<1x8xf32>,
    %c8_241 = arith.constant 8 : index
    %c48_242 = arith.constant 48 : index
    %153 = vector.load %arg18[%c8_241, %c48_242] : memref<16x128xf32, #tpu.memory_space<vmem>>, vector<1x8xf32>
    tpu.vector_store %arg18[%c8_241, %c48_242], %151 {strides = array<i32>} : memref<16x128xf32, #tpu.memory_space<vmem>>, vector<1x8xf32>,
    %c5_243 = arith.constant 5 : index
    %c96_244 = arith.constant 96 : index
    %154 = vector.load %arg18[%c5_243, %c96_244] : memref<16x128xf32, #tpu.memory_space<vmem>>, vector<1x8xf32>
    tpu.vector_store %arg18[%c5_243, %c96_244], %151 {strides = array<i32>} : memref<16x128xf32, #tpu.memory_space<vmem>>, vector<1x8xf32>,
    %c4_245 = arith.constant 4 : index
    %c112_246 = arith.constant 112 : index
    %155 = vector.load %arg18[%c4_245, %c112_246] : memref<16x128xf32, #tpu.memory_space<vmem>>, vector<1x8xf32>
    tpu.vector_store %arg18[%c4_245, %c112_246], %151 {strides = array<i32>} : memref<16x128xf32, #tpu.memory_space<vmem>>, vector<1x8xf32>,
    %c34 = arith.constant 34 : index
    %c0_247 = arith.constant 0 : index
    %156 = vector.load %arg17[%c34, %c0_247] : memref<64x8xf32, #tpu.memory_space<vmem>>, vector<1x8xf32>
    %c9_248 = arith.constant 9 : index
    %c40_249 = arith.constant 40 : index
    %157 = vector.load %arg18[%c9_248, %c40_249] : memref<16x128xf32, #tpu.memory_space<vmem>>, vector<1x8xf32>
    tpu.vector_store %arg18[%c9_248, %c40_249], %156 {strides = array<i32>} : memref<16x128xf32, #tpu.memory_space<vmem>>, vector<1x8xf32>,
    %c8_250 = arith.constant 8 : index
    %c56_251 = arith.constant 56 : index
    %158 = vector.load %arg18[%c8_250, %c56_251] : memref<16x128xf32, #tpu.memory_space<vmem>>, vector<1x8xf32>
    tpu.vector_store %arg18[%c8_250, %c56_251], %156 {strides = array<i32>} : memref<16x128xf32, #tpu.memory_space<vmem>>, vector<1x8xf32>,
    %c5_252 = arith.constant 5 : index
    %c104_253 = arith.constant 104 : index
    %159 = vector.load %arg18[%c5_252, %c104_253] : memref<16x128xf32, #tpu.memory_space<vmem>>, vector<1x8xf32>
    tpu.vector_store %arg18[%c5_252, %c104_253], %156 {strides = array<i32>} : memref<16x128xf32, #tpu.memory_space<vmem>>, vector<1x8xf32>,
    %c4_254 = arith.constant 4 : index
    %c120_255 = arith.constant 120 : index
    %160 = vector.load %arg18[%c4_254, %c120_255] : memref<16x128xf32, #tpu.memory_space<vmem>>, vector<1x8xf32>
    tpu.vector_store %arg18[%c4_254, %c120_255], %156 {strides = array<i32>} : memref<16x128xf32, #tpu.memory_space<vmem>>, vector<1x8xf32>,
    %c35 = arith.constant 35 : index
    %c0_256 = arith.constant 0 : index
    %161 = vector.load %arg17[%c35, %c0_256] : memref<64x8xf32, #tpu.memory_space<vmem>>, vector<1x8xf32>
    %c10_257 = arith.constant 10 : index
    %c32_258 = arith.constant 32 : index
    %162 = vector.load %arg18[%c10_257, %c32_258] : memref<16x128xf32, #tpu.memory_space<vmem>>, vector<1x8xf32>
    tpu.vector_store %arg18[%c10_257, %c32_258], %161 {strides = array<i32>} : memref<16x128xf32, #tpu.memory_space<vmem>>, vector<1x8xf32>,
    %c9_259 = arith.constant 9 : index
    %c48_260 = arith.constant 48 : index
    %163 = vector.load %arg18[%c9_259, %c48_260] : memref<16x128xf32, #tpu.memory_space<vmem>>, vector<1x8xf32>
    tpu.vector_store %arg18[%c9_259, %c48_260], %161 {strides = array<i32>} : memref<16x128xf32, #tpu.memory_space<vmem>>, vector<1x8xf32>,
    %c6_261 = arith.constant 6 : index
    %c96_262 = arith.constant 96 : index
    %164 = vector.load %arg18[%c6_261, %c96_262] : memref<16x128xf32, #tpu.memory_space<vmem>>, vector<1x8xf32>
    tpu.vector_store %arg18[%c6_261, %c96_262], %161 {strides = array<i32>} : memref<16x128xf32, #tpu.memory_space<vmem>>, vector<1x8xf32>,
    %c5_263 = arith.constant 5 : index
    %c112_264 = arith.constant 112 : index
    %165 = vector.load %arg18[%c5_263, %c112_264] : memref<16x128xf32, #tpu.memory_space<vmem>>, vector<1x8xf32>
    tpu.vector_store %arg18[%c5_263, %c112_264], %161 {strides = array<i32>} : memref<16x128xf32, #tpu.memory_space<vmem>>, vector<1x8xf32>,
    %c36 = arith.constant 36 : index
    %c0_265 = arith.constant 0 : index
    %166 = vector.load %arg17[%c36, %c0_265] : memref<64x8xf32, #tpu.memory_space<vmem>>, vector<1x8xf32>
    %c10_266 = arith.constant 10 : index
    %c40_267 = arith.constant 40 : index
    %167 = vector.load %arg18[%c10_266, %c40_267] : memref<16x128xf32, #tpu.memory_space<vmem>>, vector<1x8xf32>
    tpu.vector_store %arg18[%c10_266, %c40_267], %166 {strides = array<i32>} : memref<16x128xf32, #tpu.memory_space<vmem>>, vector<1x8xf32>,
    %c9_268 = arith.constant 9 : index
    %c56_269 = arith.constant 56 : index
    %168 = vector.load %arg18[%c9_268, %c56_269] : memref<16x128xf32, #tpu.memory_space<vmem>>, vector<1x8xf32>
    tpu.vector_store %arg18[%c9_268, %c56_269], %166 {strides = array<i32>} : memref<16x128xf32, #tpu.memory_space<vmem>>, vector<1x8xf32>,
    %c6_270 = arith.constant 6 : index
    %c104_271 = arith.constant 104 : index
    %169 = vector.load %arg18[%c6_270, %c104_271] : memref<16x128xf32, #tpu.memory_space<vmem>>, vector<1x8xf32>
    tpu.vector_store %arg18[%c6_270, %c104_271], %166 {strides = array<i32>} : memref<16x128xf32, #tpu.memory_space<vmem>>, vector<1x8xf32>,
    %c5_272 = arith.constant 5 : index
    %c120_273 = arith.constant 120 : index
    %170 = vector.load %arg18[%c5_272, %c120_273] : memref<16x128xf32, #tpu.memory_space<vmem>>, vector<1x8xf32>
    tpu.vector_store %arg18[%c5_272, %c120_273], %166 {strides = array<i32>} : memref<16x128xf32, #tpu.memory_space<vmem>>, vector<1x8xf32>,
    %c37 = arith.constant 37 : index
    %c0_274 = arith.constant 0 : index
    %171 = vector.load %arg17[%c37, %c0_274] : memref<64x8xf32, #tpu.memory_space<vmem>>, vector<1x8xf32>
    %c11_275 = arith.constant 11 : index
    %c32_276 = arith.constant 32 : index
    %172 = vector.load %arg18[%c11_275, %c32_276] : memref<16x128xf32, #tpu.memory_space<vmem>>, vector<1x8xf32>
    tpu.vector_store %arg18[%c11_275, %c32_276], %171 {strides = array<i32>} : memref<16x128xf32, #tpu.memory_space<vmem>>, vector<1x8xf32>,
    %c10_277 = arith.constant 10 : index
    %c48_278 = arith.constant 48 : index
    %173 = vector.load %arg18[%c10_277, %c48_278] : memref<16x128xf32, #tpu.memory_space<vmem>>, vector<1x8xf32>
    tpu.vector_store %arg18[%c10_277, %c48_278], %171 {strides = array<i32>} : memref<16x128xf32, #tpu.memory_space<vmem>>, vector<1x8xf32>,
    %c7_279 = arith.constant 7 : index
    %c96_280 = arith.constant 96 : index
    %174 = vector.load %arg18[%c7_279, %c96_280] : memref<16x128xf32, #tpu.memory_space<vmem>>, vector<1x8xf32>
    tpu.vector_store %arg18[%c7_279, %c96_280], %171 {strides = array<i32>} : memref<16x128xf32, #tpu.memory_space<vmem>>, vector<1x8xf32>,
    %c6_281 = arith.constant 6 : index
    %c112_282 = arith.constant 112 : index
    %175 = vector.load %arg18[%c6_281, %c112_282] : memref<16x128xf32, #tpu.memory_space<vmem>>, vector<1x8xf32>
    tpu.vector_store %arg18[%c6_281, %c112_282], %171 {strides = array<i32>} : memref<16x128xf32, #tpu.memory_space<vmem>>, vector<1x8xf32>,
    %c38 = arith.constant 38 : index
    %c0_283 = arith.constant 0 : index
    %176 = vector.load %arg17[%c38, %c0_283] : memref<64x8xf32, #tpu.memory_space<vmem>>, vector<1x8xf32>
    %c11_284 = arith.constant 11 : index
    %c40_285 = arith.constant 40 : index
    %177 = vector.load %arg18[%c11_284, %c40_285] : memref<16x128xf32, #tpu.memory_space<vmem>>, vector<1x8xf32>
    tpu.vector_store %arg18[%c11_284, %c40_285], %176 {strides = array<i32>} : memref<16x128xf32, #tpu.memory_space<vmem>>, vector<1x8xf32>,
    %c10_286 = arith.constant 10 : index
    %c56_287 = arith.constant 56 : index
    %178 = vector.load %arg18[%c10_286, %c56_287] : memref<16x128xf32, #tpu.memory_space<vmem>>, vector<1x8xf32>
    tpu.vector_store %arg18[%c10_286, %c56_287], %176 {strides = array<i32>} : memref<16x128xf32, #tpu.memory_space<vmem>>, vector<1x8xf32>,
    %c7_288 = arith.constant 7 : index
    %c104_289 = arith.constant 104 : index
    %179 = vector.load %arg18[%c7_288, %c104_289] : memref<16x128xf32, #tpu.memory_space<vmem>>, vector<1x8xf32>
    tpu.vector_store %arg18[%c7_288, %c104_289], %176 {strides = array<i32>} : memref<16x128xf32, #tpu.memory_space<vmem>>, vector<1x8xf32>,
    %c6_290 = arith.constant 6 : index
    %c120_291 = arith.constant 120 : index
    %180 = vector.load %arg18[%c6_290, %c120_291] : memref<16x128xf32, #tpu.memory_space<vmem>>, vector<1x8xf32>
    tpu.vector_store %arg18[%c6_290, %c120_291], %176 {strides = array<i32>} : memref<16x128xf32, #tpu.memory_space<vmem>>, vector<1x8xf32>,
    %c39 = arith.constant 39 : index
    %c0_292 = arith.constant 0 : index
    %181 = vector.load %arg17[%c39, %c0_292] : memref<64x8xf32, #tpu.memory_space<vmem>>, vector<1x8xf32>
    %c11_293 = arith.constant 11 : index
    %c48_294 = arith.constant 48 : index
    %182 = vector.load %arg18[%c11_293, %c48_294] : memref<16x128xf32, #tpu.memory_space<vmem>>, vector<1x8xf32>
    tpu.vector_store %arg18[%c11_293, %c48_294], %181 {strides = array<i32>} : memref<16x128xf32, #tpu.memory_space<vmem>>, vector<1x8xf32>,
    %c7_295 = arith.constant 7 : index
    %c112_296 = arith.constant 112 : index
    %183 = vector.load %arg18[%c7_295, %c112_296] : memref<16x128xf32, #tpu.memory_space<vmem>>, vector<1x8xf32>
    tpu.vector_store %arg18[%c7_295, %c112_296], %181 {strides = array<i32>} : memref<16x128xf32, #tpu.memory_space<vmem>>, vector<1x8xf32>,
    %c40_297 = arith.constant 40 : index
    %c0_298 = arith.constant 0 : index
    %184 = vector.load %arg17[%c40_297, %c0_298] : memref<64x8xf32, #tpu.memory_space<vmem>>, vector<1x8xf32>
    %c12_299 = arith.constant 12 : index
    %c8_300 = arith.constant 8 : index
    %185 = vector.load %arg18[%c12_299, %c8_300] : memref<16x128xf32, #tpu.memory_space<vmem>>, vector<1x8xf32>
    tpu.vector_store %arg18[%c12_299, %c8_300], %184 {strides = array<i32>} : memref<16x128xf32, #tpu.memory_space<vmem>>, vector<1x8xf32>,
    %c8_301 = arith.constant 8 : index
    %c72_302 = arith.constant 72 : index
    %186 = vector.load %arg18[%c8_301, %c72_302] : memref<16x128xf32, #tpu.memory_space<vmem>>, vector<1x8xf32>
    tpu.vector_store %arg18[%c8_301, %c72_302], %184 {strides = array<i32>} : memref<16x128xf32, #tpu.memory_space<vmem>>, vector<1x8xf32>,
    %c41 = arith.constant 41 : index
    %c0_303 = arith.constant 0 : index
    %187 = vector.load %arg17[%c41, %c0_303] : memref<64x8xf32, #tpu.memory_space<vmem>>, vector<1x8xf32>
    %c13_304 = arith.constant 13 : index
    %c0_305 = arith.constant 0 : index
    %188 = vector.load %arg18[%c13_304, %c0_305] : memref<16x128xf32, #tpu.memory_space<vmem>>, vector<1x8xf32>
    tpu.vector_store %arg18[%c13_304, %c0_305], %187 {strides = array<i32>} : memref<16x128xf32, #tpu.memory_space<vmem>>, vector<1x8xf32>,
    %c12_306 = arith.constant 12 : index
    %c16_307 = arith.constant 16 : index
    %189 = vector.load %arg18[%c12_306, %c16_307] : memref<16x128xf32, #tpu.memory_space<vmem>>, vector<1x8xf32>
    tpu.vector_store %arg18[%c12_306, %c16_307], %187 {strides = array<i32>} : memref<16x128xf32, #tpu.memory_space<vmem>>, vector<1x8xf32>,
    %c9_308 = arith.constant 9 : index
    %c64_309 = arith.constant 64 : index
    %190 = vector.load %arg18[%c9_308, %c64_309] : memref<16x128xf32, #tpu.memory_space<vmem>>, vector<1x8xf32>
    tpu.vector_store %arg18[%c9_308, %c64_309], %187 {strides = array<i32>} : memref<16x128xf32, #tpu.memory_space<vmem>>, vector<1x8xf32>,
    %c8_310 = arith.constant 8 : index
    %c80_311 = arith.constant 80 : index
    %191 = vector.load %arg18[%c8_310, %c80_311] : memref<16x128xf32, #tpu.memory_space<vmem>>, vector<1x8xf32>
    tpu.vector_store %arg18[%c8_310, %c80_311], %187 {strides = array<i32>} : memref<16x128xf32, #tpu.memory_space<vmem>>, vector<1x8xf32>,
    %c42 = arith.constant 42 : index
    %c0_312 = arith.constant 0 : index
    %192 = vector.load %arg17[%c42, %c0_312] : memref<64x8xf32, #tpu.memory_space<vmem>>, vector<1x8xf32>
    %c13_313 = arith.constant 13 : index
    %c8_314 = arith.constant 8 : index
    %193 = vector.load %arg18[%c13_313, %c8_314] : memref<16x128xf32, #tpu.memory_space<vmem>>, vector<1x8xf32>
    tpu.vector_store %arg18[%c13_313, %c8_314], %192 {strides = array<i32>} : memref<16x128xf32, #tpu.memory_space<vmem>>, vector<1x8xf32>,
    %c12_315 = arith.constant 12 : index
    %c24_316 = arith.constant 24 : index
    %194 = vector.load %arg18[%c12_315, %c24_316] : memref<16x128xf32, #tpu.memory_space<vmem>>, vector<1x8xf32>
    tpu.vector_store %arg18[%c12_315, %c24_316], %192 {strides = array<i32>} : memref<16x128xf32, #tpu.memory_space<vmem>>, vector<1x8xf32>,
    %c9_317 = arith.constant 9 : index
    %c72_318 = arith.constant 72 : index
    %195 = vector.load %arg18[%c9_317, %c72_318] : memref<16x128xf32, #tpu.memory_space<vmem>>, vector<1x8xf32>
    tpu.vector_store %arg18[%c9_317, %c72_318], %192 {strides = array<i32>} : memref<16x128xf32, #tpu.memory_space<vmem>>, vector<1x8xf32>,
    %c8_319 = arith.constant 8 : index
    %c88_320 = arith.constant 88 : index
    %196 = vector.load %arg18[%c8_319, %c88_320] : memref<16x128xf32, #tpu.memory_space<vmem>>, vector<1x8xf32>
    tpu.vector_store %arg18[%c8_319, %c88_320], %192 {strides = array<i32>} : memref<16x128xf32, #tpu.memory_space<vmem>>, vector<1x8xf32>,
    %c43 = arith.constant 43 : index
    %c0_321 = arith.constant 0 : index
    %197 = vector.load %arg17[%c43, %c0_321] : memref<64x8xf32, #tpu.memory_space<vmem>>, vector<1x8xf32>
    %c14_322 = arith.constant 14 : index
    %c0_323 = arith.constant 0 : index
    %198 = vector.load %arg18[%c14_322, %c0_323] : memref<16x128xf32, #tpu.memory_space<vmem>>, vector<1x8xf32>
    tpu.vector_store %arg18[%c14_322, %c0_323], %197 {strides = array<i32>} : memref<16x128xf32, #tpu.memory_space<vmem>>, vector<1x8xf32>,
    %c13_324 = arith.constant 13 : index
    %c16_325 = arith.constant 16 : index
    %199 = vector.load %arg18[%c13_324, %c16_325] : memref<16x128xf32, #tpu.memory_space<vmem>>, vector<1x8xf32>
    tpu.vector_store %arg18[%c13_324, %c16_325], %197 {strides = array<i32>} : memref<16x128xf32, #tpu.memory_space<vmem>>, vector<1x8xf32>,
    %c10_326 = arith.constant 10 : index
    %c64_327 = arith.constant 64 : index
    %200 = vector.load %arg18[%c10_326, %c64_327] : memref<16x128xf32, #tpu.memory_space<vmem>>, vector<1x8xf32>
    tpu.vector_store %arg18[%c10_326, %c64_327], %197 {strides = array<i32>} : memref<16x128xf32, #tpu.memory_space<vmem>>, vector<1x8xf32>,
    %c9_328 = arith.constant 9 : index
    %c80_329 = arith.constant 80 : index
    %201 = vector.load %arg18[%c9_328, %c80_329] : memref<16x128xf32, #tpu.memory_space<vmem>>, vector<1x8xf32>
    tpu.vector_store %arg18[%c9_328, %c80_329], %197 {strides = array<i32>} : memref<16x128xf32, #tpu.memory_space<vmem>>, vector<1x8xf32>,
    %c44 = arith.constant 44 : index
    %c0_330 = arith.constant 0 : index
    %202 = vector.load %arg17[%c44, %c0_330] : memref<64x8xf32, #tpu.memory_space<vmem>>, vector<1x8xf32>
    %c14_331 = arith.constant 14 : index
    %c8_332 = arith.constant 8 : index
    %203 = vector.load %arg18[%c14_331, %c8_332] : memref<16x128xf32, #tpu.memory_space<vmem>>, vector<1x8xf32>
    tpu.vector_store %arg18[%c14_331, %c8_332], %202 {strides = array<i32>} : memref<16x128xf32, #tpu.memory_space<vmem>>, vector<1x8xf32>,
    %c13_333 = arith.constant 13 : index
    %c24_334 = arith.constant 24 : index
    %204 = vector.load %arg18[%c13_333, %c24_334] : memref<16x128xf32, #tpu.memory_space<vmem>>, vector<1x8xf32>
    tpu.vector_store %arg18[%c13_333, %c24_334], %202 {strides = array<i32>} : memref<16x128xf32, #tpu.memory_space<vmem>>, vector<1x8xf32>,
    %c10_335 = arith.constant 10 : index
    %c72_336 = arith.constant 72 : index
    %205 = vector.load %arg18[%c10_335, %c72_336] : memref<16x128xf32, #tpu.memory_space<vmem>>, vector<1x8xf32>
    tpu.vector_store %arg18[%c10_335, %c72_336], %202 {strides = array<i32>} : memref<16x128xf32, #tpu.memory_space<vmem>>, vector<1x8xf32>,
    %c9_337 = arith.constant 9 : index
    %c88_338 = arith.constant 88 : index
    %206 = vector.load %arg18[%c9_337, %c88_338] : memref<16x128xf32, #tpu.memory_space<vmem>>, vector<1x8xf32>
    tpu.vector_store %arg18[%c9_337, %c88_338], %202 {strides = array<i32>} : memref<16x128xf32, #tpu.memory_space<vmem>>, vector<1x8xf32>,
    %c45 = arith.constant 45 : index
    %c0_339 = arith.constant 0 : index
    %207 = vector.load %arg17[%c45, %c0_339] : memref<64x8xf32, #tpu.memory_space<vmem>>, vector<1x8xf32>
    %c15_340 = arith.constant 15 : index
    %c0_341 = arith.constant 0 : index
    %208 = vector.load %arg18[%c15_340, %c0_341] : memref<16x128xf32, #tpu.memory_space<vmem>>, vector<1x8xf32>
    tpu.vector_store %arg18[%c15_340, %c0_341], %207 {strides = array<i32>} : memref<16x128xf32, #tpu.memory_space<vmem>>, vector<1x8xf32>,
    %c14_342 = arith.constant 14 : index
    %c16_343 = arith.constant 16 : index
    %209 = vector.load %arg18[%c14_342, %c16_343] : memref<16x128xf32, #tpu.memory_space<vmem>>, vector<1x8xf32>
    tpu.vector_store %arg18[%c14_342, %c16_343], %207 {strides = array<i32>} : memref<16x128xf32, #tpu.memory_space<vmem>>, vector<1x8xf32>,
    %c11_344 = arith.constant 11 : index
    %c64_345 = arith.constant 64 : index
    %210 = vector.load %arg18[%c11_344, %c64_345] : memref<16x128xf32, #tpu.memory_space<vmem>>, vector<1x8xf32>
    tpu.vector_store %arg18[%c11_344, %c64_345], %207 {strides = array<i32>} : memref<16x128xf32, #tpu.memory_space<vmem>>, vector<1x8xf32>,
    %c10_346 = arith.constant 10 : index
    %c80_347 = arith.constant 80 : index
    %211 = vector.load %arg18[%c10_346, %c80_347] : memref<16x128xf32, #tpu.memory_space<vmem>>, vector<1x8xf32>
    tpu.vector_store %arg18[%c10_346, %c80_347], %207 {strides = array<i32>} : memref<16x128xf32, #tpu.memory_space<vmem>>, vector<1x8xf32>,
    %c46 = arith.constant 46 : index
    %c0_348 = arith.constant 0 : index
    %212 = vector.load %arg17[%c46, %c0_348] : memref<64x8xf32, #tpu.memory_space<vmem>>, vector<1x8xf32>
    %c15_349 = arith.constant 15 : index
    %c8_350 = arith.constant 8 : index
    %213 = vector.load %arg18[%c15_349, %c8_350] : memref<16x128xf32, #tpu.memory_space<vmem>>, vector<1x8xf32>
    tpu.vector_store %arg18[%c15_349, %c8_350], %212 {strides = array<i32>} : memref<16x128xf32, #tpu.memory_space<vmem>>, vector<1x8xf32>,
    %c14_351 = arith.constant 14 : index
    %c24_352 = arith.constant 24 : index
    %214 = vector.load %arg18[%c14_351, %c24_352] : memref<16x128xf32, #tpu.memory_space<vmem>>, vector<1x8xf32>
    tpu.vector_store %arg18[%c14_351, %c24_352], %212 {strides = array<i32>} : memref<16x128xf32, #tpu.memory_space<vmem>>, vector<1x8xf32>,
    %c11_353 = arith.constant 11 : index
    %c72_354 = arith.constant 72 : index
    %215 = vector.load %arg18[%c11_353, %c72_354] : memref<16x128xf32, #tpu.memory_space<vmem>>, vector<1x8xf32>
    tpu.vector_store %arg18[%c11_353, %c72_354], %212 {strides = array<i32>} : memref<16x128xf32, #tpu.memory_space<vmem>>, vector<1x8xf32>,
    %c10_355 = arith.constant 10 : index
    %c88_356 = arith.constant 88 : index
    %216 = vector.load %arg18[%c10_355, %c88_356] : memref<16x128xf32, #tpu.memory_space<vmem>>, vector<1x8xf32>
    tpu.vector_store %arg18[%c10_355, %c88_356], %212 {strides = array<i32>} : memref<16x128xf32, #tpu.memory_space<vmem>>, vector<1x8xf32>,
    %c47 = arith.constant 47 : index
    %c0_357 = arith.constant 0 : index
    %217 = vector.load %arg17[%c47, %c0_357] : memref<64x8xf32, #tpu.memory_space<vmem>>, vector<1x8xf32>
    %c15_358 = arith.constant 15 : index
    %c16_359 = arith.constant 16 : index
    %218 = vector.load %arg18[%c15_358, %c16_359] : memref<16x128xf32, #tpu.memory_space<vmem>>, vector<1x8xf32>
    tpu.vector_store %arg18[%c15_358, %c16_359], %217 {strides = array<i32>} : memref<16x128xf32, #tpu.memory_space<vmem>>, vector<1x8xf32>,
    %c11_360 = arith.constant 11 : index
    %c80_361 = arith.constant 80 : index
    %219 = vector.load %arg18[%c11_360, %c80_361] : memref<16x128xf32, #tpu.memory_space<vmem>>, vector<1x8xf32>
    tpu.vector_store %arg18[%c11_360, %c80_361], %217 {strides = array<i32>} : memref<16x128xf32, #tpu.memory_space<vmem>>, vector<1x8xf32>,
    %c48_362 = arith.constant 48 : index
    %c0_363 = arith.constant 0 : index
    %220 = vector.load %arg17[%c48_362, %c0_363] : memref<64x8xf32, #tpu.memory_space<vmem>>, vector<1x8xf32>
    %c12_364 = arith.constant 12 : index
    %c40_365 = arith.constant 40 : index
    %221 = vector.load %arg18[%c12_364, %c40_365] : memref<16x128xf32, #tpu.memory_space<vmem>>, vector<1x8xf32>
    tpu.vector_store %arg18[%c12_364, %c40_365], %220 {strides = array<i32>} : memref<16x128xf32, #tpu.memory_space<vmem>>, vector<1x8xf32>,
    %c8_366 = arith.constant 8 : index
    %c104_367 = arith.constant 104 : index
    %222 = vector.load %arg18[%c8_366, %c104_367] : memref<16x128xf32, #tpu.memory_space<vmem>>, vector<1x8xf32>
    tpu.vector_store %arg18[%c8_366, %c104_367], %220 {strides = array<i32>} : memref<16x128xf32, #tpu.memory_space<vmem>>, vector<1x8xf32>,
    %c49 = arith.constant 49 : index
    %c0_368 = arith.constant 0 : index
    %223 = vector.load %arg17[%c49, %c0_368] : memref<64x8xf32, #tpu.memory_space<vmem>>, vector<1x8xf32>
    %c13_369 = arith.constant 13 : index
    %c32_370 = arith.constant 32 : index
    %224 = vector.load %arg18[%c13_369, %c32_370] : memref<16x128xf32, #tpu.memory_space<vmem>>, vector<1x8xf32>
    tpu.vector_store %arg18[%c13_369, %c32_370], %223 {strides = array<i32>} : memref<16x128xf32, #tpu.memory_space<vmem>>, vector<1x8xf32>,
    %c12_371 = arith.constant 12 : index
    %c48_372 = arith.constant 48 : index
    %225 = vector.load %arg18[%c12_371, %c48_372] : memref<16x128xf32, #tpu.memory_space<vmem>>, vector<1x8xf32>
    tpu.vector_store %arg18[%c12_371, %c48_372], %223 {strides = array<i32>} : memref<16x128xf32, #tpu.memory_space<vmem>>, vector<1x8xf32>,
    %c9_373 = arith.constant 9 : index
    %c96_374 = arith.constant 96 : index
    %226 = vector.load %arg18[%c9_373, %c96_374] : memref<16x128xf32, #tpu.memory_space<vmem>>, vector<1x8xf32>
    tpu.vector_store %arg18[%c9_373, %c96_374], %223 {strides = array<i32>} : memref<16x128xf32, #tpu.memory_space<vmem>>, vector<1x8xf32>,
    %c8_375 = arith.constant 8 : index
    %c112_376 = arith.constant 112 : index
    %227 = vector.load %arg18[%c8_375, %c112_376] : memref<16x128xf32, #tpu.memory_space<vmem>>, vector<1x8xf32>
    tpu.vector_store %arg18[%c8_375, %c112_376], %223 {strides = array<i32>} : memref<16x128xf32, #tpu.memory_space<vmem>>, vector<1x8xf32>,
    %c50 = arith.constant 50 : index
    %c0_377 = arith.constant 0 : index
    %228 = vector.load %arg17[%c50, %c0_377] : memref<64x8xf32, #tpu.memory_space<vmem>>, vector<1x8xf32>
    %c13_378 = arith.constant 13 : index
    %c40_379 = arith.constant 40 : index
    %229 = vector.load %arg18[%c13_378, %c40_379] : memref<16x128xf32, #tpu.memory_space<vmem>>, vector<1x8xf32>
    tpu.vector_store %arg18[%c13_378, %c40_379], %228 {strides = array<i32>} : memref<16x128xf32, #tpu.memory_space<vmem>>, vector<1x8xf32>,
    %c12_380 = arith.constant 12 : index
    %c56_381 = arith.constant 56 : index
    %230 = vector.load %arg18[%c12_380, %c56_381] : memref<16x128xf32, #tpu.memory_space<vmem>>, vector<1x8xf32>
    tpu.vector_store %arg18[%c12_380, %c56_381], %228 {strides = array<i32>} : memref<16x128xf32, #tpu.memory_space<vmem>>, vector<1x8xf32>,
    %c9_382 = arith.constant 9 : index
    %c104_383 = arith.constant 104 : index
    %231 = vector.load %arg18[%c9_382, %c104_383] : memref<16x128xf32, #tpu.memory_space<vmem>>, vector<1x8xf32>
    tpu.vector_store %arg18[%c9_382, %c104_383], %228 {strides = array<i32>} : memref<16x128xf32, #tpu.memory_space<vmem>>, vector<1x8xf32>,
    %c8_384 = arith.constant 8 : index
    %c120_385 = arith.constant 120 : index
    %232 = vector.load %arg18[%c8_384, %c120_385] : memref<16x128xf32, #tpu.memory_space<vmem>>, vector<1x8xf32>
    tpu.vector_store %arg18[%c8_384, %c120_385], %228 {strides = array<i32>} : memref<16x128xf32, #tpu.memory_space<vmem>>, vector<1x8xf32>,
    %c51 = arith.constant 51 : index
    %c0_386 = arith.constant 0 : index
    %233 = vector.load %arg17[%c51, %c0_386] : memref<64x8xf32, #tpu.memory_space<vmem>>, vector<1x8xf32>
    %c14_387 = arith.constant 14 : index
    %c32_388 = arith.constant 32 : index
    %234 = vector.load %arg18[%c14_387, %c32_388] : memref<16x128xf32, #tpu.memory_space<vmem>>, vector<1x8xf32>
    tpu.vector_store %arg18[%c14_387, %c32_388], %233 {strides = array<i32>} : memref<16x128xf32, #tpu.memory_space<vmem>>, vector<1x8xf32>,
    %c13_389 = arith.constant 13 : index
    %c48_390 = arith.constant 48 : index
    %235 = vector.load %arg18[%c13_389, %c48_390] : memref<16x128xf32, #tpu.memory_space<vmem>>, vector<1x8xf32>
    tpu.vector_store %arg18[%c13_389, %c48_390], %233 {strides = array<i32>} : memref<16x128xf32, #tpu.memory_space<vmem>>, vector<1x8xf32>,
    %c10_391 = arith.constant 10 : index
    %c96_392 = arith.constant 96 : index
    %236 = vector.load %arg18[%c10_391, %c96_392] : memref<16x128xf32, #tpu.memory_space<vmem>>, vector<1x8xf32>
    tpu.vector_store %arg18[%c10_391, %c96_392], %233 {strides = array<i32>} : memref<16x128xf32, #tpu.memory_space<vmem>>, vector<1x8xf32>,
    %c9_393 = arith.constant 9 : index
    %c112_394 = arith.constant 112 : index
    %237 = vector.load %arg18[%c9_393, %c112_394] : memref<16x128xf32, #tpu.memory_space<vmem>>, vector<1x8xf32>
    tpu.vector_store %arg18[%c9_393, %c112_394], %233 {strides = array<i32>} : memref<16x128xf32, #tpu.memory_space<vmem>>, vector<1x8xf32>,
    %c52 = arith.constant 52 : index
    %c0_395 = arith.constant 0 : index
    %238 = vector.load %arg17[%c52, %c0_395] : memref<64x8xf32, #tpu.memory_space<vmem>>, vector<1x8xf32>
    %c14_396 = arith.constant 14 : index
    %c40_397 = arith.constant 40 : index
    %239 = vector.load %arg18[%c14_396, %c40_397] : memref<16x128xf32, #tpu.memory_space<vmem>>, vector<1x8xf32>
    tpu.vector_store %arg18[%c14_396, %c40_397], %238 {strides = array<i32>} : memref<16x128xf32, #tpu.memory_space<vmem>>, vector<1x8xf32>,
    %c13_398 = arith.constant 13 : index
    %c56_399 = arith.constant 56 : index
    %240 = vector.load %arg18[%c13_398, %c56_399] : memref<16x128xf32, #tpu.memory_space<vmem>>, vector<1x8xf32>
    tpu.vector_store %arg18[%c13_398, %c56_399], %238 {strides = array<i32>} : memref<16x128xf32, #tpu.memory_space<vmem>>, vector<1x8xf32>,
    %c10_400 = arith.constant 10 : index
    %c104_401 = arith.constant 104 : index
    %241 = vector.load %arg18[%c10_400, %c104_401] : memref<16x128xf32, #tpu.memory_space<vmem>>, vector<1x8xf32>
    tpu.vector_store %arg18[%c10_400, %c104_401], %238 {strides = array<i32>} : memref<16x128xf32, #tpu.memory_space<vmem>>, vector<1x8xf32>,
    %c9_402 = arith.constant 9 : index
    %c120_403 = arith.constant 120 : index
    %242 = vector.load %arg18[%c9_402, %c120_403] : memref<16x128xf32, #tpu.memory_space<vmem>>, vector<1x8xf32>
    tpu.vector_store %arg18[%c9_402, %c120_403], %238 {strides = array<i32>} : memref<16x128xf32, #tpu.memory_space<vmem>>, vector<1x8xf32>,
    %c53 = arith.constant 53 : index
    %c0_404 = arith.constant 0 : index
    %243 = vector.load %arg17[%c53, %c0_404] : memref<64x8xf32, #tpu.memory_space<vmem>>, vector<1x8xf32>
    %c15_405 = arith.constant 15 : index
    %c32_406 = arith.constant 32 : index
    %244 = vector.load %arg18[%c15_405, %c32_406] : memref<16x128xf32, #tpu.memory_space<vmem>>, vector<1x8xf32>
    tpu.vector_store %arg18[%c15_405, %c32_406], %243 {strides = array<i32>} : memref<16x128xf32, #tpu.memory_space<vmem>>, vector<1x8xf32>,
    %c14_407 = arith.constant 14 : index
    %c48_408 = arith.constant 48 : index
    %245 = vector.load %arg18[%c14_407, %c48_408] : memref<16x128xf32, #tpu.memory_space<vmem>>, vector<1x8xf32>
    tpu.vector_store %arg18[%c14_407, %c48_408], %243 {strides = array<i32>} : memref<16x128xf32, #tpu.memory_space<vmem>>, vector<1x8xf32>,
    %c11_409 = arith.constant 11 : index
    %c96_410 = arith.constant 96 : index
    %246 = vector.load %arg18[%c11_409, %c96_410] : memref<16x128xf32, #tpu.memory_space<vmem>>, vector<1x8xf32>
    tpu.vector_store %arg18[%c11_409, %c96_410], %243 {strides = array<i32>} : memref<16x128xf32, #tpu.memory_space<vmem>>, vector<1x8xf32>,
    %c10_411 = arith.constant 10 : index
    %c112_412 = arith.constant 112 : index
    %247 = vector.load %arg18[%c10_411, %c112_412] : memref<16x128xf32, #tpu.memory_space<vmem>>, vector<1x8xf32>
    tpu.vector_store %arg18[%c10_411, %c112_412], %243 {strides = array<i32>} : memref<16x128xf32, #tpu.memory_space<vmem>>, vector<1x8xf32>,
    %c54 = arith.constant 54 : index
    %c0_413 = arith.constant 0 : index
    %248 = vector.load %arg17[%c54, %c0_413] : memref<64x8xf32, #tpu.memory_space<vmem>>, vector<1x8xf32>
    %c15_414 = arith.constant 15 : index
    %c40_415 = arith.constant 40 : index
    %249 = vector.load %arg18[%c15_414, %c40_415] : memref<16x128xf32, #tpu.memory_space<vmem>>, vector<1x8xf32>
    tpu.vector_store %arg18[%c15_414, %c40_415], %248 {strides = array<i32>} : memref<16x128xf32, #tpu.memory_space<vmem>>, vector<1x8xf32>,
    %c14_416 = arith.constant 14 : index
    %c56_417 = arith.constant 56 : index
    %250 = vector.load %arg18[%c14_416, %c56_417] : memref<16x128xf32, #tpu.memory_space<vmem>>, vector<1x8xf32>
    tpu.vector_store %arg18[%c14_416, %c56_417], %248 {strides = array<i32>} : memref<16x128xf32, #tpu.memory_space<vmem>>, vector<1x8xf32>,
    %c11_418 = arith.constant 11 : index
    %c104_419 = arith.constant 104 : index
    %251 = vector.load %arg18[%c11_418, %c104_419] : memref<16x128xf32, #tpu.memory_space<vmem>>, vector<1x8xf32>
    tpu.vector_store %arg18[%c11_418, %c104_419], %248 {strides = array<i32>} : memref<16x128xf32, #tpu.memory_space<vmem>>, vector<1x8xf32>,
    %c10_420 = arith.constant 10 : index
    %c120_421 = arith.constant 120 : index
    %252 = vector.load %arg18[%c10_420, %c120_421] : memref<16x128xf32, #tpu.memory_space<vmem>>, vector<1x8xf32>
    tpu.vector_store %arg18[%c10_420, %c120_421], %248 {strides = array<i32>} : memref<16x128xf32, #tpu.memory_space<vmem>>, vector<1x8xf32>,
    %c55 = arith.constant 55 : index
    %c0_422 = arith.constant 0 : index
    %253 = vector.load %arg17[%c55, %c0_422] : memref<64x8xf32, #tpu.memory_space<vmem>>, vector<1x8xf32>
    %c15_423 = arith.constant 15 : index
    %c48_424 = arith.constant 48 : index
    %254 = vector.load %arg18[%c15_423, %c48_424] : memref<16x128xf32, #tpu.memory_space<vmem>>, vector<1x8xf32>
    tpu.vector_store %arg18[%c15_423, %c48_424], %253 {strides = array<i32>} : memref<16x128xf32, #tpu.memory_space<vmem>>, vector<1x8xf32>,
    %c11_425 = arith.constant 11 : index
    %c112_426 = arith.constant 112 : index
    %255 = vector.load %arg18[%c11_425, %c112_426] : memref<16x128xf32, #tpu.memory_space<vmem>>, vector<1x8xf32>
    tpu.vector_store %arg18[%c11_425, %c112_426], %253 {strides = array<i32>} : memref<16x128xf32, #tpu.memory_space<vmem>>, vector<1x8xf32>,
    %c56_427 = arith.constant 56 : index
    %c0_428 = arith.constant 0 : index
    %256 = vector.load %arg17[%c56_427, %c0_428] : memref<64x8xf32, #tpu.memory_space<vmem>>, vector<1x8xf32>
    %c12_429 = arith.constant 12 : index
    %c72_430 = arith.constant 72 : index
    %257 = vector.load %arg18[%c12_429, %c72_430] : memref<16x128xf32, #tpu.memory_space<vmem>>, vector<1x8xf32>
    tpu.vector_store %arg18[%c12_429, %c72_430], %256 {strides = array<i32>} : memref<16x128xf32, #tpu.memory_space<vmem>>, vector<1x8xf32>,
    %c57 = arith.constant 57 : index
    %c0_431 = arith.constant 0 : index
    %258 = vector.load %arg17[%c57, %c0_431] : memref<64x8xf32, #tpu.memory_space<vmem>>, vector<1x8xf32>
    %c13_432 = arith.constant 13 : index
    %c64_433 = arith.constant 64 : index
    %259 = vector.load %arg18[%c13_432, %c64_433] : memref<16x128xf32, #tpu.memory_space<vmem>>, vector<1x8xf32>
    tpu.vector_store %arg18[%c13_432, %c64_433], %258 {strides = array<i32>} : memref<16x128xf32, #tpu.memory_space<vmem>>, vector<1x8xf32>,
    %c12_434 = arith.constant 12 : index
    %c80_435 = arith.constant 80 : index
    %260 = vector.load %arg18[%c12_434, %c80_435] : memref<16x128xf32, #tpu.memory_space<vmem>>, vector<1x8xf32>
    tpu.vector_store %arg18[%c12_434, %c80_435], %258 {strides = array<i32>} : memref<16x128xf32, #tpu.memory_space<vmem>>, vector<1x8xf32>,
    %c58 = arith.constant 58 : index
    %c0_436 = arith.constant 0 : index
    %261 = vector.load %arg17[%c58, %c0_436] : memref<64x8xf32, #tpu.memory_space<vmem>>, vector<1x8xf32>
    %c13_437 = arith.constant 13 : index
    %c72_438 = arith.constant 72 : index
    %262 = vector.load %arg18[%c13_437, %c72_438] : memref<16x128xf32, #tpu.memory_space<vmem>>, vector<1x8xf32>
    tpu.vector_store %arg18[%c13_437, %c72_438], %261 {strides = array<i32>} : memref<16x128xf32, #tpu.memory_space<vmem>>, vector<1x8xf32>,
    %c12_439 = arith.constant 12 : index
    %c88_440 = arith.constant 88 : index
    %263 = vector.load %arg18[%c12_439, %c88_440] : memref<16x128xf32, #tpu.memory_space<vmem>>, vector<1x8xf32>
    tpu.vector_store %arg18[%c12_439, %c88_440], %261 {strides = array<i32>} : memref<16x128xf32, #tpu.memory_space<vmem>>, vector<1x8xf32>,
    %c59 = arith.constant 59 : index
    %c0_441 = arith.constant 0 : index
    %264 = vector.load %arg17[%c59, %c0_441] : memref<64x8xf32, #tpu.memory_space<vmem>>, vector<1x8xf32>
    %c14_442 = arith.constant 14 : index
    %c64_443 = arith.constant 64 : index
    %265 = vector.load %arg18[%c14_442, %c64_443] : memref<16x128xf32, #tpu.memory_space<vmem>>, vector<1x8xf32>
    tpu.vector_store %arg18[%c14_442, %c64_443], %264 {strides = array<i32>} : memref<16x128xf32, #tpu.memory_space<vmem>>, vector<1x8xf32>,
    %c13_444 = arith.constant 13 : index
    %c80_445 = arith.constant 80 : index
    %266 = vector.load %arg18[%c13_444, %c80_445] : memref<16x128xf32, #tpu.memory_space<vmem>>, vector<1x8xf32>
    tpu.vector_store %arg18[%c13_444, %c80_445], %264 {strides = array<i32>} : memref<16x128xf32, #tpu.memory_space<vmem>>, vector<1x8xf32>,
    %c60 = arith.constant 60 : index
    %c0_446 = arith.constant 0 : index
    %267 = vector.load %arg17[%c60, %c0_446] : memref<64x8xf32, #tpu.memory_space<vmem>>, vector<1x8xf32>
    %c14_447 = arith.constant 14 : index
    %c72_448 = arith.constant 72 : index
    %268 = vector.load %arg18[%c14_447, %c72_448] : memref<16x128xf32, #tpu.memory_space<vmem>>, vector<1x8xf32>
    tpu.vector_store %arg18[%c14_447, %c72_448], %267 {strides = array<i32>} : memref<16x128xf32, #tpu.memory_space<vmem>>, vector<1x8xf32>,
    %c13_449 = arith.constant 13 : index
    %c88_450 = arith.constant 88 : index
    %269 = vector.load %arg18[%c13_449, %c88_450] : memref<16x128xf32, #tpu.memory_space<vmem>>, vector<1x8xf32>
    tpu.vector_store %arg18[%c13_449, %c88_450], %267 {strides = array<i32>} : memref<16x128xf32, #tpu.memory_space<vmem>>, vector<1x8xf32>,
    %c61 = arith.constant 61 : index
    %c0_451 = arith.constant 0 : index
    %270 = vector.load %arg17[%c61, %c0_451] : memref<64x8xf32, #tpu.memory_space<vmem>>, vector<1x8xf32>
    %c15_452 = arith.constant 15 : index
    %c64_453 = arith.constant 64 : index
    %271 = vector.load %arg18[%c15_452, %c64_453] : memref<16x128xf32, #tpu.memory_space<vmem>>, vector<1x8xf32>
    tpu.vector_store %arg18[%c15_452, %c64_453], %270 {strides = array<i32>} : memref<16x128xf32, #tpu.memory_space<vmem>>, vector<1x8xf32>,
    %c14_454 = arith.constant 14 : index
    %c80_455 = arith.constant 80 : index
    %272 = vector.load %arg18[%c14_454, %c80_455] : memref<16x128xf32, #tpu.memory_space<vmem>>, vector<1x8xf32>
    tpu.vector_store %arg18[%c14_454, %c80_455], %270 {strides = array<i32>} : memref<16x128xf32, #tpu.memory_space<vmem>>, vector<1x8xf32>,
    %c62 = arith.constant 62 : index
    %c0_456 = arith.constant 0 : index
    %273 = vector.load %arg17[%c62, %c0_456] : memref<64x8xf32, #tpu.memory_space<vmem>>, vector<1x8xf32>
    %c15_457 = arith.constant 15 : index
    %c72_458 = arith.constant 72 : index
    %274 = vector.load %arg18[%c15_457, %c72_458] : memref<16x128xf32, #tpu.memory_space<vmem>>, vector<1x8xf32>
    tpu.vector_store %arg18[%c15_457, %c72_458], %273 {strides = array<i32>} : memref<16x128xf32, #tpu.memory_space<vmem>>, vector<1x8xf32>,
    %c14_459 = arith.constant 14 : index
    %c88_460 = arith.constant 88 : index
    %275 = vector.load %arg18[%c14_459, %c88_460] : memref<16x128xf32, #tpu.memory_space<vmem>>, vector<1x8xf32>
    tpu.vector_store %arg18[%c14_459, %c88_460], %273 {strides = array<i32>} : memref<16x128xf32, #tpu.memory_space<vmem>>, vector<1x8xf32>,
    %c63 = arith.constant 63 : index
    %c0_461 = arith.constant 0 : index
    %276 = vector.load %arg17[%c63, %c0_461] : memref<64x8xf32, #tpu.memory_space<vmem>>, vector<1x8xf32>
    %c15_462 = arith.constant 15 : index
    %c80_463 = arith.constant 80 : index
    %277 = vector.load %arg18[%c15_462, %c80_463] : memref<16x128xf32, #tpu.memory_space<vmem>>, vector<1x8xf32>
    tpu.vector_store %arg18[%c15_462, %c80_463], %276 {strides = array<i32>} : memref<16x128xf32, #tpu.memory_space<vmem>>, vector<1x8xf32>,
    %c0_464 = arith.constant 0 : index
    %c0_465 = arith.constant 0 : index
    %278 = vector.load %arg18[%c0_464, %c0_465] : memref<16x128xf32, #tpu.memory_space<vmem>>, vector<16x128xf32>
    %279 = arith.truncf %278 : vector<16x128xf32> to vector<16x128xbf16>
    %c0_466 = arith.constant 0 : index
    %c0_467 = arith.constant 0 : index
    %280 = vector.load %arg5[%c0_466, %c0_467] : memref<128x16xbf16, #tpu.memory_space<vmem>>, vector<128x16xbf16>
    %cst_468 = arith.constant dense<0.000000e+00> : vector<16x16xf32>
    %281 = tpu.matmul %279, %280, %cst_468 {dimension_numbers = #tpu.dot_dimension_numbers<[1], [0], [0], [1], [0, 0, 1, 1], [], []>} : vector<16x128xbf16>, vector<128x16xbf16>, vector<16x16xf32> -> vector<16x16xf32>
    %c0_469 = arith.constant 0 : index
    %c0_470 = arith.constant 0 : index
    %282 = vector.load %arg6[%c0_469, %c0_470] : memref<1x16xf32, #tpu.memory_space<vmem>>, vector<1x16xf32>
    %283 = vector.broadcast %282 : vector<1x16xf32> to vector<16x16xf32>
    %284 = arith.mulf %281, %283 : vector<16x16xf32>
    %c0_471 = arith.constant 0 : index
    %c0_472 = arith.constant 0 : index
    %285 = vector.load %arg7[%c0_471, %c0_472] : memref<1x16xf32, #tpu.memory_space<vmem>>, vector<1x16xf32>
    %286 = vector.broadcast %285 : vector<1x16xf32> to vector<16x16xf32>
    %287 = arith.addf %284, %286 : vector<16x16xf32>
    %cst_473 = arith.constant 0.000000e+00 : f32
    %288 = vector.broadcast %cst_473 : f32 to vector<16x16xf32>
    %289 = arith.cmpf oge, %287, %288 : vector<16x16xf32>
    %cst_474 = arith.constant 2.000000e-01 : f32
    %290 = vector.broadcast %cst_474 : f32 to vector<16x16xf32>
    %291 = arith.mulf %290, %287 : vector<16x16xf32>
    %292 = arith.select %289, %287, %291 : vector<16x16xi1>, vector<16x16xf32>
    %c0_475 = arith.constant 0 : index
    %c0_476 = arith.constant 0 : index
    %293 = vector.load %arg19[%c0_475, %c0_476] : memref<16x16xf32, #tpu.memory_space<vmem>>, vector<16x16xf32>
    tpu.vector_store %arg19[%c0_475, %c0_476], %292 {strides = array<i32>} : memref<16x16xf32, #tpu.memory_space<vmem>>, vector<16x16xf32>,
    %cst_477 = arith.constant 0.000000e+00 : f32
    %294 = vector.broadcast %cst_477 : f32 to vector<4x256xf32>
    %c0_478 = arith.constant 0 : index
    %c0_479 = arith.constant 0 : index
    %295 = vector.load %arg20[%c0_478, %c0_479] : memref<4x256xf32, #tpu.memory_space<vmem>>, vector<4x256xf32>
    tpu.vector_store %arg20[%c0_478, %c0_479], %294 {strides = array<i32>} : memref<4x256xf32, #tpu.memory_space<vmem>>, vector<4x256xf32>,
    %c0_480 = arith.constant 0 : index
    %c0_481 = arith.constant 0 : index
    %296 = vector.load %arg19[%c0_480, %c0_481] : memref<16x16xf32, #tpu.memory_space<vmem>>, vector<1x16xf32>
    %c0_482 = arith.constant 0 : index
    %c80_483 = arith.constant 80 : index
    %297 = vector.load %arg20[%c0_482, %c80_483] : memref<4x256xf32, #tpu.memory_space<vmem>>, vector<1x16xf32>
    tpu.vector_store %arg20[%c0_482, %c80_483], %296 {strides = array<i32>} : memref<4x256xf32, #tpu.memory_space<vmem>>, vector<1x16xf32>,
    %c1_484 = arith.constant 1 : index
    %c0_485 = arith.constant 0 : index
    %298 = vector.load %arg19[%c1_484, %c0_485] : memref<16x16xf32, #tpu.memory_space<vmem>>, vector<1x16xf32>
    %c1_486 = arith.constant 1 : index
    %c64_487 = arith.constant 64 : index
    %299 = vector.load %arg20[%c1_486, %c64_487] : memref<4x256xf32, #tpu.memory_space<vmem>>, vector<1x16xf32>
    tpu.vector_store %arg20[%c1_486, %c64_487], %298 {strides = array<i32>} : memref<4x256xf32, #tpu.memory_space<vmem>>, vector<1x16xf32>,
    %c0_488 = arith.constant 0 : index
    %c96_489 = arith.constant 96 : index
    %300 = vector.load %arg20[%c0_488, %c96_489] : memref<4x256xf32, #tpu.memory_space<vmem>>, vector<1x16xf32>
    tpu.vector_store %arg20[%c0_488, %c96_489], %298 {strides = array<i32>} : memref<4x256xf32, #tpu.memory_space<vmem>>, vector<1x16xf32>,
    %c2_490 = arith.constant 2 : index
    %c0_491 = arith.constant 0 : index
    %301 = vector.load %arg19[%c2_490, %c0_491] : memref<16x16xf32, #tpu.memory_space<vmem>>, vector<1x16xf32>
    %c1_492 = arith.constant 1 : index
    %c80_493 = arith.constant 80 : index
    %302 = vector.load %arg20[%c1_492, %c80_493] : memref<4x256xf32, #tpu.memory_space<vmem>>, vector<1x16xf32>
    tpu.vector_store %arg20[%c1_492, %c80_493], %301 {strides = array<i32>} : memref<4x256xf32, #tpu.memory_space<vmem>>, vector<1x16xf32>,
    %c0_494 = arith.constant 0 : index
    %c112_495 = arith.constant 112 : index
    %303 = vector.load %arg20[%c0_494, %c112_495] : memref<4x256xf32, #tpu.memory_space<vmem>>, vector<1x16xf32>
    tpu.vector_store %arg20[%c0_494, %c112_495], %301 {strides = array<i32>} : memref<4x256xf32, #tpu.memory_space<vmem>>, vector<1x16xf32>,
    %c3_496 = arith.constant 3 : index
    %c0_497 = arith.constant 0 : index
    %304 = vector.load %arg19[%c3_496, %c0_497] : memref<16x16xf32, #tpu.memory_space<vmem>>, vector<1x16xf32>
    %c1_498 = arith.constant 1 : index
    %c96_499 = arith.constant 96 : index
    %305 = vector.load %arg20[%c1_498, %c96_499] : memref<4x256xf32, #tpu.memory_space<vmem>>, vector<1x16xf32>
    tpu.vector_store %arg20[%c1_498, %c96_499], %304 {strides = array<i32>} : memref<4x256xf32, #tpu.memory_space<vmem>>, vector<1x16xf32>,
    %c4_500 = arith.constant 4 : index
    %c0_501 = arith.constant 0 : index
    %306 = vector.load %arg19[%c4_500, %c0_501] : memref<16x16xf32, #tpu.memory_space<vmem>>, vector<1x16xf32>
    %c2_502 = arith.constant 2 : index
    %c16_503 = arith.constant 16 : index
    %307 = vector.load %arg20[%c2_502, %c16_503] : memref<4x256xf32, #tpu.memory_space<vmem>>, vector<1x16xf32>
    tpu.vector_store %arg20[%c2_502, %c16_503], %306 {strides = array<i32>} : memref<4x256xf32, #tpu.memory_space<vmem>>, vector<1x16xf32>,
    %c0_504 = arith.constant 0 : index
    %c144 = arith.constant 144 : index
    %308 = vector.load %arg20[%c0_504, %c144] : memref<4x256xf32, #tpu.memory_space<vmem>>, vector<1x16xf32>
    tpu.vector_store %arg20[%c0_504, %c144], %306 {strides = array<i32>} : memref<4x256xf32, #tpu.memory_space<vmem>>, vector<1x16xf32>,
    %c5_505 = arith.constant 5 : index
    %c0_506 = arith.constant 0 : index
    %309 = vector.load %arg19[%c5_505, %c0_506] : memref<16x16xf32, #tpu.memory_space<vmem>>, vector<1x16xf32>
    %c3_507 = arith.constant 3 : index
    %c0_508 = arith.constant 0 : index
    %310 = vector.load %arg20[%c3_507, %c0_508] : memref<4x256xf32, #tpu.memory_space<vmem>>, vector<1x16xf32>
    tpu.vector_store %arg20[%c3_507, %c0_508], %309 {strides = array<i32>} : memref<4x256xf32, #tpu.memory_space<vmem>>, vector<1x16xf32>,
    %c2_509 = arith.constant 2 : index
    %c32_510 = arith.constant 32 : index
    %311 = vector.load %arg20[%c2_509, %c32_510] : memref<4x256xf32, #tpu.memory_space<vmem>>, vector<1x16xf32>
    tpu.vector_store %arg20[%c2_509, %c32_510], %309 {strides = array<i32>} : memref<4x256xf32, #tpu.memory_space<vmem>>, vector<1x16xf32>,
    %c1_511 = arith.constant 1 : index
    %c128 = arith.constant 128 : index
    %312 = vector.load %arg20[%c1_511, %c128] : memref<4x256xf32, #tpu.memory_space<vmem>>, vector<1x16xf32>
    tpu.vector_store %arg20[%c1_511, %c128], %309 {strides = array<i32>} : memref<4x256xf32, #tpu.memory_space<vmem>>, vector<1x16xf32>,
    %c0_512 = arith.constant 0 : index
    %c160 = arith.constant 160 : index
    %313 = vector.load %arg20[%c0_512, %c160] : memref<4x256xf32, #tpu.memory_space<vmem>>, vector<1x16xf32>
    tpu.vector_store %arg20[%c0_512, %c160], %309 {strides = array<i32>} : memref<4x256xf32, #tpu.memory_space<vmem>>, vector<1x16xf32>,
    %c6_513 = arith.constant 6 : index
    %c0_514 = arith.constant 0 : index
    %314 = vector.load %arg19[%c6_513, %c0_514] : memref<16x16xf32, #tpu.memory_space<vmem>>, vector<1x16xf32>
    %c3_515 = arith.constant 3 : index
    %c16_516 = arith.constant 16 : index
    %315 = vector.load %arg20[%c3_515, %c16_516] : memref<4x256xf32, #tpu.memory_space<vmem>>, vector<1x16xf32>
    tpu.vector_store %arg20[%c3_515, %c16_516], %314 {strides = array<i32>} : memref<4x256xf32, #tpu.memory_space<vmem>>, vector<1x16xf32>,
    %c2_517 = arith.constant 2 : index
    %c48_518 = arith.constant 48 : index
    %316 = vector.load %arg20[%c2_517, %c48_518] : memref<4x256xf32, #tpu.memory_space<vmem>>, vector<1x16xf32>
    tpu.vector_store %arg20[%c2_517, %c48_518], %314 {strides = array<i32>} : memref<4x256xf32, #tpu.memory_space<vmem>>, vector<1x16xf32>,
    %c1_519 = arith.constant 1 : index
    %c144_520 = arith.constant 144 : index
    %317 = vector.load %arg20[%c1_519, %c144_520] : memref<4x256xf32, #tpu.memory_space<vmem>>, vector<1x16xf32>
    tpu.vector_store %arg20[%c1_519, %c144_520], %314 {strides = array<i32>} : memref<4x256xf32, #tpu.memory_space<vmem>>, vector<1x16xf32>,
    %c0_521 = arith.constant 0 : index
    %c176 = arith.constant 176 : index
    %318 = vector.load %arg20[%c0_521, %c176] : memref<4x256xf32, #tpu.memory_space<vmem>>, vector<1x16xf32>
    tpu.vector_store %arg20[%c0_521, %c176], %314 {strides = array<i32>} : memref<4x256xf32, #tpu.memory_space<vmem>>, vector<1x16xf32>,
    %c7_522 = arith.constant 7 : index
    %c0_523 = arith.constant 0 : index
    %319 = vector.load %arg19[%c7_522, %c0_523] : memref<16x16xf32, #tpu.memory_space<vmem>>, vector<1x16xf32>
    %c3_524 = arith.constant 3 : index
    %c32_525 = arith.constant 32 : index
    %320 = vector.load %arg20[%c3_524, %c32_525] : memref<4x256xf32, #tpu.memory_space<vmem>>, vector<1x16xf32>
    tpu.vector_store %arg20[%c3_524, %c32_525], %319 {strides = array<i32>} : memref<4x256xf32, #tpu.memory_space<vmem>>, vector<1x16xf32>,
    %c1_526 = arith.constant 1 : index
    %c160_527 = arith.constant 160 : index
    %321 = vector.load %arg20[%c1_526, %c160_527] : memref<4x256xf32, #tpu.memory_space<vmem>>, vector<1x16xf32>
    tpu.vector_store %arg20[%c1_526, %c160_527], %319 {strides = array<i32>} : memref<4x256xf32, #tpu.memory_space<vmem>>, vector<1x16xf32>,
    %c8_528 = arith.constant 8 : index
    %c0_529 = arith.constant 0 : index
    %322 = vector.load %arg19[%c8_528, %c0_529] : memref<16x16xf32, #tpu.memory_space<vmem>>, vector<1x16xf32>
    %c2_530 = arith.constant 2 : index
    %c80_531 = arith.constant 80 : index
    %323 = vector.load %arg20[%c2_530, %c80_531] : memref<4x256xf32, #tpu.memory_space<vmem>>, vector<1x16xf32>
    tpu.vector_store %arg20[%c2_530, %c80_531], %322 {strides = array<i32>} : memref<4x256xf32, #tpu.memory_space<vmem>>, vector<1x16xf32>,
    %c0_532 = arith.constant 0 : index
    %c208 = arith.constant 208 : index
    %324 = vector.load %arg20[%c0_532, %c208] : memref<4x256xf32, #tpu.memory_space<vmem>>, vector<1x16xf32>
    tpu.vector_store %arg20[%c0_532, %c208], %322 {strides = array<i32>} : memref<4x256xf32, #tpu.memory_space<vmem>>, vector<1x16xf32>,
    %c9_533 = arith.constant 9 : index
    %c0_534 = arith.constant 0 : index
    %325 = vector.load %arg19[%c9_533, %c0_534] : memref<16x16xf32, #tpu.memory_space<vmem>>, vector<1x16xf32>
    %c3_535 = arith.constant 3 : index
    %c64_536 = arith.constant 64 : index
    %326 = vector.load %arg20[%c3_535, %c64_536] : memref<4x256xf32, #tpu.memory_space<vmem>>, vector<1x16xf32>
    tpu.vector_store %arg20[%c3_535, %c64_536], %325 {strides = array<i32>} : memref<4x256xf32, #tpu.memory_space<vmem>>, vector<1x16xf32>,
    %c2_537 = arith.constant 2 : index
    %c96_538 = arith.constant 96 : index
    %327 = vector.load %arg20[%c2_537, %c96_538] : memref<4x256xf32, #tpu.memory_space<vmem>>, vector<1x16xf32>
    tpu.vector_store %arg20[%c2_537, %c96_538], %325 {strides = array<i32>} : memref<4x256xf32, #tpu.memory_space<vmem>>, vector<1x16xf32>,
    %c1_539 = arith.constant 1 : index
    %c192 = arith.constant 192 : index
    %328 = vector.load %arg20[%c1_539, %c192] : memref<4x256xf32, #tpu.memory_space<vmem>>, vector<1x16xf32>
    tpu.vector_store %arg20[%c1_539, %c192], %325 {strides = array<i32>} : memref<4x256xf32, #tpu.memory_space<vmem>>, vector<1x16xf32>,
    %c0_540 = arith.constant 0 : index
    %c224 = arith.constant 224 : index
    %329 = vector.load %arg20[%c0_540, %c224] : memref<4x256xf32, #tpu.memory_space<vmem>>, vector<1x16xf32>
    tpu.vector_store %arg20[%c0_540, %c224], %325 {strides = array<i32>} : memref<4x256xf32, #tpu.memory_space<vmem>>, vector<1x16xf32>,
    %c10_541 = arith.constant 10 : index
    %c0_542 = arith.constant 0 : index
    %330 = vector.load %arg19[%c10_541, %c0_542] : memref<16x16xf32, #tpu.memory_space<vmem>>, vector<1x16xf32>
    %c3_543 = arith.constant 3 : index
    %c80_544 = arith.constant 80 : index
    %331 = vector.load %arg20[%c3_543, %c80_544] : memref<4x256xf32, #tpu.memory_space<vmem>>, vector<1x16xf32>
    tpu.vector_store %arg20[%c3_543, %c80_544], %330 {strides = array<i32>} : memref<4x256xf32, #tpu.memory_space<vmem>>, vector<1x16xf32>,
    %c2_545 = arith.constant 2 : index
    %c112_546 = arith.constant 112 : index
    %332 = vector.load %arg20[%c2_545, %c112_546] : memref<4x256xf32, #tpu.memory_space<vmem>>, vector<1x16xf32>
    tpu.vector_store %arg20[%c2_545, %c112_546], %330 {strides = array<i32>} : memref<4x256xf32, #tpu.memory_space<vmem>>, vector<1x16xf32>,
    %c1_547 = arith.constant 1 : index
    %c208_548 = arith.constant 208 : index
    %333 = vector.load %arg20[%c1_547, %c208_548] : memref<4x256xf32, #tpu.memory_space<vmem>>, vector<1x16xf32>
    tpu.vector_store %arg20[%c1_547, %c208_548], %330 {strides = array<i32>} : memref<4x256xf32, #tpu.memory_space<vmem>>, vector<1x16xf32>,
    %c0_549 = arith.constant 0 : index
    %c240 = arith.constant 240 : index
    %334 = vector.load %arg20[%c0_549, %c240] : memref<4x256xf32, #tpu.memory_space<vmem>>, vector<1x16xf32>
    tpu.vector_store %arg20[%c0_549, %c240], %330 {strides = array<i32>} : memref<4x256xf32, #tpu.memory_space<vmem>>, vector<1x16xf32>,
    %c11_550 = arith.constant 11 : index
    %c0_551 = arith.constant 0 : index
    %335 = vector.load %arg19[%c11_550, %c0_551] : memref<16x16xf32, #tpu.memory_space<vmem>>, vector<1x16xf32>
    %c3_552 = arith.constant 3 : index
    %c96_553 = arith.constant 96 : index
    %336 = vector.load %arg20[%c3_552, %c96_553] : memref<4x256xf32, #tpu.memory_space<vmem>>, vector<1x16xf32>
    tpu.vector_store %arg20[%c3_552, %c96_553], %335 {strides = array<i32>} : memref<4x256xf32, #tpu.memory_space<vmem>>, vector<1x16xf32>,
    %c1_554 = arith.constant 1 : index
    %c224_555 = arith.constant 224 : index
    %337 = vector.load %arg20[%c1_554, %c224_555] : memref<4x256xf32, #tpu.memory_space<vmem>>, vector<1x16xf32>
    tpu.vector_store %arg20[%c1_554, %c224_555], %335 {strides = array<i32>} : memref<4x256xf32, #tpu.memory_space<vmem>>, vector<1x16xf32>,
    %c12_556 = arith.constant 12 : index
    %c0_557 = arith.constant 0 : index
    %338 = vector.load %arg19[%c12_556, %c0_557] : memref<16x16xf32, #tpu.memory_space<vmem>>, vector<1x16xf32>
    %c2_558 = arith.constant 2 : index
    %c144_559 = arith.constant 144 : index
    %339 = vector.load %arg20[%c2_558, %c144_559] : memref<4x256xf32, #tpu.memory_space<vmem>>, vector<1x16xf32>
    tpu.vector_store %arg20[%c2_558, %c144_559], %338 {strides = array<i32>} : memref<4x256xf32, #tpu.memory_space<vmem>>, vector<1x16xf32>,
    %c13_560 = arith.constant 13 : index
    %c0_561 = arith.constant 0 : index
    %340 = vector.load %arg19[%c13_560, %c0_561] : memref<16x16xf32, #tpu.memory_space<vmem>>, vector<1x16xf32>
    %c3_562 = arith.constant 3 : index
    %c128_563 = arith.constant 128 : index
    %341 = vector.load %arg20[%c3_562, %c128_563] : memref<4x256xf32, #tpu.memory_space<vmem>>, vector<1x16xf32>
    tpu.vector_store %arg20[%c3_562, %c128_563], %340 {strides = array<i32>} : memref<4x256xf32, #tpu.memory_space<vmem>>, vector<1x16xf32>,
    %c2_564 = arith.constant 2 : index
    %c160_565 = arith.constant 160 : index
    %342 = vector.load %arg20[%c2_564, %c160_565] : memref<4x256xf32, #tpu.memory_space<vmem>>, vector<1x16xf32>
    tpu.vector_store %arg20[%c2_564, %c160_565], %340 {strides = array<i32>} : memref<4x256xf32, #tpu.memory_space<vmem>>, vector<1x16xf32>,
    %c14_566 = arith.constant 14 : index
    %c0_567 = arith.constant 0 : index
    %343 = vector.load %arg19[%c14_566, %c0_567] : memref<16x16xf32, #tpu.memory_space<vmem>>, vector<1x16xf32>
    %c3_568 = arith.constant 3 : index
    %c144_569 = arith.constant 144 : index
    %344 = vector.load %arg20[%c3_568, %c144_569] : memref<4x256xf32, #tpu.memory_space<vmem>>, vector<1x16xf32>
    tpu.vector_store %arg20[%c3_568, %c144_569], %343 {strides = array<i32>} : memref<4x256xf32, #tpu.memory_space<vmem>>, vector<1x16xf32>,
    %c2_570 = arith.constant 2 : index
    %c176_571 = arith.constant 176 : index
    %345 = vector.load %arg20[%c2_570, %c176_571] : memref<4x256xf32, #tpu.memory_space<vmem>>, vector<1x16xf32>
    tpu.vector_store %arg20[%c2_570, %c176_571], %343 {strides = array<i32>} : memref<4x256xf32, #tpu.memory_space<vmem>>, vector<1x16xf32>,
    %c15_572 = arith.constant 15 : index
    %c0_573 = arith.constant 0 : index
    %346 = vector.load %arg19[%c15_572, %c0_573] : memref<16x16xf32, #tpu.memory_space<vmem>>, vector<1x16xf32>
    %c3_574 = arith.constant 3 : index
    %c160_575 = arith.constant 160 : index
    %347 = vector.load %arg20[%c3_574, %c160_575] : memref<4x256xf32, #tpu.memory_space<vmem>>, vector<1x16xf32>
    tpu.vector_store %arg20[%c3_574, %c160_575], %346 {strides = array<i32>} : memref<4x256xf32, #tpu.memory_space<vmem>>, vector<1x16xf32>,
    %c0_576 = arith.constant 0 : index
    %c0_577 = arith.constant 0 : index
    %348 = vector.load %arg20[%c0_576, %c0_577] : memref<4x256xf32, #tpu.memory_space<vmem>>, vector<4x256xf32>
    %349 = arith.truncf %348 : vector<4x256xf32> to vector<4x256xbf16>
    %c0_578 = arith.constant 0 : index
    %c0_579 = arith.constant 0 : index
    %350 = vector.load %arg8[%c0_578, %c0_579] : memref<256x32xbf16, #tpu.memory_space<vmem>>, vector<256x32xbf16>
    %cst_580 = arith.constant dense<0.000000e+00> : vector<4x32xf32>
    %351 = tpu.matmul %349, %350, %cst_580 {dimension_numbers = #tpu.dot_dimension_numbers<[1], [0], [0], [1], [0, 0, 1, 1], [], []>} : vector<4x256xbf16>, vector<256x32xbf16>, vector<4x32xf32> -> vector<4x32xf32>
    %c0_581 = arith.constant 0 : index
    %c0_582 = arith.constant 0 : index
    %352 = vector.load %arg9[%c0_581, %c0_582] : memref<1x32xf32, #tpu.memory_space<vmem>>, vector<1x32xf32>
    %353 = vector.broadcast %352 : vector<1x32xf32> to vector<4x32xf32>
    %354 = arith.mulf %351, %353 : vector<4x32xf32>
    %c0_583 = arith.constant 0 : index
    %c0_584 = arith.constant 0 : index
    %355 = vector.load %arg10[%c0_583, %c0_584] : memref<1x32xf32, #tpu.memory_space<vmem>>, vector<1x32xf32>
    %356 = vector.broadcast %355 : vector<1x32xf32> to vector<4x32xf32>
    %357 = arith.addf %354, %356 : vector<4x32xf32>
    %cst_585 = arith.constant 0.000000e+00 : f32
    %358 = vector.broadcast %cst_585 : f32 to vector<4x32xf32>
    %359 = arith.cmpf oge, %357, %358 : vector<4x32xf32>
    %cst_586 = arith.constant 2.000000e-01 : f32
    %360 = vector.broadcast %cst_586 : f32 to vector<4x32xf32>
    %361 = arith.mulf %360, %357 : vector<4x32xf32>
    %362 = arith.select %359, %357, %361 : vector<4x32xi1>, vector<4x32xf32>
    %c0_587 = arith.constant 0 : index
    %c0_588 = arith.constant 0 : index
    %363 = vector.load %arg21[%c0_587, %c0_588] : memref<4x32xf32, #tpu.memory_space<vmem>>, vector<4x32xf32>
    tpu.vector_store %arg21[%c0_587, %c0_588], %362 {strides = array<i32>} : memref<4x32xf32, #tpu.memory_space<vmem>>, vector<4x32xf32>,
    %cst_589 = arith.constant 0.000000e+00 : f32
    %364 = vector.broadcast %cst_589 : f32 to vector<1x512xf32>
    %c0_590 = arith.constant 0 : index
    %c0_591 = arith.constant 0 : index
    %365 = vector.load %arg22[%c0_590, %c0_591] : memref<1x512xf32, #tpu.memory_space<vmem>>, vector<1x512xf32>
    tpu.vector_store %arg22[%c0_590, %c0_591], %364 {strides = array<i32>} : memref<1x512xf32, #tpu.memory_space<vmem>>, vector<1x512xf32>,
    %c0_592 = arith.constant 0 : index
    %c0_593 = arith.constant 0 : index
    %366 = vector.load %arg21[%c0_592, %c0_593] : memref<4x32xf32, #tpu.memory_space<vmem>>, vector<1x32xf32>
    %c0_594 = arith.constant 0 : index
    %c160_595 = arith.constant 160 : index
    %367 = vector.load %arg22[%c0_594, %c160_595] : memref<1x512xf32, #tpu.memory_space<vmem>>, vector<1x32xf32>
    tpu.vector_store %arg22[%c0_594, %c160_595], %366 {strides = array<i32>} : memref<1x512xf32, #tpu.memory_space<vmem>>, vector<1x32xf32>,
    %c1_596 = arith.constant 1 : index
    %c0_597 = arith.constant 0 : index
    %368 = vector.load %arg21[%c1_596, %c0_597] : memref<4x32xf32, #tpu.memory_space<vmem>>, vector<1x32xf32>
    %c0_598 = arith.constant 0 : index
    %c192_599 = arith.constant 192 : index
    %369 = vector.load %arg22[%c0_598, %c192_599] : memref<1x512xf32, #tpu.memory_space<vmem>>, vector<1x32xf32>
    tpu.vector_store %arg22[%c0_598, %c192_599], %368 {strides = array<i32>} : memref<1x512xf32, #tpu.memory_space<vmem>>, vector<1x32xf32>,
    %c2_600 = arith.constant 2 : index
    %c0_601 = arith.constant 0 : index
    %370 = vector.load %arg21[%c2_600, %c0_601] : memref<4x32xf32, #tpu.memory_space<vmem>>, vector<1x32xf32>
    %c0_602 = arith.constant 0 : index
    %c288 = arith.constant 288 : index
    %371 = vector.load %arg22[%c0_602, %c288] : memref<1x512xf32, #tpu.memory_space<vmem>>, vector<1x32xf32>
    tpu.vector_store %arg22[%c0_602, %c288], %370 {strides = array<i32>} : memref<1x512xf32, #tpu.memory_space<vmem>>, vector<1x32xf32>,
    %c3_603 = arith.constant 3 : index
    %c0_604 = arith.constant 0 : index
    %372 = vector.load %arg21[%c3_603, %c0_604] : memref<4x32xf32, #tpu.memory_space<vmem>>, vector<1x32xf32>
    %c0_605 = arith.constant 0 : index
    %c320 = arith.constant 320 : index
    %373 = vector.load %arg22[%c0_605, %c320] : memref<1x512xf32, #tpu.memory_space<vmem>>, vector<1x32xf32>
    tpu.vector_store %arg22[%c0_605, %c320], %372 {strides = array<i32>} : memref<1x512xf32, #tpu.memory_space<vmem>>, vector<1x32xf32>,
    %c0_606 = arith.constant 0 : index
    %c0_607 = arith.constant 0 : index
    %374 = vector.load %arg22[%c0_606, %c0_607] : memref<1x512xf32, #tpu.memory_space<vmem>>, vector<1x512xf32>
    %375 = arith.truncf %374 : vector<1x512xf32> to vector<1x512xbf16>
    %c0_608 = arith.constant 0 : index
    %c0_609 = arith.constant 0 : index
    %376 = vector.load %arg11[%c0_608, %c0_609] : memref<512x64xbf16, #tpu.memory_space<vmem>>, vector<512x64xbf16>
    %cst_610 = arith.constant dense<0.000000e+00> : vector<1x64xf32>
    %377 = tpu.matmul %375, %376, %cst_610 {dimension_numbers = #tpu.dot_dimension_numbers<[1], [0], [0], [1], [0, 0, 1, 1], [], []>} : vector<1x512xbf16>, vector<512x64xbf16>, vector<1x64xf32> -> vector<1x64xf32>
    %c0_611 = arith.constant 0 : index
    %c0_612 = arith.constant 0 : index
    %378 = vector.load %arg12[%c0_611, %c0_612] : memref<1x64xf32, #tpu.memory_space<vmem>>, vector<1x64xf32>
    %379 = arith.mulf %377, %378 : vector<1x64xf32>
    %c0_613 = arith.constant 0 : index
    %c0_614 = arith.constant 0 : index
    %380 = vector.load %arg13[%c0_613, %c0_614] : memref<1x64xf32, #tpu.memory_space<vmem>>, vector<1x64xf32>
    %381 = arith.addf %379, %380 : vector<1x64xf32>
    %cst_615 = arith.constant 0.000000e+00 : f32
    %382 = vector.broadcast %cst_615 : f32 to vector<1x64xf32>
    %383 = arith.cmpf oge, %381, %382 : vector<1x64xf32>
    %cst_616 = arith.constant 2.000000e-01 : f32
    %384 = vector.broadcast %cst_616 : f32 to vector<1x64xf32>
    %385 = arith.mulf %384, %381 : vector<1x64xf32>
    %386 = arith.select %383, %381, %385 : vector<1x64xi1>, vector<1x64xf32>
    %c0_617 = arith.constant 0 : index
    %c0_618 = arith.constant 0 : index
    %387 = vector.load %arg23[%c0_617, %c0_618] : memref<1x64xf32, #tpu.memory_space<vmem>>, vector<1x64xf32>
    tpu.vector_store %arg23[%c0_617, %c0_618], %386 {strides = array<i32>} : memref<1x64xf32, #tpu.memory_space<vmem>>, vector<1x64xf32>,
    %c0_619 = arith.constant 0 : index
    %c0_620 = arith.constant 0 : index
    %388 = vector.load %arg23[%c0_619, %c0_620] : memref<1x64xf32, #tpu.memory_space<vmem>>, vector<1x64xf32>
    %c0_621 = arith.constant 0 : index
    %c0_622 = arith.constant 0 : index
    %389 = vector.load %arg24[%c0_621, %c0_622] : memref<1x64xf32, #tpu.memory_space<vmem>>, vector<1x64xf32>
    tpu.vector_store %arg24[%c0_621, %c0_622], %388 {strides = array<i32>} : memref<1x64xf32, #tpu.memory_space<vmem>>, vector<1x64xf32>,
    %c0_623 = arith.constant 0 : index
    %c0_624 = arith.constant 0 : index
    %390 = vector.load %arg24[%c0_623, %c0_624] : memref<1x64xf32, #tpu.memory_space<vmem>>, vector<1x64xf32>
    %391 = arith.truncf %390 : vector<1x64xf32> to vector<1x64xbf16>
    %c0_625 = arith.constant 0 : index
    %c0_626 = arith.constant 0 : index
    %392 = vector.load %arg14[%c0_625, %c0_626] : memref<64x1xbf16, #tpu.memory_space<vmem>>, vector<64x1xbf16>
    %cst_627 = arith.constant dense<0.000000e+00> : vector<1x1xf32>
    %393 = tpu.matmul %391, %392, %cst_627 {dimension_numbers = #tpu.dot_dimension_numbers<[1], [0], [0], [1], [0, 0, 1, 1], [], []>} : vector<1x64xbf16>, vector<64x1xbf16>, vector<1x1xf32> -> vector<1x1xf32>
    %c0_628 = arith.constant 0 : index
    %c0_629 = arith.constant 0 : index
    %394 = vector.load %arg15[%c0_628, %c0_629] : memref<1x1xf32, #tpu.memory_space<vmem>>, vector<1x1xf32>
    %395 = arith.addf %393, %394 : vector<1x1xf32>
    %396 = arith.negf %395 : vector<1x1xf32>
    %397 = math.exp %396 : vector<1x1xf32>
    %cst_630 = arith.constant 1.000000e+00 : f32
    %398 = vector.broadcast %cst_630 : f32 to vector<1x1xf32>
    %399 = arith.addf %398, %397 : vector<1x1xf32>
    %400 = arith.divf %398, %399 : vector<1x1xf32>
    %c0_631 = arith.constant 0 : index
    %c0_632 = arith.constant 0 : index
    %c0_633 = arith.constant 0 : index
    %401 = vector.load %arg16[%c0_631, %c0_632, %c0_633] : memref<1x1x1xf32, #tpu.memory_space<vmem>>, vector<1x1x1xf32>
    %402 = vector.shape_cast %401 : vector<1x1x1xf32> to vector<1x1xf32>
    %403 = vector.shape_cast %400 : vector<1x1xf32> to vector<1x1x1xf32>
    tpu.vector_store %arg16[%c0_631, %c0_632, %c0_633], %403 {strides = array<i32>} : memref<1x1x1xf32, #tpu.memory_space<vmem>>, vector<1x1x1xf32>,
    return
  }
  func.func @transform_0(%arg0: i32) -> (i32, i32, i32) {
    %c0_i32 = arith.constant 0 : i32
    %c0_i32_0 = arith.constant 0 : i32
    %c0_i32_1 = arith.constant 0 : i32
    return %arg0, %c0_i32, %c0_i32_0 : i32, i32, i32
  }
  func.func @transform_1(%arg0: i32) -> (i32, i32) {
    %c0_i32 = arith.constant 0 : i32
    %c0_i32_0 = arith.constant 0 : i32
    %c0_i32_1 = arith.constant 0 : i32
    return %c0_i32, %c0_i32_0 : i32, i32
  }
  func.func @transform_2(%arg0: i32) -> (i32, i32) {
    %c0_i32 = arith.constant 0 : i32
    %c0_i32_0 = arith.constant 0 : i32
    %c0_i32_1 = arith.constant 0 : i32
    return %c0_i32, %c0_i32_0 : i32, i32
  }
  func.func @transform_3(%arg0: i32) -> (i32, i32) {
    %c0_i32 = arith.constant 0 : i32
    %c0_i32_0 = arith.constant 0 : i32
    %c0_i32_1 = arith.constant 0 : i32
    return %c0_i32, %c0_i32_0 : i32, i32
  }
  func.func @transform_4(%arg0: i32) -> (i32, i32) {
    %c0_i32 = arith.constant 0 : i32
    %c0_i32_0 = arith.constant 0 : i32
    %c0_i32_1 = arith.constant 0 : i32
    return %c0_i32, %c0_i32_0 : i32, i32
  }
  func.func @transform_5(%arg0: i32) -> (i32, i32) {
    %c0_i32 = arith.constant 0 : i32
    %c0_i32_0 = arith.constant 0 : i32
    %c0_i32_1 = arith.constant 0 : i32
    return %c0_i32, %c0_i32_0 : i32, i32
  }
  func.func @transform_6(%arg0: i32) -> (i32, i32) {
    %c0_i32 = arith.constant 0 : i32
    %c0_i32_0 = arith.constant 0 : i32
    %c0_i32_1 = arith.constant 0 : i32
    return %c0_i32, %c0_i32_0 : i32, i32
  }
  func.func @transform_7(%arg0: i32) -> (i32, i32) {
    %c0_i32 = arith.constant 0 : i32
    %c0_i32_0 = arith.constant 0 : i32
    %c0_i32_1 = arith.constant 0 : i32
    return %c0_i32, %c0_i32_0 : i32, i32
  }
  func.func @transform_8(%arg0: i32) -> (i32, i32) {
    %c0_i32 = arith.constant 0 : i32
    %c0_i32_0 = arith.constant 0 : i32
    %c0_i32_1 = arith.constant 0 : i32
    return %c0_i32, %c0_i32_0 : i32, i32
  }
  func.func @transform_9(%arg0: i32) -> (i32, i32) {
    %c0_i32 = arith.constant 0 : i32
    %c0_i32_0 = arith.constant 0 : i32
    %c0_i32_1 = arith.constant 0 : i32
    return %c0_i32, %c0_i32_0 : i32, i32
  }
  func.func @transform_10(%arg0: i32) -> (i32, i32) {
    %c0_i32 = arith.constant 0 : i32
    %c0_i32_0 = arith.constant 0 : i32
    %c0_i32_1 = arith.constant 0 : i32
    return %c0_i32, %c0_i32_0 : i32, i32
  }
  func.func @transform_11(%arg0: i32) -> (i32, i32) {
    %c0_i32 = arith.constant 0 : i32
    %c0_i32_0 = arith.constant 0 : i32
    %c0_i32_1 = arith.constant 0 : i32
    return %c0_i32, %c0_i32_0 : i32, i32
  }
  func.func @transform_12(%arg0: i32) -> (i32, i32) {
    %c0_i32 = arith.constant 0 : i32
    %c0_i32_0 = arith.constant 0 : i32
    %c0_i32_1 = arith.constant 0 : i32
    return %c0_i32, %c0_i32_0 : i32, i32
  }
  func.func @transform_13(%arg0: i32) -> (i32, i32) {
    %c0_i32 = arith.constant 0 : i32
    %c0_i32_0 = arith.constant 0 : i32
    %c0_i32_1 = arith.constant 0 : i32
    return %c0_i32, %c0_i32_0 : i32, i32
  }
  func.func @transform_14(%arg0: i32) -> (i32, i32) {
    %c0_i32 = arith.constant 0 : i32
    %c0_i32_0 = arith.constant 0 : i32
    %c0_i32_1 = arith.constant 0 : i32
    return %c0_i32, %c0_i32_0 : i32, i32
  }
  func.func @transform_15(%arg0: i32) -> (i32, i32, i32) {
    %c0_i32 = arith.constant 0 : i32
    %c0_i32_0 = arith.constant 0 : i32
    %c0_i32_1 = arith.constant 0 : i32
    return %arg0, %c0_i32, %c0_i32_0 : i32, i32, i32
  }
}

</mosaic_0001>

<bundles_post_ra>
// kernel: discriminator_forward.1
= control target key start
LH: loop header
LB: loop body
LE: loop exit
PB: predicated region body
PF: predicated region fallthrough
CT: control target
= control target key end

     0   :  { %s2952_s20 = smov 0   ;;  %s3980_s0 = inlined_call_operand.vmem [shape: bf16[2,64,48], index: 0, kind: input, shape index: {}]   ;;  %s3981_s1 = inlined_call_operand.vmem [shape: bf16[48,8], index: 1, kind: input, shape index: {}]   ;;  %s3982_s2 = inlined_call_operand.vmem [shape: f32[1,8], index: 2, kind: input, shape index: {}]   ;;  %s3983_s3 = inlined_call_operand.vmem [shape: f32[1,8], index: 3, kind: input, shape index: {}]   ;;  %s3984_s4 = inlined_call_operand.vmem [shape: bf16[128,16], index: 4, kind: input, shape index: {}]   ;;  %s3985_s5 = inlined_call_operand.vmem [shape: f32[1,16], index: 5, kind: input, shape index: {}]   ;;  %s3986_s6 = inlined_call_operand.vmem [shape: f32[1,16], index: 6, kind: input, shape index: {}]   ;;  %s3987_s7 = inlined_call_operand.vmem [shape: bf16[256,32], index: 7, kind: input, shape index: {}]   ;;  %s3988_s8 = inlined_call_operand.vmem [shape: f32[1,32], index: 8, kind: input, shape index: {}]   ;;  %s3989_s9 = inlined_call_operand.vmem [shape: f32[1,32], index: 9, kind: input, shape index: {}]   ;;  %s3990_s10 = inlined_call_operand.vmem [shape: bf16[512,64], index: 10, kind: input, shape index: {}]   ;;  %s3991_s11 = inlined_call_operand.vmem [shape: f32[1,64], index: 11, kind: input, shape index: {}]   ;;  %s3992_s12 = inlined_call_operand.vmem [shape: f32[1,64], index: 12, kind: input, shape index: {}]   ;;  %s3993_s13 = inlined_call_operand.vmem [shape: bf16[64,1], index: 13, kind: input, shape index: {}]   ;;  %s3994_s14 = inlined_call_operand.<no memory space> [shape: f32[1,1], index: 14, kind: input, shape index: {}]   ;;  %s3995_s15 = inlined_call_operand.vmem [shape: f32[2,1,1], index: 15, kind: output, shape index: {}]  }
   0x1   :  { %v20_v0 = vstv %s3994_s14 }
   0x2   :  { %21 = vst [vmem:[#allocation10] sm:$0x1] %v20_v0 }
   0x3 LB: > { %s2459_s21 = sadd.s32 4294967295, %s2851_s20   ;;  %p2463_p0 = scmp.ge.s32.totalorder %s2851_s20, 1  ;;  %s2851_s20 = sphi %s2952_s20, %s27_s20  }
   0x4   : > { %p439_p1 = scmp.lt.s32.totalorder %s2851_s20, 3 }
   0x6   : > { %p440_p2 = pnand %p2463_p0, %p439_p1 }
   0x7   : > { %p485_p3 = scmp.lt.s32.totalorder (!%p440_p2), %s2459_s21, 1  ;;  %s2854_s22 = smov (!%p440_p2), 32  }
   0x8   : > { %443 = sbr.rel (%p440_p2) target bundleno = 1717 (0x6b5), region = 80  ;;  %s2855_s23 = smov (!%p440_p2), 40  }
   0x9   : > { %s2856_s14 = smov (!%p440_p2), 48   ;;  %s2857_s24 = smov (!%p440_p2), 16  }
   0xa   : > { %s2859_s26 = smov (!%p440_p2), 24   ;;  %s2860_s27 = smov (!%p440_p2), 64  }
   0xb   : > { %s2861_s28 = smov (!%p440_p2), 8   ;;  %s2862_s29 = smov (!%p440_p2), 72  }
   0xc   : > { %s2864_s16 = smov (!%p440_p2), 88   ;;  %s2865_s17 = smov (!%p440_p2), 96  }
   0xd   : > { %v2749_v1 = vld [vmem:[%s3981_s1 + $0x10] sm:$0xff]  ;;  %v2748_v2 = vld [vmem:[%s3981_s1 + $0x8] sm:$0xff]  ;;  %s4001_s21 = smov (!%p485_p3, %s2459_s21), 1  ;;  %v2747_v3 = vld [vmem:[%s3981_s1] sm:$0xff]  ;;  %vm546_vm0 = vcmask 392192   ;;  %v2853_v7 = vmov 0.0  }
   0xe   : > { %564 = vmatpush.bf16.msra.mxu0 %v2749_v1  ;;  %s2742_s25 = sshll.u32 %s4001_s21, 5  ;;  %645 = vst [vmem:[#allocation3] sm:$0xff] %v2853_v7  ;;  %v2989_v8 = vld [vmem:[%s3982_s2] ss:$0 sm:$0xff]  ;;  %vm636_vm2 = vcmask 64512   ;;  %vm736_vm5 = vcmask 57344  }
   0xf   : > { %s2975_s30 = scalar_lea.vmem %s3980_s0, %s2742_s25  ;;  %646 = vst [vmem:[#allocation3 + $0x8] sm:$0xff] %v2853_v7  ;;  %v2994_v9 = vld [vmem:[%s3983_s3] ss:$0 sm:$0xff]  ;;  %s2858_s25 = smov 56   ;;  %vm652_vm9 = vcmask 385344   ;;  %vm659_vm10 = vcmask 319744  }
  0x10   : > { %v2743_v4 = vld [vmem:[%s2975_s30] sm:$0xff]  ;;  %v2744_v5 = vld [vmem:[%s2975_s30 + $0x8] sm:$0xff]  ;;  %v2745_v6 = vld [vmem:[%s2975_s30 + $0x10] sm:$0xff]  ;;  %1650 = vst [vmem:[#allocation5] sm:$0xff] %v2853_v7  ;;  %vm664_vm11 = vcmask 450944   ;;  %vm675_vm12 = vcmask 516544  }
  0x11   : > { %v2746_v42 = vld [vmem:[%s2975_s30 + $0x18] sm:$0xff]  ;;  %vm747_vm13 = vcmask 582144   ;;  %vm728_vm14 = vcmask 122944   ;;  %vm742_vm15 = vcmask 188544   ;;  %s2863_s30 = smov 80   ;;  %s2866_s18 = smov 104  }
  0x12   : > { %565 = vmatpush.bf16.msra.mxu0 %v2748_v2  ;;  %s2867_s19 = smov 112  }
  0x16   : > { %566 = vmatpush.bf16.msra.mxu0 %v2747_v3 }
  0x19   : > { %2494 = vmatmul.msk.bf16.vlgmr.msra.gmra.mxu0 %vm546_vm0, %v2743_v4 }
  0x29   : > { %2495 = vmatmul.msk.bf16.gmra.mxu0 %vm546_vm0, %v2744_v5 }
  0x39   : > { %2496 = vmatmul.msk.bf16.gmra.mxu0 %vm546_vm0, %v2745_v6 }
  0x49   : > { %2497 = vmatmul.msk.bf16.gmra.mxu0 %vm546_vm0, %v2746_v42  ;;  %vm763_vm0 = vcmask 254144  }
  0x96   : > { %v568_v10 = vpop.f32.mrf.mxu0 }
  0x97   : > { %v592_v11 = vmul.f32 %v2989_v8, %v568_v10 }
  0x99   : > { %v604_v12 = vadd.f32 %v2994_v9, %v592_v11 }
  0x9b   : > { %vm612_vm1 = vcmp.ge.f32.partialorder %v604_v12, 0.0  ;;  %v620_v13 = vmul.f32 0.2, %v604_v12 }
  0x9d   : > { %v628_v14 = vsel %vm612_vm1, %v604_v12, %v620_v13 }
  0x9e   : > { %637 = vst.msk [vmem:[#allocation2] sm:$0xff] %vm636_vm2, %v628_v14  ;;  %v570_v15 = vpop.f32.mrf.mxu0 }
  0x9f   : > { %v593_v16 = vmul.f32 %v2989_v8, %v570_v15 }
  0xa1   : > { %v605_v17 = vadd.f32 %v2994_v9, %v593_v16 }
  0xa3   : > { %vm613_vm3 = vcmp.ge.f32.partialorder %v605_v17, 0.0  ;;  %v621_v18 = vmul.f32 0.2, %v605_v17 }
  0xa5   : > { %v629_v19 = vsel %vm613_vm3, %v605_v17, %v621_v18  ;;  %v677_v20 = vld [vmem:[#allocation2 + $0x3] sm:$0x1]  ;;  %v3001_v21 = vld [vmem:[#allocation2 + $0x2] sm:$0x1]  ;;  %v654_v22 = vld [vmem:[#allocation2 + $0x1] sm:$0x1] }
  0xa6   : > { %638 = vst.msk [vmem:[#allocation2 + $0x8] sm:$0xff] %vm636_vm2, %v629_v19  ;;  %679 = vrot.lane.b32.xlu1 %v677_v20, %s2854_s22  ;;  %668 = vrot.lane.b32.xlu2 %v3001_v21, %s2855_s23  ;;  %v573_v23 = vpop.f32.mrf.mxu0  ;;  %v697_v27 = vld [vmem:[#allocation2 + $0x5] sm:$0x1]  ;;  %v687_v30 = vld [vmem:[#allocation2 + $0x4] sm:$0x1] }
  0xa7   : > { %656 = vrot.lane.b32.xlu0 %v654_v22, %s2854_s22  ;;  %v594_v24 = vmul.f32 %v2989_v8, %v573_v23  ;;  %v647_v37 = vld [vmem:[#allocation2] sm:$0x1]  ;;  %v707_v39 = vld [vmem:[#allocation2 + $0x6] sm:$0x1] }
  0xa9   : > { %v606_v25 = vadd.f32 %v2994_v9, %v594_v24 }
  0xab   : > { %vm614_vm4 = vcmp.ge.f32.partialorder %v606_v25, 0.0  ;;  %v622_v26 = vmul.f32 0.2, %v606_v25 }
  0xad   : > { %v3010_v28 = vld [vmem:[#allocation2 + $0x9] sm:$0x1]  ;;  %v630_v29 = vsel %vm614_vm4, %v606_v25, %v622_v26  ;;  %v3015_v32 = vld [vmem:[#allocation2 + $0xb] sm:$0x1]  ;;  %v3019_v34 = vld [vmem:[#allocation2 + $0xd] sm:$0x1] }
  0xae   : > { %699 = vrot.lane.b32.xlu1 %v697_v27, %s2854_s22  ;;  %683 = vrot.lane.b32.xlu2 %v677_v20, %s2856_s14  ;;  %639 = vst.msk [vmem:[#allocation2 + $0x10] sm:$0xff] %vm636_vm2, %v630_v29  ;;  %v575_v31 = vpop.f32.mrf.mxu0  ;;  %v3033_v40 = vld [vmem:[#allocation2 + $0xa] sm:$0x1]  ;;  %v3069_v47 = vld [vmem:[#allocation2 + $0xc] sm:$0x1]  ;;  %vm752_vm4 = vcmask 713344  }
  0xaf   : > { %689 = vrot.lane.b32.xlu0 %v687_v30, %s2855_s23  ;;  %v595_v33 = vmul.f32 %v2989_v8, %v575_v31  ;;  %737 = vst.msk [vmem:[#allocation3 + $0x5] sm:$0x1] %vm736_vm5, %v3010_v28  ;;  %v3079_v49 = vld [vmem:[#allocation2 + $0xe] sm:$0x1]  ;;  %v3087_v53 = vld [vmem:[#allocation2 + $0x8] sm:$0x1] }
  0xb0   : > { %775 = vst.msk [vmem:[#allocation3 + $0x6] sm:$0x1] %vm736_vm5, %v3015_v32  ;;  %v3111_v0 = vld [vmem:[#allocation2 + $0xf] sm:$0x1] }
  0xb1   : > { %v607_v35 = vadd.f32 %v2994_v9, %v595_v33  ;;  %808 = vst.msk [vmem:[#allocation3 + $0x7] sm:$0x1] %vm736_vm5, %v3019_v34 }
  0xb3   : > { %vm615_vm6 = vcmp.ge.f32.partialorder %v607_v35, 0.0  ;;  %v623_v36 = vmul.f32 0.2, %v607_v35 }
  0xb5   : > { %v631_v38 = vsel %vm615_vm6, %v607_v35, %v623_v36  ;;  %v3057_v45 = vld [vmem:[#allocation2 + $0x13] sm:$0x1]  ;;  %v3065_v46 = vld [vmem:[#allocation2 + $0x14] sm:$0x1]  ;;  %v3075_v48 = vld [vmem:[#allocation2 + $0x15] sm:$0x1] }
  0xb6   : > { %649 = vrot.lane.b32.xlu2 %v647_v37, %s2855_s23  ;;  %739 = vrot.lane.b32.xlu1 %v3010_v28, %s2857_s24  ;;  %640 = vst.msk [vmem:[#allocation2 + $0x18] sm:$0xff] %vm636_vm2, %v631_v38  ;;  %v578_v50 = vpop.f32.mrf.mxu0  ;;  %v3093_v55 = vld [vmem:[#allocation2 + $0x11] sm:$0x1]  ;;  %v3100_v60 = vld [vmem:[#allocation2 + $0x16] sm:$0x1]  ;;  %vm874_vm6 = vcmask 844544  }
  0xb7   : > { %703 = vrot.lane.b32.xlu0 %v697_v27, %s2856_s14  ;;  %v596_v51 = vmul.f32 %v2989_v8, %v578_v50  ;;  %v3106_v62 = vld [vmem:[#allocation2 + $0x12] sm:$0x1]  ;;  %v3125_v3 = vld [vmem:[#allocation2 + $0x10] sm:$0x1] }
  0xb9   : > { %v608_v52 = vadd.f32 %v2994_v9, %v596_v51 }
  0xbb   : > { %vm616_vm7 = vcmp.ge.f32.partialorder %v608_v52, 0.0  ;;  %v624_v54 = vmul.f32 0.2, %v608_v52 }
  0xbd   : > { %v3038_v41 = vld [vmem:[#allocation2 + $0x1b] sm:$0x1]  ;;  %v3042_v43 = vld [vmem:[#allocation2 + $0x1d] sm:$0x1]  ;;  %v3044_v44 = vld [vmem:[#allocation2 + $0x19] sm:$0x1]  ;;  %v632_v56 = vsel %vm616_vm7, %v608_v52, %v624_v54 }
  0xbe   : > { %713 = vrot.lane.b32.xlu2 %v707_v39, %s2858_s25  ;;  %760 = vrot.lane.b32.xlu1 %v3033_v40, %s2859_s26  ;;  %993 = vst.msk [vmem:[#allocation3 + $0x9] sm:$0x1] %vm736_vm5, %v3044_v44  ;;  %v580_v57 = vpop.f32.mrf.mxu0  ;;  %v3113_v1 = vld [vmem:[#allocation2 + $0x1a] sm:$0x1]  ;;  %v3121_v2 = vld [vmem:[#allocation2 + $0x1c] sm:$0x1] }
  0xbf   : > { %693 = vrot.lane.b32.xlu0 %v687_v30, %s2858_s25  ;;  %1026 = vst.msk [vmem:[#allocation3 + $0xa] sm:$0x1] %vm736_vm5, %v3038_v41  ;;  %v597_v58 = vmul.f32 %v2989_v8, %v580_v57  ;;  %v3149_v12 = vld [vmem:[#allocation2 + $0x1e] sm:$0x1]  ;;  %v3160_v15 = vld [vmem:[#allocation2 + $0x18] sm:$0x1] }
  0xc0   : > { %1059 = vst.msk [vmem:[#allocation3 + $0xb] sm:$0x1] %vm736_vm5, %v3042_v43  ;;  %v3183_v24 = vld [vmem:[#allocation2 + $0x1f] sm:$0x1]  ;;  %vm859_vm7 = vcmask 910144  }
  0xc1   : > { %641 = vst.msk [vmem:[#allocation2 + $0x20] sm:$0xff] %vm636_vm2, %v632_v56  ;;  %v609_v59 = vadd.f32 %v2994_v9, %v597_v58 }
  0xc3   : > { %vm617_vm8 = vcmp.ge.f32.partialorder %v609_v59, 0.0  ;;  %v625_v61 = vmul.f32 0.2, %v609_v59 }
  0xc5   : > { %v633_v63 = vsel %vm617_vm8, %v609_v59, %v625_v61  ;;  %vm879_vm8 = vcmask 975744  }
  0xc6   : > { %661 = vrot.lane.b32.xlu2 %v654_v22, %s2856_s14  ;;  %744 = vrot.lane.b32.xlu1 %v3010_v28, %s2860_s27  ;;  %642 = vst.msk [vmem:[#allocation2 + $0x28] sm:$0xff] %vm636_vm2, %v633_v63  ;;  %v583_v51 = vpop.f32.mrf.mxu0 }
  0xc7   : > { %709 = vrot.lane.b32.xlu0 %v707_v39, %s2855_s23  ;;  %v598_v52 = vmul.f32 %v2989_v8, %v583_v51  ;;  %v717_v51 = vld [vmem:[#allocation2 + $0x7] sm:$0x1] }
  0xc8   : > { %v3158_v14 = vld [vmem:[#allocation2 + $0x23] sm:$0x1]  ;;  %v3172_v19 = vld [vmem:[#allocation2 + $0x22] sm:$0x1]  ;;  %v3193_v29 = vld [vmem:[#allocation2 + $0x20] sm:$0x1] }
  0xc9   : > { %v3202_v35 = vld [vmem:[#allocation2 + $0x24] sm:$0x1]  ;;  %v3204_v36 = vld [vmem:[#allocation2 + $0x26] sm:$0x1]  ;;  %v3208_v37 = vld [vmem:[#allocation2 + $0x21] sm:$0x1]  ;;  %v610_v58 = vadd.f32 %v2994_v9, %v598_v52 }
  0xca   : > { %v3216_v50 = vld [vmem:[#allocation2 + $0x25] sm:$0x1] }
  0xcb   : > { %vm618_vm1 = vcmp.ge.f32.partialorder %v610_v58, 0.0  ;;  %v626_v59 = vmul.f32 0.2, %v610_v58 }
  0xcd   : > { %v3131_v4 = vld [vmem:[#allocation2 + $0x2d] sm:$0x1]  ;;  %v3135_v6 = vld [vmem:[#allocation2 + $0x2b] sm:$0x1]  ;;  %v3139_v10 = vld [vmem:[#allocation2 + $0x29] sm:$0x1]  ;;  %v634_v63 = vsel %vm618_vm1, %v610_v58, %v626_v59 }
  0xce   : > { %777 = vrot.lane.b32.xlu2 %v3015_v32, %s2857_s24  ;;  %902 = vrot.lane.b32.xlu1 %v3057_v45, %s2854_s22  ;;  %1306 = vst.msk [vmem:[#allocation3 + $0xf] sm:$0x1] %vm736_vm5, %v3131_v4  ;;  %v3230_v61 = vld [vmem:[#allocation2 + $0x2c] sm:$0x1]  ;;  %vm1715_vm1 = vcmask 516480  }
  0xcf   : > { %756 = vrot.lane.b32.xlu0 %v3033_v40, %s2861_s28  ;;  %1273 = vst.msk [vmem:[#allocation3 + $0xe] sm:$0x1] %vm736_vm5, %v3135_v6 }
  0xd0   : > { %1240 = vst.msk [vmem:[#allocation3 + $0xd] sm:$0x1] %vm736_vm5, %v3139_v10  ;;  %vm772_vm5 = vcmask 778944  }
  0xd1   : > { %643 = vst.msk [vmem:[#allocation2 + $0x30] sm:$0xff] %vm636_vm2, %v634_v63 }
  0xd6   : > { %810 = vrot.lane.b32.xlu2 %v3019_v34, %s2857_s24  ;;  %920 = vrot.lane.b32.xlu1 %v3065_v46, %s2855_s23 }
  0xd7   : > { %791 = vrot.lane.b32.xlu0 %v3069_v47, %s2861_s28 }
  0xd8   : > { %v3291_v58 = vld [vmem:[#allocation2 + $0x31] sm:$0x1] }
  0xde   : > { %795 = vrot.lane.b32.xlu2 %v3069_v47, %s2859_s26  ;;  %942 = vrot.lane.b32.xlu1 %v3075_v48, %s2856_s14 }
  0xdf   : > { %828 = vrot.lane.b32.xlu0 %v3079_v49, %s2859_s26 }
  0xe6   : > { %725 = vrot.lane.b32.xlu2 %v3087_v53, %s2861_s28  ;;  %924 = vrot.lane.b32.xlu1 %v3065_v46, %s2858_s25 }
  0xe7   : > { %863 = vrot.lane.b32.xlu0 %v3093_v55, %s2854_s22 }
  0xee   : > { %824 = vrot.lane.b32.xlu2 %v3079_v49, %s2861_s28  ;;  %956 = vrot.lane.b32.xlu1 %v3100_v60, %s2855_s23 }
  0xef   : > { %883 = vrot.lane.b32.xlu0 %v3106_v62, %s2855_s23 }
  0xf6   : > { %842 = vrot.lane.b32.xlu2 %v3111_v0, %s2857_s24  ;;  %1009 = vrot.lane.b32.xlu1 %v3113_v1, %s2861_s28 }
  0xf7   : > { %906 = vrot.lane.b32.xlu0 %v3057_v45, %s2856_s14 }
  0xfe   : > { %781 = vrot.lane.b32.xlu2 %v3015_v32, %s2860_s27  ;;  %1042 = vrot.lane.b32.xlu1 %v3121_v2, %s2861_s28 }
  0xff   : > { %852 = vrot.lane.b32.xlu0 %v3125_v3, %s2855_s23 }
 0x100   : > { %v669_v5 = vpop.permute.xlu2 %668 }
 0x106   : > { %938 = vrot.lane.b32.xlu2 %v3075_v48, %s2854_s22  ;;  %1061 = vrot.lane.b32.xlu1 %v3042_v43, %s2857_s24 }
 0x107   : > { %960 = vrot.lane.b32.xlu0 %v3100_v60, %s2858_s25 }
 0x108   : > { %v684_v11 = vpop.permute.xlu2 %683 }
 0x10e   : > { %1079 = vrot.lane.b32.xlu2 %v3149_v12, %s2859_s26  ;;  %1046 = vrot.lane.b32.xlu1 %v3121_v2, %s2859_s26 }
 0x10f   : > { %867 = vrot.lane.b32.xlu0 %v3093_v55, %s2856_s14 }
 0x110   : > { %v650_v13 = vpop.permute.xlu2 %649 }
 0x111   : > { %653 = vst.msk [vmem:[#allocation3] sm:$0x1] %vm652_vm9, %v650_v13 }
 0x116   : > { %984 = vrot.lane.b32.xlu2 %v3160_v15, %s2861_s28  ;;  %1149 = vrot.lane.b32.xlu1 %v3158_v14, %s2854_s22 }
 0x117   : > { %1028 = vrot.lane.b32.xlu0 %v3038_v41, %s2857_s24 }
 0x118   : > { %v680_v16 = vpop.permute.xlu1 %679  ;;  %v714_v17 = vpop.permute.xlu2 %713 }
 0x119   : > { %682 = vst.msk [vmem:[#allocation3 + $0x2] sm:$0x1] %vm659_vm10, %v680_v16  ;;  %v657_v18 = vpop.permute.xlu0 %656 }
 0x11a   : > { %660 = vst.msk [vmem:[#allocation3 + $0x1] sm:$0x1] %vm659_vm10, %v657_v18 }
 0x11b   : > { %671 = vst.msk [vmem:[#allocation3 + $0x1] sm:$0x1] %vm652_vm9, %v669_v5  ;;  %v3237_v5 = vld [vmem:[#allocation2 + $0x2a] sm:$0x1] }
 0x11c   : > { %686 = vst.msk [vmem:[#allocation3 + $0x1] sm:$0x1] %vm664_vm11, %v684_v11  ;;  %v585_v11 = vpop.f32.mrf.mxu0 }
 0x11d   : > { %v599_v13 = vmul.f32 %v2989_v8, %v585_v11 }
 0x11e   : > { %995 = vrot.lane.b32.xlu2 %v3044_v44, %s2857_s24  ;;  %1131 = vrot.lane.b32.xlu1 %v3172_v19, %s2855_s23 }
 0x11f   : > { %1075 = vrot.lane.b32.xlu0 %v3149_v12, %s2861_s28 }
 0x120   : > { %v700_v20 = vpop.permute.xlu1 %699  ;;  %v662_v22 = vpop.permute.xlu2 %661 }
 0x121   : > { %702 = vst.msk [vmem:[#allocation3 + $0x3] sm:$0x1] %vm659_vm10, %v700_v20  ;;  %v690_v23 = vpop.permute.xlu0 %689  ;;  %v611_v20 = vadd.f32 %v2994_v9, %v599_v13  ;;  %v3302_v13 = vld [vmem:[#allocation2 + $0x17] sm:$0x1] }
 0x122   : > { %692 = vst.msk [vmem:[#allocation3 + $0x2] sm:$0x1] %vm652_vm9, %v690_v23 }
 0x123   : > { %665 = vst.msk [vmem:[#allocation3] sm:$0x1] %vm664_vm11, %v662_v22  ;;  %vm619_vm3 = vcmp.ge.f32.partialorder %v611_v20, 0.0  ;;  %v627_v22 = vmul.f32 0.2, %v611_v20 }
 0x125   : > { %v635_v23 = vsel %vm619_vm3, %v611_v20, %v627_v22  ;;  %vm1668_vm3 = vcmask 910080  }
 0x126   : > { %1013 = vrot.lane.b32.xlu2 %v3113_v1, %s2859_s26  ;;  %1153 = vrot.lane.b32.xlu1 %v3158_v14, %s2856_s14  ;;  %644 = vst.msk [vmem:[#allocation2 + $0x38] sm:$0xff] %vm636_vm2, %v635_v23  ;;  %v3322_v23 = vld [vmem:[#allocation2 + $0x27] sm:$0x1]  ;;  %vm733_vm2 = vcmask 647744  }
 0x127   : > { %1093 = vrot.lane.b32.xlu0 %v3183_v24, %s2857_s24 }
 0x128   : > { %v778_v25 = vpop.permute.xlu2 %777  ;;  %v740_v26 = vpop.permute.xlu1 %739 }
 0x129   : > { %v704_v27 = vpop.permute.xlu0 %703 }
 0x12a   : > { %706 = vst.msk [vmem:[#allocation3 + $0x2] sm:$0x1] %vm664_vm11, %v704_v27  ;;  %v3262_v27 = vld [vmem:[#allocation2 + $0x28] sm:$0x1] }
 0x12b   : > { %716 = vst.msk [vmem:[#allocation3 + $0x2] sm:$0x1] %vm675_vm12, %v714_v17 }
 0x12e   : > { %999 = vrot.lane.b32.xlu2 %v3044_v44, %s2860_s27  ;;  %1103 = vrot.lane.b32.xlu1 %v3193_v29, %s2855_s23 }
 0x12f   : > { %1032 = vrot.lane.b32.xlu0 %v3038_v41, %s2860_s27 }
 0x130   : > { %v811_v30 = vpop.permute.xlu2 %810  ;;  %v761_v31 = vpop.permute.xlu1 %760 }
 0x131   : > { %v694_v33 = vpop.permute.xlu0 %693 }
 0x132   : > { %696 = vst.msk [vmem:[#allocation3 + $0x1] sm:$0x1] %vm675_vm12, %v694_v33 }
 0x136   : > { %1167 = vrot.lane.b32.xlu2 %v3202_v35, %s2855_s23  ;;  %1207 = vrot.lane.b32.xlu1 %v3204_v36, %s2858_s25 }
 0x137   : > { %1113 = vrot.lane.b32.xlu0 %v3208_v37, %s2854_s22 }
 0x138   : > { %v796_v38 = vpop.permute.xlu2 %795  ;;  %v745_v39 = vpop.permute.xlu1 %744 }
 0x139   : > { %v710_v42 = vpop.permute.xlu0 %709  ;;  %748 = vst.msk [vmem:[#allocation3 + $0x1] sm:$0x1] %vm747_vm13, %v745_v39 }
 0x13a   : > { %712 = vst.msk [vmem:[#allocation3 + $0x3] sm:$0x1] %vm652_vm9, %v710_v42 }
 0x13e   : > { %1189 = vrot.lane.b32.xlu2 %v3216_v50, %s2856_s14  ;;  %1117 = vrot.lane.b32.xlu1 %v3208_v37, %s2856_s14 }
 0x13f   : > { %1185 = vrot.lane.b32.xlu0 %v3216_v50, %s2854_s22 }
 0x140   : > { %v726_v54 = vpop.permute.xlu2 %725  ;;  %v903_v56 = vpop.permute.xlu1 %902 }
 0x141   : > { %v757_v57 = vpop.permute.xlu0 %756  ;;  %729 = vst.msk [vmem:[#allocation3 + $0x4] sm:$0x1] %vm728_vm14, %v726_v54 }
 0x142   : > { %759 = vst.msk [vmem:[#allocation3 + $0x5] sm:$0x1] %vm728_vm14, %v757_v57  ;;  %v3289_v57 = vld [vmem:[#allocation2 + $0x33] sm:$0x1] }
 0x143   : > { %780 = vst.msk [vmem:[#allocation3 + $0x5] sm:$0x1] %vm742_vm15, %v778_v25 }
 0x144   : > { %743 = vst.msk [vmem:[#allocation3 + $0x4] sm:$0x1] %vm742_vm15, %v740_v26  ;;  %v3260_v26 = vld [vmem:[#allocation2 + $0x2e] sm:$0x1] }
 0x145   : > { %764 = vst.msk [vmem:[#allocation3 + $0x4] sm:$0x1] %vm763_vm0, %v761_v31 }
 0x146   : > { %1171 = vrot.lane.b32.xlu2 %v3202_v35, %s2858_s25  ;;  %1289 = vrot.lane.b32.xlu1 %v3230_v61, %s2861_s28  ;;  %798 = vst.msk [vmem:[#allocation3 + $0x5] sm:$0x1] %vm763_vm0, %v796_v38 }
 0x147   : > { %1256 = vrot.lane.b32.xlu0 %v3237_v5, %s2861_s28 }
 0x148   : > { %v825_v16 = vpop.permute.xlu2 %824  ;;  %v921_v17 = vpop.permute.xlu1 %920 }
 0x149   : > { %v792_v18 = vpop.permute.xlu0 %791  ;;  %827 = vst.msk [vmem:[#allocation3 + $0x7] sm:$0x1] %vm728_vm14, %v825_v16 }
 0x14a   : > { %794 = vst.msk [vmem:[#allocation3 + $0x6] sm:$0x1] %vm728_vm14, %v792_v18 }
 0x14b   : > { %813 = vst.msk [vmem:[#allocation3 + $0x6] sm:$0x1] %vm742_vm15, %v811_v30 }
 0x14e   : > { %1203 = vrot.lane.b32.xlu2 %v3204_v36, %s2855_s23  ;;  %1308 = vrot.lane.b32.xlu1 %v3131_v4, %s2857_s24 }
 0x14f   : > { %1275 = vrot.lane.b32.xlu0 %v3135_v6, %s2857_s24 }
 0x150   : > { %v843_v8 = vpop.permute.xlu2 %842  ;;  %v943_v9 = vpop.permute.xlu1 %942 }
 0x151   : > { %v829_v25 = vpop.permute.xlu0 %828  ;;  %845 = vst.msk [vmem:[#allocation3 + $0x7] sm:$0x1] %vm742_vm15, %v843_v8 }
 0x152   : > { %831 = vst.msk [vmem:[#allocation3 + $0x6] sm:$0x1] %vm763_vm0, %v829_v25 }
 0x153   : > { %905 = vst.msk [vmem:[#allocation3 + $0x6] sm:$0x1] %vm659_vm10, %v903_v56 }
 0x154   : > { %923 = vst.msk [vmem:[#allocation3 + $0x6] sm:$0x1] %vm652_vm9, %v921_v17 }
 0x155   : > { %945 = vst.msk [vmem:[#allocation3 + $0x6] sm:$0x1] %vm664_vm11, %v943_v9 }
 0x156   : > { %1326 = vrot.lane.b32.xlu1 %v3260_v26, %s2859_s26  ;;  %1231 = vrot.lane.b32.xlu2 %v3262_v27, %s2861_s28 }
 0x157   : > { %1293 = vrot.lane.b32.xlu0 %v3230_v61, %s2859_s26 }
 0x158   : > { %v782_v30 = vpop.permute.xlu2 %781  ;;  %v925_v31 = vpop.permute.xlu1 %924 }
 0x159   : > { %784 = vst.msk [vmem:[#allocation3 + $0x2] sm:$0x1] %vm747_vm13, %v782_v30  ;;  %v864_v33 = vpop.permute.xlu0 %863  ;;  %v3334_v30 = vld [vmem:[#allocation2 + $0x32] sm:$0x1] }
 0x15a   : > { %866 = vst.msk [vmem:[#allocation3 + $0x5] sm:$0x1] %vm659_vm10, %v864_v33 }
 0x15e   : > { %1246 = vrot.lane.b32.xlu1 %v3139_v10, %s2860_s27  ;;  %1279 = vrot.lane.b32.xlu2 %v3135_v6, %s2860_s27 }
 0x15f   : > { %1242 = vrot.lane.b32.xlu0 %v3139_v10, %s2857_s24 }
 0x160   : > { %v939_v38 = vpop.permute.xlu2 %938  ;;  %v957_v39 = vpop.permute.xlu1 %956 }
 0x161   : > { %941 = vst.msk [vmem:[#allocation3 + $0x7] sm:$0x1] %vm659_vm10, %v939_v38  ;;  %v884_v42 = vpop.permute.xlu0 %883 }
 0x162   : > { %959 = vst.msk [vmem:[#allocation3 + $0x7] sm:$0x1] %vm652_vm9, %v957_v39 }
 0x163   : > { %886 = vst.msk [vmem:[#allocation3 + $0x5] sm:$0x1] %vm652_vm9, %v884_v42  ;;  %v3346_v42 = vld [vmem:[#allocation2 + $0x34] sm:$0x1] }
 0x166   : > { %719 = vrot.lane.b32.xlu1 %v717_v51, %s2856_s14  ;;  %765 = vrot.lane.b32.xlu2 %v3033_v40, %s2862_s29 }
 0x167   : > { %1322 = vrot.lane.b32.xlu0 %v3260_v26, %s2861_s28  ;;  %s492_s28 = scalar_lea.vmem %s3995_s15, %s4001_s21 }
 0x168   : > { %v1080_v52 = vpop.permute.xlu2 %1079  ;;  %v1010_v54 = vpop.permute.xlu1 %1009 }
 0x169   : > { %v907_v56 = vpop.permute.xlu0 %906  ;;  %1012 = vst.msk [vmem:[#allocation3 + $0x9] sm:$0x1] %vm728_vm14, %v1010_v54 }
 0x16a   : > { %909 = vst.msk [vmem:[#allocation3 + $0x5] sm:$0x1] %vm664_vm11, %v907_v56 }
 0x16b   : > { %927 = vst.msk [vmem:[#allocation3 + $0x5] sm:$0x1] %vm675_vm12, %v925_v31  ;;  %v3336_v31 = vld [vmem:[#allocation2 + $0x2f] sm:$0x1] }
 0x16e   : > { %1396 = vrot.lane.b32.xlu2 %v3289_v57, %s2854_s22  ;;  %1360 = vrot.lane.b32.xlu1 %v3291_v58, %s2854_s22 }
 0x16f   : > { %672 = vrot.lane.b32.xlu0 %v3001_v21, %s2858_s25 }
 0x170   : > { %v1043_v59 = vpop.permute.xlu1 %1042  ;;  %v985_v63 = vpop.permute.xlu2 %984 }
 0x171   : > { %v853_v11 = vpop.permute.xlu0 %852  ;;  %1045 = vst.msk [vmem:[#allocation3 + $0xa] sm:$0x1] %vm728_vm14, %v1043_v59 }
 0x172   : > { %855 = vst.msk [vmem:[#allocation3 + $0x4] sm:$0x1] %vm652_vm9, %v853_v11  ;;  %v3385_v11 = vld [vmem:[#allocation2 + $0x30] sm:$0x1] }
 0x173   : > { %987 = vst.msk [vmem:[#allocation3 + $0x8] sm:$0x1] %vm728_vm14, %v985_v63 }
 0x176   : > { %974 = vrot.lane.b32.xlu2 %v3302_v13, %s2856_s14  ;;  %887 = vrot.lane.b32.xlu1 %v3106_v62, %s2858_s25 }
 0x177   : > { %799 = vrot.lane.b32.xlu0 %v3069_v47, %s2862_s29 }
 0x178   : > { %v1062_v21 = vpop.permute.xlu1 %1061  ;;  %v996_v16 = vpop.permute.xlu2 %995 }
 0x179   : > { %v961_v17 = vpop.permute.xlu0 %960  ;;  %1064 = vst.msk [vmem:[#allocation3 + $0xa] sm:$0x1] %vm742_vm15, %v1062_v21 }
 0x17a   : > { %963 = vst.msk [vmem:[#allocation3 + $0x6] sm:$0x1] %vm675_vm12, %v961_v17 }
 0x17b   : > { %1082 = vst.msk [vmem:[#allocation3 + $0xa] sm:$0x1] %vm763_vm0, %v1080_v52 }
 0x17c   : > { %998 = vst.msk [vmem:[#allocation3 + $0x8] sm:$0x1] %vm742_vm15, %v996_v16  ;;  %v3396_v16 = vld [vmem:[#allocation2 + $0x35] sm:$0x1] }
 0x17e   : > { %1135 = vrot.lane.b32.xlu2 %v3172_v19, %s2858_s25  ;;  %1050 = vrot.lane.b32.xlu1 %v3121_v2, %s2862_s29 }
 0x17f   : > { %1017 = vrot.lane.b32.xlu0 %v3113_v1, %s2862_s29 }
 0x180   : > { %v1047_v18 = vpop.permute.xlu1 %1046  ;;  %v1014_v20 = vpop.permute.xlu2 %1013 }
 0x181   : > { %v868_v22 = vpop.permute.xlu0 %867  ;;  %1016 = vst.msk [vmem:[#allocation3 + $0x8] sm:$0x1] %vm763_vm0, %v1014_v20 }
 0x182   : > { %870 = vst.msk [vmem:[#allocation3 + $0x4] sm:$0x1] %vm664_vm11, %v868_v22 }
 0x186   : > { %1264 = vrot.lane.b32.xlu2 %v3237_v5, %s2862_s29  ;;  %1260 = vrot.lane.b32.xlu1 %v3237_v5, %s2859_s26 }
 0x187   : > { %1221 = vrot.lane.b32.xlu0 %v3322_v23, %s2856_s14 }
 0x188   : > { %v1000_v8 = vpop.permute.xlu2 %999  ;;  %v1150_v9 = vpop.permute.xlu1 %1149 }
 0x189   : > { %v1029_v25 = vpop.permute.xlu0 %1028  ;;  %1002 = vst.msk [vmem:[#allocation3 + $0x5] sm:$0x1] %vm747_vm13, %v1000_v8 }
 0x18a   : > { %1031 = vst.msk [vmem:[#allocation3 + $0x9] sm:$0x1] %vm742_vm15, %v1029_v25  ;;  %v3443_v25 = vld [vmem:[#allocation2 + $0x36] sm:$0x1] }
 0x18b   : > { %1049 = vst.msk [vmem:[#allocation3 + $0x9] sm:$0x1] %vm763_vm0, %v1047_v18 }
 0x18c   : > { %1152 = vst.msk [vmem:[#allocation3 + $0xa] sm:$0x1] %vm659_vm10, %v1150_v9 }
 0x18e   : > { %1378 = vrot.lane.b32.xlu2 %v3334_v30, %s2855_s23  ;;  %1340 = vrot.lane.b32.xlu1 %v3336_v31, %s2857_s24 }
 0x18f   : > { %1297 = vrot.lane.b32.xlu0 %v3230_v61, %s2862_s29 }
 0x190   : > { %v1168_v33 = vpop.permute.xlu2 %1167  ;;  %v1132_v38 = vpop.permute.xlu1 %1131 }
 0x191   : > { %v1076_v39 = vpop.permute.xlu0 %1075  ;;  %1170 = vst.msk [vmem:[#allocation3 + $0xa] sm:$0x1] %vm652_vm9, %v1168_v33 }
 0x192   : > { %1078 = vst.msk [vmem:[#allocation3 + $0xb] sm:$0x1] %vm728_vm14, %v1076_v39 }
 0x196   : > { %785 = vrot.lane.b32.xlu2 %v3015_v32, %s2863_s30  ;;  %730 = vrot.lane.b32.xlu1 %v3087_v53, %s2862_s29 }
 0x197   : > { %1414 = vrot.lane.b32.xlu0 %v3346_v42, %s2855_s23 }
 0x198   : > { %v1190_v51 = vpop.permute.xlu2 %1189  ;;  %v1154_v52 = vpop.permute.xlu1 %1153 }
 0x199   : > { %v1094_v54 = vpop.permute.xlu0 %1093  ;;  %1192 = vst.msk [vmem:[#allocation3 + $0xa] sm:$0x1] %vm664_vm11, %v1190_v51 }
 0x19a   : > { %1096 = vst.msk [vmem:[#allocation3 + $0xb] sm:$0x1] %vm742_vm15, %v1094_v54 }
 0x19e   : > { %988 = vrot.lane.b32.xlu2 %v3160_v15, %s2862_s29  ;;  %818 = vrot.lane.b32.xlu1 %v3019_v34, %s2863_s30 }
 0x19f   : > { %814 = vrot.lane.b32.xlu0 %v3019_v34, %s2860_s27 }
 0x1a0   : > { %v1172_v32 = vpop.permute.xlu2 %1171  ;;  %v1104_v53 = vpop.permute.xlu1 %1103 }
 0x1a1   : > { %v1033_v56 = vpop.permute.xlu0 %1032  ;;  %1106 = vst.msk [vmem:[#allocation3 + $0x8] sm:$0x1] %vm652_vm9, %v1104_v53 }
 0x1a2   : > { %1035 = vst.msk [vmem:[#allocation3 + $0x6] sm:$0x1] %vm747_vm13, %v1033_v56 }
 0x1a6   : > { %1069 = vrot.lane.b32.xlu2 %v3042_v43, %s2863_s30  ;;  %1065 = vrot.lane.b32.xlu1 %v3042_v43, %s2860_s27 }
 0x1a7   : > { %1036 = vrot.lane.b32.xlu0 %v3038_v41, %s2863_s30 }
 0x1a8   : > { %v1204_v15 = vpop.permute.xlu2 %1203  ;;  %v1208_v59 = vpop.permute.xlu1 %1207 }
 0x1a9   : > { %v1114_v63 = vpop.permute.xlu0 %1113  ;;  %1210 = vst.msk [vmem:[#allocation3 + $0xa] sm:$0x1] %vm675_vm12, %v1208_v59  ;;  %v3492_v59 = vld [vmem:[#allocation2 + $0x39] sm:$0x1] }
 0x1aa   : > { %1116 = vst.msk [vmem:[#allocation3 + $0x9] sm:$0x1] %vm659_vm10, %v1114_v63 }
 0x1ab   : > { %1134 = vst.msk [vmem:[#allocation3 + $0x9] sm:$0x1] %vm652_vm9, %v1132_v38 }
 0x1ac   : > { %1156 = vst.msk [vmem:[#allocation3 + $0x9] sm:$0x1] %vm664_vm11, %v1154_v52 }
 0x1ad   : > { %1174 = vst.msk [vmem:[#allocation3 + $0x9] sm:$0x1] %vm675_vm12, %v1172_v32 }
 0x1ae   : > { %1312 = vrot.lane.b32.xlu2 %v3131_v4, %s2860_s27  ;;  %1283 = vrot.lane.b32.xlu1 %v3135_v6, %s2863_s30 }
 0x1af   : > { %1235 = vrot.lane.b32.xlu0 %v3262_v27, %s2862_s29 }
 0x1b0   : > { %v1118_v34 = vpop.permute.xlu1 %1117  ;;  %v1232_v41 = vpop.permute.xlu2 %1231 }
 0x1b1   : > { %v1186_v43 = vpop.permute.xlu0 %1185  ;;  %1120 = vst.msk [vmem:[#allocation3 + $0x8] sm:$0x1] %vm664_vm11, %v1118_v34 }
 0x1b2   : > { %1188 = vst.msk [vmem:[#allocation3 + $0xb] sm:$0x1] %vm659_vm10, %v1186_v43 }
 0x1b3   : > { %1206 = vst.msk [vmem:[#allocation3 + $0xb] sm:$0x1] %vm652_vm9, %v1204_v15  ;;  %v3490_v15 = vld [vmem:[#allocation2 + $0x37] sm:$0x1] }
 0x1b4   : > { %1234 = vst.msk [vmem:[#allocation3 + $0xc] sm:$0x1] %vm728_vm14, %v1232_v41  ;;  %v3505_v41 = vld [vmem:[#allocation2 + $0x3b] sm:$0x1] }
 0x1b6   : > { %1400 = vrot.lane.b32.xlu2 %v3289_v57, %s2856_s14  ;;  %1350 = vrot.lane.b32.xlu1 %v3385_v11, %s2855_s23 }
 0x1b7   : > { %1316 = vrot.lane.b32.xlu0 %v3131_v4, %s2863_s30 }
 0x1b8   : > { %v1290_v6 = vpop.permute.xlu1 %1289  ;;  %v1280_v27 = vpop.permute.xlu2 %1279 }
 0x1b9   : > { %1292 = vst.msk [vmem:[#allocation3 + $0xe] sm:$0x1] %vm728_vm14, %v1290_v6  ;;  %v1257_v21 = vpop.permute.xlu0 %1256 }
 0x1ba   : > { %1259 = vst.msk [vmem:[#allocation3 + $0xd] sm:$0x1] %vm728_vm14, %v1257_v21 }
 0x1bb   : > { %1282 = vst.msk [vmem:[#allocation3 + $0xa] sm:$0x1] %vm747_vm13, %v1280_v27 }
 0x1be   : > { %749 = vrot.lane.b32.xlu2 %v3010_v28, %s2863_s30  ;;  %1436 = vrot.lane.b32.xlu1 %v3396_v16, %s2856_s14 }
 0x1bf   : > { %1432 = vrot.lane.b32.xlu0 %v3396_v16, %s2854_s22 }
 0x1c0   : > { %v1309_v4 = vpop.permute.xlu1 %1308  ;;  %v766_v17 = vpop.permute.xlu2 %765 }
 0x1c1   : > { %1311 = vst.msk [vmem:[#allocation3 + $0xe] sm:$0x1] %vm742_vm15, %v1309_v4  ;;  %v1276_v18 = vpop.permute.xlu0 %1275 }
 0x1c2   : > { %1278 = vst.msk [vmem:[#allocation3 + $0xd] sm:$0x1] %vm742_vm15, %v1276_v18 }
 0x1c3   : > { %768 = vst.msk [vmem:[#allocation3 + $0x1] sm:$0x1] %vm733_vm2, %v766_v17 }
 0x1c6   : > { %836 = vrot.lane.b32.xlu2 %v3079_v49, %s2864_s16  ;;  %832 = vrot.lane.b32.xlu1 %v3079_v49, %s2862_s29 }
 0x1c7   : > { %803 = vrot.lane.b32.xlu0 %v3069_v47, %s2864_s16 }
 0x1c8   : > { %v1327_v28 = vpop.permute.xlu1 %1326  ;;  %v1397_v20 = vpop.permute.xlu2 %1396 }
 0x1c9   : > { %1329 = vst.msk [vmem:[#allocation3 + $0xe] sm:$0x1] %vm763_vm0, %v1327_v28  ;;  %v1294_v22 = vpop.permute.xlu0 %1293 }
 0x1ca   : > { %1296 = vst.msk [vmem:[#allocation3 + $0xd] sm:$0x1] %vm763_vm0, %v1294_v22  ;;  %v3541_v22 = vld [vmem:[#allocation2 + $0x3a] sm:$0x1] }
 0x1cb   : > { %1399 = vst.msk [vmem:[#allocation3 + $0xe] sm:$0x1] %vm659_vm10, %v1397_v20 }
 0x1ce   : > { %1083 = vrot.lane.b32.xlu2 %v3149_v12, %s2862_s29  ;;  %1054 = vrot.lane.b32.xlu1 %v3121_v2, %s2864_s16 }
 0x1cf   : > { %1003 = vrot.lane.b32.xlu0 %v3044_v44, %s2863_s30 }
 0x1d0   : > { %v1247_v49 = vpop.permute.xlu1 %1246  ;;  %v975_v47 = vpop.permute.xlu2 %974 }
 0x1d1   : > { %1249 = vst.msk [vmem:[#allocation3 + $0x9] sm:$0x1] %vm747_vm13, %v1247_v49  ;;  %v1243_v8 = vpop.permute.xlu0 %1242  ;;  %v1476_v49 = vld [vmem:[#allocation2 + $0x38] sm:$0x1] }
 0x1d2   : > { %1245 = vst.msk [vmem:[#allocation3 + $0xc] sm:$0x1] %vm742_vm15, %v1243_v8 }
 0x1d3   : > { %977 = vst.msk [vmem:[#allocation3 + $0x7] sm:$0x1] %vm664_vm11, %v975_v47 }
 0x1d6   : > { %1301 = vrot.lane.b32.xlu2 %v3230_v61, %s2864_s16  ;;  %1250 = vrot.lane.b32.xlu1 %v3139_v10, %s2863_s30 }
 0x1d7   : > { %1087 = vrot.lane.b32.xlu0 %v3149_v12, %s2864_s16 }
 0x1d8   : > { %v720_v2 = vpop.permute.xlu1 %719  ;;  %v1136_v44 = vpop.permute.xlu2 %1135 }
 0x1d9   : > { %722 = vst.msk [vmem:[#allocation3 + $0x3] sm:$0x1] %vm664_vm11, %v720_v2  ;;  %v1323_v9 = vpop.permute.xlu0 %1322  ;;  %v1522_v2 = vld [vmem:[#allocation2 + $0x3d] sm:$0x1] }
 0x1da   : > { %1325 = vst.msk [vmem:[#allocation3 + $0xf] sm:$0x1] %vm728_vm14, %v1323_v9  ;;  %vm1692_vm14 = vcmask 254080  }
 0x1db   : > { %1138 = vst.msk [vmem:[#allocation3 + $0x8] sm:$0x1] %vm675_vm12, %v1136_v44  ;;  %v3551_v44 = vld [vmem:[#allocation2 + $0x3c] sm:$0x1] }
 0x1de   : > { %1364 = vrot.lane.b32.xlu2 %v3291_v58, %s2856_s14  ;;  %1334 = vrot.lane.b32.xlu1 %v3260_v26, %s2864_s16 }
 0x1df   : > { %1330 = vrot.lane.b32.xlu0 %v3260_v26, %s2862_s29 }
 0x1e0   : > { %v1265_v10 = vpop.permute.xlu2 %1264  ;;  %v1361_v12 = vpop.permute.xlu1 %1360 }
 0x1e1   : > { %v673_v61 = vpop.permute.xlu0 %672  ;;  %1267 = vst.msk [vmem:[#allocation3 + $0x9] sm:$0x1] %vm733_vm2, %v1265_v10 }
 0x1e2   : > { %676 = vst.msk [vmem:[#allocation3] sm:$0x1] %vm675_vm12, %v673_v61 }
 0x1e3   : > { %1363 = vst.msk [vmem:[#allocation3 + $0xd] sm:$0x1] %vm659_vm10, %v1361_v12 }
 0x1e6   : > { %1454 = vrot.lane.b32.xlu2 %v3443_v25, %s2858_s25  ;;  %1450 = vrot.lane.b32.xlu1 %v3443_v25, %s2855_s23  ;;  %s2868_s23 = smov 120  }
 0x1e7   : > { %1418 = vrot.lane.b32.xlu0 %v3346_v42, %s2858_s25 }
 0x1e8   : > { %v1379_v26 = vpop.permute.xlu2 %1378  ;;  %v888_v33 = vpop.permute.xlu1 %887 }
 0x1e9   : > { %v800_v38 = vpop.permute.xlu0 %799  ;;  %1381 = vst.msk [vmem:[#allocation3 + $0xd] sm:$0x1] %vm652_vm9, %v1379_v26 }
 0x1ea   : > { %802 = vst.msk [vmem:[#allocation3 + $0x2] sm:$0x1] %vm733_vm2, %v800_v38 }
 0x1eb   : > { %890 = vst.msk [vmem:[#allocation3 + $0x4] sm:$0x1] %vm675_vm12, %v888_v33 }
 0x1ee   : > { %871 = vrot.lane.b32.xlu2 %v3093_v55, %s2865_s17  ;;  %846 = vrot.lane.b32.xlu1 %v3111_v0, %s2863_s30 }
 0x1ef   : > { %769 = vrot.lane.b32.xlu0 %v3033_v40, %s2864_s16 }
 0x1f0   : > { %v786_v39 = vpop.permute.xlu2 %785  ;;  %v1051_v51 = vpop.permute.xlu1 %1050 }
 0x1f1   : > { %v1018_v52 = vpop.permute.xlu0 %1017  ;;  %788 = vst.msk [vmem:[#allocation3 + $0x1] sm:$0x1] %vm752_vm4, %v786_v39  ;;  %v1532_v39 = vld [vmem:[#allocation2 + $0x3e] sm:$0x1] }
 0x1f2   : > { %1020 = vst.msk [vmem:[#allocation3 + $0x5] sm:$0x1] %vm733_vm2, %v1018_v52 }
 0x1f3   : > { %1053 = vst.msk [vmem:[#allocation3 + $0x6] sm:$0x1] %vm733_vm2, %v1051_v51 }
 0x1f6   : > { %1097 = vrot.lane.b32.xlu2 %v3183_v24, %s2863_s30  ;;  %1021 = vrot.lane.b32.xlu1 %v3113_v1, %s2864_s16 }
 0x1f7   : > { %910 = vrot.lane.b32.xlu0 %v3057_v45, %s2865_s17 }
 0x1f8   : > { %v989_v0 = vpop.permute.xlu2 %988  ;;  %v1261_v40 = vpop.permute.xlu1 %1260 }
 0x1f9   : > { %v1222_v54 = vpop.permute.xlu0 %1221  ;;  %991 = vst.msk [vmem:[#allocation3 + $0x4] sm:$0x1] %vm733_vm2, %v989_v0  ;;  %v2844_v0 = vld [vmem:[#allocation2 + $0x14] sm:$0x1] }
 0x1fa   : > { %1224 = vst.msk [vmem:[#allocation3 + $0xb] sm:$0x1] %vm664_vm11, %v1222_v54 }
 0x1fb   : > { %1263 = vst.msk [vmem:[#allocation3 + $0xc] sm:$0x1] %vm763_vm0, %v1261_v40  ;;  %vm1656_vm0 = vcmask 778880  }
 0x1fe   : > { %1268 = vrot.lane.b32.xlu2 %v3237_v5, %s2864_s16  ;;  %1157 = vrot.lane.b32.xlu1 %v3158_v14, %s2865_s17 }
 0x1ff   : > { %1121 = vrot.lane.b32.xlu0 %v3208_v37, %s2865_s17 }
 0x200   : > { %v1070_v1 = vpop.permute.xlu2 %1069  ;;  %v1341_v24 = vpop.permute.xlu1 %1340 }
 0x201   : > { %v1298_v32 = vpop.permute.xlu0 %1297  ;;  %1072 = vst.msk [vmem:[#allocation3 + $0x6] sm:$0x1] %vm752_vm4, %v1070_v1 }
 0x202   : > { %1300 = vst.msk [vmem:[#allocation3 + $0xa] sm:$0x1] %vm733_vm2, %v1298_v32 }
 0x203   : > { %1343 = vst.msk [vmem:[#allocation3 + $0xf] sm:$0x1] %vm742_vm15, %v1341_v24  ;;  %vm1702_vm15 = vcmask 385280  }
 0x206   : > { %1382 = vrot.lane.b32.xlu2 %v3334_v30, %s2858_s25  ;;  %1368 = vrot.lane.b32.xlu1 %v3291_v58, %s2865_s17 }
 0x207   : > { %1344 = vrot.lane.b32.xlu0 %v3336_v31, %s2863_s30 }
 0x208   : > { %v1313_v5 = vpop.permute.xlu2 %1312  ;;  %v731_v53 = vpop.permute.xlu1 %730 }
 0x209   : > { %v1415_v56 = vpop.permute.xlu0 %1414  ;;  %1315 = vst.msk [vmem:[#allocation3 + $0xb] sm:$0x1] %vm747_vm13, %v1313_v5  ;;  %v1542_v5 = vld [vmem:[#allocation2 + $0x3f] sm:$0x1] }
 0x20a   : > { %1417 = vst.msk [vmem:[#allocation3 + $0xe] sm:$0x1] %vm652_vm9, %v1415_v56 }
 0x20b   : > { %734 = vst.msk [vmem:[#allocation3] sm:$0x1] %vm733_vm2, %v731_v53 }
 0x20e   : > { %1468 = vrot.lane.b32.xlu1 %v3490_v15, %s2856_s14  ;;  %1484 = vrot.lane.b32.xlu2 %v3492_v59, %s2860_s27 }
 0x20f   : > { %1404 = vrot.lane.b32.xlu0 %v3289_v57, %s2865_s17 }
 0x210   : > { %v1401_v31 = vpop.permute.xlu2 %1400  ;;  %v819_v63 = vpop.permute.xlu1 %818 }
 0x211   : > { %v815_v34 = vpop.permute.xlu0 %814  ;;  %1403 = vst.msk [vmem:[#allocation3 + $0xd] sm:$0x1] %vm664_vm11, %v1401_v31 }
 0x212   : > { %817 = vst.msk [vmem:[#allocation3 + $0x3] sm:$0x1] %vm747_vm13, %v815_v34 }
 0x213   : > { %821 = vst.msk [vmem:[#allocation3 + $0x2] sm:$0x1] %vm752_vm4, %v819_v63 }
 0x216   : > { %856 = vrot.lane.b32.xlu1 %v3125_v3, %s2866_s18  ;;  %891 = vrot.lane.b32.xlu2 %v3106_v62, %s2866_s18 }
 0x217   : > { %1504 = vrot.lane.b32.xlu0 %v3505_v41, %s2860_s27 }
 0x218   : > { %v750_v43 = vpop.permute.xlu2 %749  ;;  %v1066_v6 = vpop.permute.xlu1 %1065 }
 0x219   : > { %v1037_v27 = vpop.permute.xlu0 %1036  ;;  %753 = vst.msk [vmem:[#allocation3] sm:$0x1] %vm752_vm4, %v750_v43 }
 0x21a   : > { %1039 = vst.msk [vmem:[#allocation3 + $0x5] sm:$0x1] %vm752_vm4, %v1037_v27 }
 0x21b   : > { %1068 = vst.msk [vmem:[#allocation3 + $0x7] sm:$0x1] %vm747_vm13, %v1066_v6 }
 0x21e   : > { %946 = vrot.lane.b32.xlu1 %v3075_v48, %s2865_s17  ;;  %1107 = vrot.lane.b32.xlu2 %v3193_v29, %s2866_s18 }
 0x21f   : > { %928 = vrot.lane.b32.xlu0 %v3065_v46, %s2866_s18 }
 0x220   : > { %v837_v3 = vpop.permute.xlu2 %836  ;;  %v1284_v21 = vpop.permute.xlu1 %1283 }
 0x221   : > { %v1236_v4 = vpop.permute.xlu0 %1235  ;;  %839 = vst.msk [vmem:[#allocation3 + $0x2] sm:$0x1] %vm772_vm5, %v837_v3 }
 0x222   : > { %1238 = vst.msk [vmem:[#allocation3 + $0x8] sm:$0x1] %vm733_vm2, %v1236_v4 }
 0x223   : > { %1286 = vst.msk [vmem:[#allocation3 + $0x9] sm:$0x1] %vm752_vm4, %v1284_v21 }
 0x226   : > { %1175 = vrot.lane.b32.xlu1 %v3202_v35, %s2866_s18  ;;  %1193 = vrot.lane.b32.xlu2 %v3216_v50, %s2865_s17 }
 0x227   : > { %1139 = vrot.lane.b32.xlu0 %v3172_v19, %s2866_s18 }
 0x228   : > { %v1084_v29 = vpop.permute.xlu2 %1083  ;;  %v1351_v46 = vpop.permute.xlu1 %1350 }
 0x229   : > { %v1317_v17 = vpop.permute.xlu0 %1316  ;;  %1086 = vst.msk [vmem:[#allocation3 + $0x7] sm:$0x1] %vm733_vm2, %v1084_v29 }
 0x22a   : > { %1319 = vst.msk [vmem:[#allocation3 + $0xa] sm:$0x1] %vm752_vm4, %v1317_v17 }
 0x22b   : > { %1353 = vst.msk [vmem:[#allocation3 + $0xc] sm:$0x1] %vm652_vm9, %v1351_v46 }
 0x22e   : > { %1386 = vrot.lane.b32.xlu1 %v3334_v30, %s2866_s18  ;;  %1422 = vrot.lane.b32.xlu2 %v3346_v42, %s2866_s18 }
 0x22f   : > { %1354 = vrot.lane.b32.xlu0 %v3385_v11, %s2866_s18 }
 0x230   : > { %v1302_v18 = vpop.permute.xlu2 %1301  ;;  %v1437_v28 = vpop.permute.xlu1 %1436 }
 0x231   : > { %v1433_v20 = vpop.permute.xlu0 %1432  ;;  %1304 = vst.msk [vmem:[#allocation3 + $0x9] sm:$0x1] %vm772_vm5, %v1302_v18 }
 0x232   : > { %1435 = vst.msk [vmem:[#allocation3 + $0xf] sm:$0x1] %vm659_vm10, %v1433_v20 }
 0x233   : > { %1439 = vst.msk [vmem:[#allocation3 + $0xe] sm:$0x1] %vm664_vm11, %v1437_v28 }
 0x236   : > { %1494 = vrot.lane.b32.xlu2 %v3541_v22, %s2862_s29  ;;  %1478 = vrot.lane.b32.xlu1 %v1476_v49, %s2862_s29 }
 0x237   : > { %1440 = vrot.lane.b32.xlu0 %v3396_v16, %s2865_s17 }
 0x238   : > { %v1365_v11 = vpop.permute.xlu2 %1364  ;;  %v833_v47 = vpop.permute.xlu1 %832 }
 0x239   : > { %v804_v8 = vpop.permute.xlu0 %803  ;;  %1367 = vst.msk [vmem:[#allocation3 + $0xc] sm:$0x1] %vm664_vm11, %v1365_v11 }
 0x23a   : > { %806 = vst.msk [vmem:[#allocation3 + $0x1] sm:$0x1] %vm772_vm5, %v804_v8  ;;  %v2757_v8 = vld [vmem:[%s3984_s4 + $0x38] sm:$0xff] }
 0x23b   : > { %835 = vst.msk [vmem:[#allocation3 + $0x3] sm:$0x1] %vm733_vm2, %v833_v47  ;;  %1615 = vmatpush.bf16.msra.mxu1 %v2757_v8 }
 0x23e   : > { %876 = vrot.lane.b32.xlu2 %v3093_v55, %s2867_s19  ;;  %1524 = vrot.lane.b32.xlu1 %v1522_v2, %s2860_s27 }
 0x23f   : > { %1514 = vrot.lane.b32.xlu0 %v3551_v44, %s2862_s29 }
 0x240   : > { %v1455_v9 = vpop.permute.xlu2 %1454  ;;  %v1055_v10 = vpop.permute.xlu1 %1054 }
 0x241   : > { %v1004_v12 = vpop.permute.xlu0 %1003  ;;  %1457 = vst.msk [vmem:[#allocation3 + $0xe] sm:$0x1] %vm675_vm12, %v1455_v9 }
 0x242   : > { %1006 = vst.msk [vmem:[#allocation3 + $0x4] sm:$0x1] %vm752_vm4, %v1004_v12  ;;  %v2755_v12 = vld [vmem:[%s3984_s4 + $0x28] sm:$0xff] }
 0x243   : > { %1057 = vst.msk [vmem:[#allocation3 + $0x5] sm:$0x1] %vm772_vm5, %v1055_v10 }
 0x246   : > { %964 = vrot.lane.b32.xlu2 %v3100_v60, %s2866_s18  ;;  %950 = vrot.lane.b32.xlu1 %v3075_v48, %s2867_s19 }
 0x247   : > { %914 = vrot.lane.b32.xlu0 %v3057_v45, %s2867_s19 }
 0x248   : > { %v872_v55 = vpop.permute.xlu2 %871  ;;  %v1251_v61 = vpop.permute.xlu1 %1250 }
 0x249   : > { %v1088_v26 = vpop.permute.xlu0 %1087  ;;  %875 = vst.msk [vmem:[#allocation3 + $0x1] sm:$0x1] %vm874_vm6, %v872_v55  ;;  %v2754_v55 = vld [vmem:[%s3984_s4 + $0x20] sm:$0xff] }
 0x24a   : > { %1090 = vst.msk [vmem:[#allocation3 + $0x6] sm:$0x1] %vm772_vm5, %v1088_v26 }
 0x24b   : > { %1253 = vst.msk [vmem:[#allocation3 + $0x8] sm:$0x1] %vm752_vm4, %v1251_v61 }
 0x24e   : > { %1197 = vrot.lane.b32.xlu2 %v3216_v50, %s2867_s19  ;;  %1161 = vrot.lane.b32.xlu1 %v3158_v14, %s2867_s19 }
 0x24f   : > { %1125 = vrot.lane.b32.xlu0 %v3208_v37, %s2867_s19 }
 0x250   : > { %v1098_v48 = vpop.permute.xlu2 %1097  ;;  %v1335_v45 = vpop.permute.xlu1 %1334 }
 0x251   : > { %v1331_v33 = vpop.permute.xlu0 %1330  ;;  %1100 = vst.msk [vmem:[#allocation3 + $0x7] sm:$0x1] %vm752_vm4, %v1098_v48 }
 0x252   : > { %1333 = vst.msk [vmem:[#allocation3 + $0xb] sm:$0x1] %vm733_vm2, %v1331_v33  ;;  %v2752_v33 = vld [vmem:[%s3984_s4 + $0x10] sm:$0xff] }
 0x253   : > { %1337 = vst.msk [vmem:[#allocation3 + $0xa] sm:$0x1] %vm772_vm5, %v1335_v45  ;;  %v2753_v45 = vld [vmem:[%s3984_s4 + $0x18] sm:$0xff] }
 0x256   : > { %1408 = vrot.lane.b32.xlu2 %v3289_v57, %s2867_s19  ;;  %1372 = vrot.lane.b32.xlu1 %v3291_v58, %s2867_s19 }
 0x257   : > { %1211 = vrot.lane.b32.xlu0 %v3204_v36, %s2866_s18 }
 0x258   : > { %v1269_v14 = vpop.permute.xlu2 %1268  ;;  %v1451_v37 = vpop.permute.xlu1 %1450 }
 0x259   : > { %v1419_v50 = vpop.permute.xlu0 %1418  ;;  %1271 = vst.msk [vmem:[#allocation3 + $0x8] sm:$0x1] %vm772_vm5, %v1269_v14 }
 0x25a   : > { %1421 = vst.msk [vmem:[#allocation3 + $0xd] sm:$0x1] %vm675_vm12, %v1419_v50 }
 0x25b   : > { %1453 = vst.msk [vmem:[#allocation3 + $0xf] sm:$0x1] %vm652_vm9, %v1451_v37  ;;  %vm898_vm9 = vcmask 1041344  }
 0x25e   : > { %1488 = vrot.lane.b32.xlu2 %v3492_v59, %s2863_s30  ;;  %1458 = vrot.lane.b32.xlu1 %v3443_v25, %s2866_s18 }
 0x25f   : > { %1444 = vrot.lane.b32.xlu0 %v3396_v16, %s2867_s19 }
 0x260   : > { %v1383_v57 = vpop.permute.xlu2 %1382  ;;  %v847_v58 = vpop.permute.xlu1 %846 }
 0x261   : > { %v770_v38 = vpop.permute.xlu0 %769  ;;  %1385 = vst.msk [vmem:[#allocation3 + $0xc] sm:$0x1] %vm675_vm12, %v1383_v57  ;;  %v2751_v57 = vld [vmem:[%s3984_s4 + $0x8] sm:$0xff] }
 0x262   : > { %773 = vst.msk [vmem:[#allocation3] sm:$0x1] %vm772_vm5, %v770_v38 }
 0x263   : > { %849 = vst.msk [vmem:[#allocation3 + $0x3] sm:$0x1] %vm752_vm4, %v847_v58  ;;  %v2750_v58 = vld [vmem:[%s3984_s4] sm:$0xff] }
 0x266   : > { %1534 = vrot.lane.b32.xlu2 %v1532_v39, %s2862_s29  ;;  %1528 = vrot.lane.b32.xlu1 %v1522_v2, %s2863_s30  ;;  %v2756_v2 = vld [vmem:[%s3984_s4 + $0x30] sm:$0xff] }
 0x267   : > { %1508 = vrot.lane.b32.xlu0 %v3505_v41, %s2863_s30  ;;  %1616 = vmatpush.bf16.msra.mxu1 %v2756_v2  ;;  %v2765_v2 = vld [vmem:[%s3987_s7 + $0x38] sm:$0xff] }
 0x268   : > { %v1022_v51 = vpop.permute.xlu1 %1021  ;;  %v1485_v52 = vpop.permute.xlu2 %1484  ;;  %1930 = vmatpush.bf16.msra.mxu2 %v2765_v2  ;;  %v2800_v2 = vld [vmem:[%s3990_s10 + $0xd0] sm:$0xff] }
 0x269   : > { %v911_v16 = vpop.permute.xlu0 %910  ;;  %1024 = vst.msk [vmem:[#allocation3 + $0x4] sm:$0x1] %vm772_vm5, %v1022_v51 }
 0x26a   : > { %913 = vst.msk [vmem:[#allocation3 + $0x2] sm:$0x1] %vm874_vm6, %v911_v16 }
 0x26b   : > { %1487 = vst.msk [vmem:[#allocation3 + $0xd] sm:$0x1] %vm747_vm13, %v1485_v52  ;;  %1617 = vmatpush.bf16.msra.mxu1 %v2755_v12 }
 0x26e   : > { %968 = vrot.lane.b32.xlu2 %v3100_v60, %s2868_s23  ;;  %932 = vrot.lane.b32.xlu1 %v2844_v0, %s2868_s23 }
 0x26f   : > { %895 = vrot.lane.b32.xlu0 %v3106_v62, %s2868_s23  ;;  %1618 = vmatpush.bf16.msra.mxu1 %v2754_v55 }
 0x270   : > { %v1158_v40 = vpop.permute.xlu1 %1157  ;;  %v892_v54 = vpop.permute.xlu2 %891 }
 0x271   : > { %v1122_v1 = vpop.permute.xlu0 %1121  ;;  %1160 = vst.msk [vmem:[#allocation3 + $0x6] sm:$0x1] %vm874_vm6, %v1158_v40 }
 0x272   : > { %1124 = vst.msk [vmem:[#allocation3 + $0x5] sm:$0x1] %vm874_vm6, %v1122_v1 }
 0x273   : > { %894 = vst.msk [vmem:[#allocation3 + $0x1] sm:$0x1] %vm859_vm7, %v892_v54  ;;  %1619 = vmatpush.bf16.msra.mxu1 %v2753_v45  ;;  %v2762_v45 = vld [vmem:[%s3987_s7 + $0x20] sm:$0xff] }
 0x276   : > { %1179 = vrot.lane.b32.xlu2 %v3202_v35, %s2868_s23  ;;  %1143 = vrot.lane.b32.xlu1 %v3172_v19, %s2868_s23 }
 0x277   : > { %978 = vrot.lane.b32.xlu0 %v3302_v13, %s2867_s19  ;;  %1620 = vmatpush.bf16.msra.mxu1 %v2752_v33  ;;  %v2770_v33 = vld [vmem:[%s3987_s7 + $0x60] sm:$0xff] }
 0x278   : > { %v1369_v60 = vpop.permute.xlu1 %1368  ;;  %v1108_v62 = vpop.permute.xlu2 %1107 }
 0x279   : > { %v1345_v24 = vpop.permute.xlu0 %1344  ;;  %1371 = vst.msk [vmem:[#allocation3 + $0x9] sm:$0x1] %vm874_vm6, %v1369_v60 }
 0x27a   : > { %1347 = vst.msk [vmem:[#allocation3 + $0xb] sm:$0x1] %vm752_vm4, %v1345_v24  ;;  %v2837_v24 = vld [vmem:[%s3986_s6] ss:$0 sm:$0xff] }
 0x27b   : > { %1110 = vst.msk [vmem:[#allocation3 + $0x4] sm:$0x1] %vm859_vm7, %v1108_v62  ;;  %1621 = vmatpush.bf16.msra.mxu1 %v2751_v57  ;;  %v2836_v62 = vld [vmem:[%s3985_s5] ss:$0 sm:$0xff] }
 0x27e   : > { %1390 = vrot.lane.b32.xlu2 %v3334_v30, %s2868_s23  ;;  %1225 = vrot.lane.b32.xlu1 %v3322_v23, %s2867_s19 }
 0x27f   : > { %1215 = vrot.lane.b32.xlu0 %v3204_v36, %s2868_s23  ;;  %1622 = vmatpush.bf16.msra.mxu1 %v2750_v58  ;;  %v2761_v58 = vld [vmem:[%s3987_s7 + $0x18] sm:$0xff] }
 0x280   : > { %v1469_v19 = vpop.permute.xlu1 %1468  ;;  %v1194_v35 = vpop.permute.xlu2 %1193 }
 0x281   : > { %v1405_v13 = vpop.permute.xlu0 %1404  ;;  %1471 = vst.msk [vmem:[#allocation3 + $0xf] sm:$0x1] %vm664_vm11, %v1469_v19  ;;  %vm1647_vm11 = vcmask 130048  }
 0x282   : > { %1407 = vst.msk [vmem:[#allocation3 + $0xa] sm:$0x1] %vm874_vm6, %v1405_v13 }
 0x283   : > { %1196 = vst.msk [vmem:[#allocation3 + $0x7] sm:$0x1] %vm874_vm6, %v1194_v35 }
 0x286   : > { %1472 = vrot.lane.b32.xlu2 %v3490_v15, %s2867_s19  ;;  %1462 = vrot.lane.b32.xlu1 %v3443_v25, %s2868_s23 }
 0x287   : > { %1426 = vrot.lane.b32.xlu0 %v3346_v42, %s2868_s23 }
 0x288   : > { %v857_v23 = vpop.permute.xlu1 %856  ;;  %v1423_v36 = vpop.permute.xlu2 %1422 }
 0x289   : > { %860 = vst.msk [vmem:[#allocation3] sm:$0x1] %vm859_vm7, %v857_v23  ;;  %v1505_v30 = vpop.permute.xlu0 %1504 }
 0x28a   : > { %1507 = vst.msk [vmem:[#allocation3 + $0xe] sm:$0x1] %vm747_vm13, %v1505_v30 }
 0x28b   : > { %1425 = vst.msk [vmem:[#allocation3 + $0xa] sm:$0x1] %vm859_vm7, %v1423_v36 }
 0x28e   : > { %1538 = vrot.lane.b32.xlu2 %v1532_v39, %s2864_s16  ;;  %1518 = vrot.lane.b32.xlu1 %v3551_v44, %s2864_s16 }
 0x28f   : > { %1498 = vrot.lane.b32.xlu0 %v3541_v22, %s2864_s16 }
 0x290   : > { %v947_v25 = vpop.permute.xlu1 %946  ;;  %v1495_v32 = vpop.permute.xlu2 %1494 }
 0x291   : > { %949 = vst.msk [vmem:[#allocation3 + $0x3] sm:$0x1] %vm874_vm6, %v947_v25  ;;  %v929_v42 = vpop.permute.xlu0 %928 }
 0x292   : > { %931 = vst.msk [vmem:[#allocation3 + $0x2] sm:$0x1] %vm859_vm7, %v929_v42 }
 0x293   : > { %1497 = vst.msk [vmem:[#allocation3 + $0xd] sm:$0x1] %vm733_vm2, %v1495_v32 }
 0x297   : > { %1544 = vrot.lane.b32.xlu0 %v1542_v5, %s2863_s30 }
 0x298   : > { %v1176_v53 = vpop.permute.xlu1 %1175  ;;  %v877_v56 = vpop.permute.xlu2 %876 }
 0x299   : > { %1178 = vst.msk [vmem:[#allocation3 + $0x6] sm:$0x1] %vm859_vm7, %v1176_v53  ;;  %v1140_v15 = vpop.permute.xlu0 %1139 }
 0x29a   : > { %1142 = vst.msk [vmem:[#allocation3 + $0x5] sm:$0x1] %vm859_vm7, %v1140_v15 }
 0x29b   : > { %880 = vst.msk [vmem:[#allocation3] sm:$0x1] %vm879_vm8, %v877_v56 }
 0x2a0   : > { %v1387_v59 = vpop.permute.xlu1 %1386  ;;  %v965_v31 = vpop.permute.xlu2 %964 }
 0x2a1   : > { %1389 = vst.msk [vmem:[#allocation3 + $0x9] sm:$0x1] %vm859_vm7, %v1387_v59  ;;  %v1355_v63 = vpop.permute.xlu0 %1354 }
 0x2a2   : > { %1357 = vst.msk [vmem:[#allocation3 + $0x8] sm:$0x1] %vm859_vm7, %v1355_v63 }
 0x2a3   : > { %967 = vst.msk [vmem:[#allocation3 + $0x3] sm:$0x1] %vm859_vm7, %v965_v31 }
 0x2a8   : > { %v1198_v34 = vpop.permute.xlu2 %1197  ;;  %v1479_v41 = vpop.permute.xlu1 %1478 }
 0x2a9   : > { %v1441_v43 = vpop.permute.xlu0 %1440  ;;  %1200 = vst.msk [vmem:[#allocation3 + $0x6] sm:$0x1] %vm879_vm8, %v1198_v34 }
 0x2aa   : > { %1443 = vst.msk [vmem:[#allocation3 + $0xb] sm:$0x1] %vm874_vm6, %v1441_v43 }
 0x2ab   : > { %1481 = vst.msk [vmem:[#allocation3 + $0xc] sm:$0x1] %vm733_vm2, %v1479_v41 }
 0x2b0   : > { %v1409_v6 = vpop.permute.xlu2 %1408  ;;  %v1525_v27 = vpop.permute.xlu1 %1524 }
 0x2b1   : > { %v1515_v3 = vpop.permute.xlu0 %1514  ;;  %1411 = vst.msk [vmem:[#allocation3 + $0x9] sm:$0x1] %vm879_vm8, %v1409_v6 }
 0x2b2   : > { %1517 = vst.msk [vmem:[#allocation3 + $0xe] sm:$0x1] %vm733_vm2, %v1515_v3 }
 0x2b3   : > { %1527 = vst.msk [vmem:[#allocation3 + $0xf] sm:$0x1] %vm747_vm13, %v1525_v27  ;;  %vm1696_vm13 = vcmask 122880  }
 0x2b8   : > { %v1489_v21 = vpop.permute.xlu2 %1488  ;;  %v951_v4 = vpop.permute.xlu1 %950 }
 0x2b9   : > { %v915_v29 = vpop.permute.xlu0 %914  ;;  %1491 = vst.msk [vmem:[#allocation3 + $0xc] sm:$0x1] %vm752_vm4, %v1489_v21 }
 0x2ba   : > { %917 = vst.msk [vmem:[#allocation3 + $0x1] sm:$0x1] %vm879_vm8, %v915_v29 }
 0x2bb   : > { %953 = vst.msk [vmem:[#allocation3 + $0x2] sm:$0x1] %vm879_vm8, %v951_v4 }
 0x2c0   : > { %v1535_v46 = vpop.permute.xlu2 %1534  ;;  %v1162_v17 = vpop.permute.xlu1 %1161 }
 0x2c1   : > { %v1126_v18 = vpop.permute.xlu0 %1125  ;;  %1537 = vst.msk [vmem:[#allocation3 + $0xf] sm:$0x1] %vm733_vm2, %v1535_v46  ;;  %vm1663_vm2 = vcmask 647680  }
 0x2c2   : > { %1128 = vst.msk [vmem:[#allocation3 + $0x4] sm:$0x1] %vm879_vm8, %v1126_v18 }
 0x2c3   : > { %1164 = vst.msk [vmem:[#allocation3 + $0x5] sm:$0x1] %vm879_vm8, %v1162_v17 }
 0x2c8   : > { %v969_v28 = vpop.permute.xlu2 %968  ;;  %v1373_v20 = vpop.permute.xlu1 %1372 }
 0x2c9   : > { %v1212_v22 = vpop.permute.xlu0 %1211  ;;  %971 = vst.msk [vmem:[#allocation3 + $0x2] sm:$0x1] %vm898_vm9, %v969_v28 }
 0x2ca   : > { %1214 = vst.msk [vmem:[#allocation3 + $0x7] sm:$0x1] %vm859_vm7, %v1212_v22 }
 0x2cb   : > { %1375 = vst.msk [vmem:[#allocation3 + $0x8] sm:$0x1] %vm879_vm8, %v1373_v20 }
 0x2d0   : > { %v1180_v49 = vpop.permute.xlu2 %1179  ;;  %v1459_v11 = vpop.permute.xlu1 %1458 }
 0x2d1   : > { %v1445_v47 = vpop.permute.xlu0 %1444  ;;  %1182 = vst.msk [vmem:[#allocation3 + $0x5] sm:$0x1] %vm898_vm9, %v1180_v49 }
 0x2d2   : > { %1447 = vst.msk [vmem:[#allocation3 + $0xa] sm:$0x1] %vm879_vm8, %v1445_v47 }
 0x2d3   : > { %1461 = vst.msk [vmem:[#allocation3 + $0xb] sm:$0x1] %vm859_vm7, %v1459_v11  ;;  %vm1969_vm7 = vcmask 257024  }
 0x2d8   : > { %v1391_v44 = vpop.permute.xlu2 %1390  ;;  %v1529_v9 = vpop.permute.xlu1 %1528 }
 0x2d9   : > { %v1509_v10 = vpop.permute.xlu0 %1508  ;;  %1393 = vst.msk [vmem:[#allocation3 + $0x8] sm:$0x1] %vm898_vm9, %v1391_v44  ;;  %v2773_v44 = vld [vmem:[%s3987_s7 + $0x78] sm:$0xff] }
 0x2da   : > { %1511 = vst.msk [vmem:[#allocation3 + $0xd] sm:$0x1] %vm752_vm4, %v1509_v10  ;;  %1943 = vmatpush.bf16.msra.mxu3 %v2773_v44  ;;  %v2772_v10 = vld [vmem:[%s3987_s7 + $0x70] sm:$0xff]  ;;  %v2778_v44 = vld [vmem:[%s3990_s10 + $0x20] sm:$0xff] }
 0x2db   : > { %1531 = vst.msk [vmem:[#allocation3 + $0xe] sm:$0x1] %vm752_vm4, %v1529_v9  ;;  %v2764_v9 = vld [vmem:[%s3987_s7 + $0x30] sm:$0xff] }
 0x2dc   : > { %1931 = vmatpush.bf16.msra.mxu2 %v2764_v9  ;;  %v2786_v9 = vld [vmem:[%s3990_s10 + $0x60] sm:$0xff] }
 0x2de   : > { %1944 = vmatpush.bf16.msra.mxu3 %v2772_v10  ;;  %v2794_v10 = vld [vmem:[%s3990_s10 + $0xa0] sm:$0xff] }
 0x2e0   : > { %v1473_v61 = vpop.permute.xlu2 %1472  ;;  %v933_v26 = vpop.permute.xlu1 %932 }
 0x2e1   : > { %v896_v48 = vpop.permute.xlu0 %895  ;;  %1475 = vst.msk [vmem:[#allocation3 + $0xb] sm:$0x1] %vm879_vm8, %v1473_v61 }
 0x2e2   : > { %899 = vst.msk [vmem:[#allocation3] sm:$0x1] %vm898_vm9, %v896_v48  ;;  %v2771_v48 = vld [vmem:[%s3987_s7 + $0x68] sm:$0xff] }
 0x2e3   : > { %935 = vst.msk [vmem:[#allocation3 + $0x1] sm:$0x1] %vm898_vm9, %v933_v26  ;;  %v2763_v26 = vld [vmem:[%s3987_s7 + $0x28] sm:$0xff]  ;;  %1945 = vmatpush.bf16.msra.mxu3 %v2771_v48  ;;  %v2784_v48 = vld [vmem:[%s3990_s10 + $0x50] sm:$0xff] }
 0x2e4   : > { %1932 = vmatpush.bf16.msra.mxu2 %v2763_v26  ;;  %v2776_v26 = vld [vmem:[%s3990_s10 + $0x10] sm:$0xff] }
 0x2e7   : > { %1946 = vmatpush.bf16.msra.mxu3 %v2770_v33 }
 0x2e8   : > { %v1539_v14 = vpop.permute.xlu2 %1538  ;;  %v1144_v37 = vpop.permute.xlu1 %1143  ;;  %1933 = vmatpush.bf16.msra.mxu2 %v2762_v45  ;;  %v2792_v45 = vld [vmem:[%s3990_s10 + $0x90] sm:$0xff] }
 0x2e9   : > { %v979_v50 = vpop.permute.xlu0 %978  ;;  %1541 = vst.msk [vmem:[#allocation3 + $0xe] sm:$0x1] %vm772_vm5, %v1539_v14 }
 0x2ea   : > { %981 = vst.msk [vmem:[#allocation3 + $0x3] sm:$0x1] %vm879_vm8, %v979_v50 }
 0x2eb   : > { %1146 = vst.msk [vmem:[#allocation3 + $0x4] sm:$0x1] %vm898_vm9, %v1144_v37 }
 0x2ec   : > { %1934 = vmatpush.bf16.msra.mxu2 %v2761_v58  ;;  %v2791_v58 = vld [vmem:[%s3990_s10 + $0x88] sm:$0xff] }
 0x2f0   : > { %v1226_v38 = vpop.permute.xlu1 %1225 }
 0x2f1   : > { %v1216_v39 = vpop.permute.xlu0 %1215  ;;  %1228 = vst.msk [vmem:[#allocation3 + $0x7] sm:$0x1] %vm879_vm8, %v1226_v38  ;;  %v2769_v38 = vld [vmem:[%s3987_s7 + $0x58] sm:$0xff] }
 0x2f2   : > { %1218 = vst.msk [vmem:[#allocation3 + $0x6] sm:$0x1] %vm898_vm9, %v1216_v39  ;;  %1947 = vmatpush.bf16.msra.mxu3 %v2769_v38  ;;  %v2798_v38 = vld [vmem:[%s3990_s10 + $0xc0] sm:$0xff] }
 0x2f8   : > { %v1463_v51 = vpop.permute.xlu1 %1462 }
 0x2f9   : > { %v1427_v52 = vpop.permute.xlu0 %1426  ;;  %1465 = vst.msk [vmem:[#allocation3 + $0xa] sm:$0x1] %vm898_vm9, %v1463_v51  ;;  %v1548_v54 = vld [vmem:[#allocation3] sm:$0xff]  ;;  %v2760_v51 = vld [vmem:[%s3987_s7 + $0x10] sm:$0xff] }
 0x2fa   : > { %1429 = vst.msk [vmem:[#allocation3 + $0x9] sm:$0x1] %vm898_vm9, %v1427_v52  ;;  %v2768_v52 = vld [vmem:[%s3987_s7 + $0x50] sm:$0xff]  ;;  %1935 = vmatpush.bf16.msra.mxu2 %v2760_v51  ;;  %v2774_v51 = vld [vmem:[%s3990_s10] sm:$0xff] }
 0x2fb   : > { %1948 = vmatpush.bf16.msra.mxu3 %v2768_v52  ;;  %v2782_v52 = vld [vmem:[%s3990_s10 + $0x40] sm:$0xff] }
 0x300   : > { %v1519_v16 = vpop.permute.xlu1 %1518 }
 0x301   : > { %v1499_v0 = vpop.permute.xlu0 %1498  ;;  %1521 = vst.msk [vmem:[#allocation3 + $0xd] sm:$0x1] %vm772_vm5, %v1519_v16  ;;  %v2759_v16 = vld [vmem:[%s3987_s7 + $0x8] sm:$0xff] }
 0x302   : > { %1501 = vst.msk [vmem:[#allocation3 + $0xc] sm:$0x1] %vm772_vm5, %v1499_v0  ;;  %v2767_v0 = vld [vmem:[%s3987_s7 + $0x48] sm:$0xff]  ;;  %1936 = vmatpush.bf16.msra.mxu2 %v2759_v16  ;;  %v2790_v16 = vld [vmem:[%s3990_s10 + $0x80] sm:$0xff] }
 0x303   : > { %1949 = vmatpush.bf16.msra.mxu3 %v2767_v0 }
 0x309   : > { %v1545_v40 = vpop.permute.xlu0 %1544 }
 0x30a   : > { %1547 = vst.msk [vmem:[#allocation3 + $0xf] sm:$0x1] %vm752_vm4, %v1545_v40  ;;  %vm1679_vm4 = vcmask 1041280  }
 0x311   : > { %v1549_v1 = vld [vmem:[#allocation3 + $0x8] sm:$0xff] }
 0x312   : > { %v1550_v60 = vpack.c.bf16 %v1549_v1, %v1548_v54  ;;  %v2758_v1 = vld [vmem:[%s3987_s7] sm:$0xff] }
 0x313   : > { %1937 = vmatpush.bf16.msra.mxu2 %v2758_v1 }
 0x314   : > { %1623 = vmatmul.bf16.vlgmr.msra.gmra.mxu1 %v1550_v60  ;;  %v2766_v60 = vld [vmem:[%s3987_s7 + $0x40] sm:$0xff] }
 0x315   : > { %1950 = vmatpush.bf16.msra.mxu3 %v2766_v60 }
 0x391   : > { %v1624_v19 = vpop.f32.mrf.mxu1 }
 0x392   : > { %v1633_v35 = vmul.f32 %v2836_v62, %v1624_v19 }
 0x394   : > { %v1639_v13 = vadd.f32 %v2837_v24, %v1633_v35 }
 0x396   : > { %vm1641_vm10 = vcmp.ge.f32.partialorder %v1639_v13, 0.0  ;;  %v1643_v23 = vmul.f32 0.2, %v1639_v13 }
 0x398   : > { %v1645_v36 = vsel %vm1641_vm10, %v1639_v13, %v1643_v23 }
 0x399   : > { %1648 = vst.msk [vmem:[#allocation4] sm:$0xff] %vm1647_vm11, %v1645_v36  ;;  %v1626_v30 = vpop.f32.mrf.mxu1 }
 0x39a   : > { %v1634_v25 = vmul.f32 %v2836_v62, %v1626_v30 }
 0x39c   : > { %v1640_v32 = vadd.f32 %v2837_v24, %v1634_v25  ;;  %v2805_v25 = vld [vmem:[%s3990_s10 + $0xf8] sm:$0xff] }
 0x39d   : > { %2315 = vmatpush.bf16.msrb.mxu0 %v2805_v25  ;;  %v2808_v25 = vld [vmem:[%s3993_s13 + $0x10] sm:$0xff] }
 0x39e   : > { %vm1642_vm12 = vcmp.ge.f32.partialorder %v1640_v32, 0.0  ;;  %v1644_v42 = vmul.f32 0.2, %v1640_v32 }
 0x3a0   : > { %v1646_v5 = vsel %vm1642_vm12, %v1640_v32, %v1644_v42  ;;  %v1706_v53 = vld [vmem:[#allocation4 + $0x6] sm:$0x1]  ;;  %v1695_v56 = vld [vmem:[#allocation4 + $0x5] sm:$0x1]  ;;  %v1687_v15 = vld [vmem:[#allocation4 + $0x4] sm:$0x1]  ;;  %v1971_v32 = vlaneseq }
 0x3a1   : > { %1649 = vst.msk [vmem:[#allocation4 + $0x8] sm:$0xff] %vm1647_vm11, %v1646_v5  ;;  %1708 = vrot.lane.b32.xlu0 %v1706_v53, %s2857_s24  ;;  %1699 = vrot.lane.b32.xlu2 %v1695_v56, %s2854_s22  ;;  %v1719_v59 = vld [vmem:[#allocation4 + $0x7] sm:$0x1]  ;;  %v1651_v31 = vld [vmem:[#allocation4] sm:$0x1]  ;;  %v2804_v42 = vld [vmem:[%s3990_s10 + $0xf0] sm:$0xff] }
 0x3a2   : > { %1689 = vrot.lane.b32.xlu1 %v1687_v15, %s2857_s24  ;;  %1697 = vst.msk [vmem:[#allocation5 + $0x3] sm:$0x1] %vm1696_vm13, %v1695_v56  ;;  %v1658_v43 = vld [vmem:[#allocation4 + $0x1] sm:$0x1]  ;;  %v1670_v6 = vld [vmem:[#allocation4 + $0x2] sm:$0x1]  ;;  %2316 = vmatpush.bf16.msrb.mxu0 %v2804_v42 }
 0x3a3   : > { %1704 = vst.msk [vmem:[#allocation5 + $0x5] sm:$0x1] %vm1696_vm13, %v1695_v56  ;;  %v1681_v21 = vld [vmem:[#allocation4 + $0x3] sm:$0x1]  ;;  %vm1973_vm5 = vcmp.lt.s32.totalorder %v1971_v32, 512  ;;  %vm3906_vm8 = vcmp.ge.s32.totalorder %v1971_v32, 32 }
 0x3a4   : > { %1975 = vst.msk [vmem:[#allocation7] sm:$0xf] %vm1973_vm5, %v2853_v7  ;;  %v2838_v5 = vld [vmem:[%s3988_s8] ss:$0 sm:$0xff]  ;;  %vm3911_vm9 = vcmp.lt.s32.totalorder %v1971_v32, 64  ;;  %vm1990_vm11 = vcmp.ge.s32.totalorder %v1971_v32, 64 }
 0x3a5   : > { %vm1983_vm10 = vmand %vm3906_vm8, %vm3911_vm9  ;;  %vm1991_vm12 = vcmp.lt.s32.totalorder %v1971_v32, 96  ;;  %v2807_v32 = vld [vmem:[%s3993_s13 + $0x8] sm:$0xff] }
 0x3a8   : > { %v1770_v63 = vld [vmem:[#allocation4 + $0xd] sm:$0x1]  ;;  %v1733_v34 = vld [vmem:[#allocation4 + $0x9] sm:$0x1]  ;;  %v1726_v41 = vld [vmem:[#allocation4 + $0x8] sm:$0x1] }
 0x3a9   : > { %1721 = vrot.lane.b32.xlu2 %v1719_v59, %s2854_s22  ;;  %1653 = vrot.lane.b32.xlu0 %v1651_v31, %s2863_s30  ;;  %1771 = vst.msk [vmem:[#allocation5 + $0x7] sm:$0x1] %vm1696_vm13, %v1770_v63  ;;  %v1764_v27 = vld [vmem:[#allocation4 + $0xc] sm:$0x1]  ;;  %v1745_v3 = vld [vmem:[#allocation4 + $0xa] sm:$0x1]  ;;  %vm1992_vm13 = vmand %vm1990_vm11, %vm1991_vm12 }
 0x3aa   : > { %1712 = vrot.lane.b32.xlu1 %v1706_v53, %s2856_s14  ;;  %v1777_v4 = vld [vmem:[#allocation4 + $0xe] sm:$0x1]  ;;  %v1757_v29 = vld [vmem:[#allocation4 + $0xb] sm:$0x1]  ;;  %v1787_v46 = vld [vmem:[#allocation4 + $0xf] sm:$0x1] }
 0x3ab   : > { %v2839_v59 = vld [vmem:[%s3989_s9] ss:$0 sm:$0xff]  ;;  %v2803_v31 = vld [vmem:[%s3990_s10 + $0xe8] sm:$0xff] }
 0x3ac   : > { %2317 = vmatpush.bf16.msrb.mxu0 %v2803_v31 }
 0x3b1   : > { %1735 = vrot.lane.b32.xlu0 %v1733_v34, %s2860_s27  ;;  %1728 = vrot.lane.b32.xlu2 %v1726_v41, %s2863_s30 }
 0x3b2   : > { %1660 = vrot.lane.b32.xlu1 %v1658_v43, %s2860_s27 }
 0x3b9   : > { %1672 = vrot.lane.b32.xlu0 %v1670_v6, %s2863_s30  ;;  %1665 = vrot.lane.b32.xlu2 %v1658_v43, %s2865_s17 }
 0x3ba   : > { %1766 = vrot.lane.b32.xlu1 %v1764_v27, %s2857_s24 }
 0x3c1   : > { %1773 = vrot.lane.b32.xlu0 %v1770_v63, %s2854_s22  ;;  %1747 = vrot.lane.b32.xlu2 %v1745_v3, %s2863_s30 }
 0x3c2   : > { %1739 = vrot.lane.b32.xlu1 %v1733_v34, %s2865_s17 }
 0x3c9   : > { %1683 = vrot.lane.b32.xlu0 %v1681_v21, %s2865_s17  ;;  %1676 = vrot.lane.b32.xlu2 %v1670_v6, %s2867_s19 }
 0x3ca   : > { %1779 = vrot.lane.b32.xlu1 %v1777_v4, %s2857_s24 }
 0x3d1   : > { %1783 = vrot.lane.b32.xlu0 %v1777_v4, %s2856_s14  ;;  %1759 = vrot.lane.b32.xlu2 %v1757_v29, %s2865_s17  ;;  %v2781_v29 = vld [vmem:[%s3990_s10 + $0x38] sm:$0xff] }
 0x3d2   : > { %1751 = vrot.lane.b32.xlu1 %v1745_v3, %s2867_s19  ;;  %2276 = vmatpush.bf16.msrb.mxu1 %v2781_v29 }
 0x3da   : > { %1789 = vrot.lane.b32.xlu1 %v1787_v46, %s2854_s22  ;;  %v2789_v46 = vld [vmem:[%s3990_s10 + $0x78] sm:$0xff] }
 0x3db   : > { %2289 = vmatpush.bf16.msrb.mxu2 %v2789_v46 }
 0x3fb   : > { %v1700_v17 = vpop.permute.xlu2 %1699 }
 0x403   : > { %v1722_v18 = vpop.permute.xlu2 %1721 }
 0x40b   : > { %v1729_v28 = vpop.permute.xlu2 %1728 }
 0x413   : > { %v1709_v20 = vpop.permute.xlu0 %1708  ;;  %v1666_v22 = vpop.permute.xlu2 %1665 }
 0x414   : > { %1711 = vst.msk [vmem:[#allocation5 + $0x3] sm:$0x1] %vm1692_vm14, %v1709_v20  ;;  %v1690_v49 = vpop.permute.xlu1 %1689 }
 0x415   : > { %1717 = vst.msk [vmem:[#allocation5 + $0x5] sm:$0x1] %vm1692_vm14, %v1709_v20  ;;  %v2788_v20 = vld [vmem:[%s3990_s10 + $0x70] sm:$0xff] }
 0x416   : > { %1693 = vst.msk [vmem:[#allocation5 + $0x2] sm:$0x1] %vm1692_vm14, %v1690_v49  ;;  %2290 = vmatpush.bf16.msrb.mxu2 %v2788_v20 }
 0x417   : > { %1694 = vst.msk [vmem:[#allocation5 + $0x4] sm:$0x1] %vm1692_vm14, %v1690_v49  ;;  %v2779_v49 = vld [vmem:[%s3990_s10 + $0x28] sm:$0xff] }
 0x418   : > { %1703 = vst.msk [vmem:[#allocation5 + $0x2] sm:$0x1] %vm1702_vm15, %v1700_v17 }
 0x419   : > { %1705 = vst.msk [vmem:[#allocation5 + $0x4] sm:$0x1] %vm1702_vm15, %v1700_v17  ;;  %v2797_v17 = vld [vmem:[%s3990_s10 + $0xb8] sm:$0xff] }
 0x41a   : > { %1724 = vst.msk [vmem:[#allocation5 + $0x3] sm:$0x1] %vm1702_vm15, %v1722_v18  ;;  %2302 = vmatpush.bf16.msrb.mxu3 %v2797_v17 }
 0x41b   : > { %1725 = vst.msk [vmem:[#allocation5 + $0x5] sm:$0x1] %vm1702_vm15, %v1722_v18  ;;  %v1654_v11 = vpop.permute.xlu0 %1653  ;;  %v1748_v47 = vpop.permute.xlu2 %1747  ;;  %v2802_v18 = vld [vmem:[%s3990_s10 + $0xe0] sm:$0xff] }
 0x41c   : > { %v1713_v8 = vpop.permute.xlu1 %1712  ;;  %1657 = vst.msk [vmem:[#allocation5] sm:$0x1] %vm1656_vm0, %v1654_v11  ;;  %2318 = vmatpush.bf16.msrb.mxu0 %v2802_v18  ;;  %v2787_v11 = vld [vmem:[%s3990_s10 + $0x68] sm:$0xff] }
 0x41d   : > { %1716 = vst.msk [vmem:[#allocation5 + $0x2] sm:$0x1] %vm1715_vm1, %v1713_v8  ;;  %2291 = vmatpush.bf16.msrb.mxu2 %v2787_v11 }
 0x41e   : > { %1718 = vst.msk [vmem:[#allocation5 + $0x4] sm:$0x1] %vm1715_vm1, %v1713_v8  ;;  %v2795_v8 = vld [vmem:[%s3990_s10 + $0xa8] sm:$0xff] }
 0x41f   : > { %1731 = vst.msk [vmem:[#allocation5 + $0x2] sm:$0x1] %vm1656_vm0, %v1729_v28 }
 0x420   : > { %1732 = vst.msk [vmem:[#allocation5 + $0x4] sm:$0x1] %vm1656_vm0, %v1729_v28  ;;  %v2780_v28 = vld [vmem:[%s3990_s10 + $0x30] sm:$0xff] }
 0x421   : > { %1669 = vst.msk [vmem:[#allocation5] sm:$0x1] %vm1668_vm3, %v1666_v22  ;;  %v2796_v22 = vld [vmem:[%s3990_s10 + $0xb0] sm:$0xff]  ;;  %2277 = vmatpush.bf16.msrb.mxu1 %v2780_v28  ;;  %2292 = vmatpush.bf16.msrb.mxu2 %v2786_v9  ;;  %v2349_v28 = vld [vmem:[#allocation10] sm:$0x1] }
 0x422   : > { %2303 = vmatpush.bf16.msrb.mxu3 %v2796_v22 }
 0x423   : > { %v1736_v12 = vpop.permute.xlu0 %1735  ;;  %v1677_v55 = vpop.permute.xlu2 %1676 }
 0x424   : > { %v1661_v61 = vpop.permute.xlu1 %1660  ;;  %1738 = vst.msk [vmem:[#allocation5 + $0x3] sm:$0x1] %vm1663_vm2, %v1736_v12 }
 0x425   : > { %1664 = vst.msk [vmem:[#allocation5 + $0x1] sm:$0x1] %vm1663_vm2, %v1661_v61  ;;  %2278 = vmatpush.bf16.msrb.mxu1 %v2779_v49  ;;  %v2793_v61 = vld [vmem:[%s3990_s10 + $0x98] sm:$0xff] }
 0x426   : > { %1743 = vst.msk [vmem:[#allocation5 + $0x5] sm:$0x1] %vm1663_vm2, %v1736_v12  ;;  %2304 = vmatpush.bf16.msrb.mxu3 %v2795_v8  ;;  %v2777_v12 = vld [vmem:[%s3990_s10 + $0x18] sm:$0xff] }
 0x427   : > { %1750 = vst.msk [vmem:[#allocation5 + $0x3] sm:$0x1] %vm1656_vm0, %v1748_v47 }
 0x428   : > { %1755 = vst.msk [vmem:[#allocation5 + $0x5] sm:$0x1] %vm1656_vm0, %v1748_v47  ;;  %v2801_v47 = vld [vmem:[%s3990_s10 + $0xd8] sm:$0xff] }
 0x429   : > { %1680 = vst.msk [vmem:[#allocation5] sm:$0x1] %vm1679_vm4, %v1677_v55  ;;  %2319 = vmatpush.bf16.msrb.mxu0 %v2801_v47  ;;  %2279 = vmatpush.bf16.msrb.mxu1 %v2778_v44  ;;  %v2785_v55 = vld [vmem:[%s3990_s10 + $0x58] sm:$0xff] }
 0x42a   : > { %2305 = vmatpush.bf16.msrb.mxu3 %v2794_v10  ;;  %2293 = vmatpush.bf16.msrb.mxu2 %v2785_v55 }
 0x42b   : > { %v1673_v14 = vpop.permute.xlu0 %1672  ;;  %v1760_v37 = vpop.permute.xlu2 %1759 }
 0x42c   : > { %v1767_v50 = vpop.permute.xlu1 %1766  ;;  %1675 = vst.msk [vmem:[#allocation5 + $0x1] sm:$0x1] %vm1656_vm0, %v1673_v14  ;;  %vm2374_vm0 = vcmask 523264  }
 0x42d   : > { %1769 = vst.msk [vmem:[#allocation5 + $0x6] sm:$0x1] %vm1692_vm14, %v1767_v50  ;;  %2320 = vmatpush.bf16.msrb.mxu0 %v2800_v2  ;;  %2280 = vmatpush.bf16.msrb.mxu1 %v2777_v12  ;;  %v2783_v50 = vld [vmem:[%s3990_s10 + $0x48] sm:$0xff] }
 0x42e   : > { %1762 = vst.msk [vmem:[#allocation5 + $0x3] sm:$0x1] %vm1668_vm3, %v1760_v37  ;;  %2306 = vmatpush.bf16.msrb.mxu3 %v2793_v61  ;;  %2294 = vmatpush.bf16.msrb.mxu2 %v2784_v48 }
 0x42f   : > { %1763 = vst.msk [vmem:[#allocation5 + $0x5] sm:$0x1] %vm1668_vm3, %v1760_v37  ;;  %v2775_v37 = vld [vmem:[%s3990_s10 + $0x8] sm:$0xff] }
 0x431   : > { %2281 = vmatpush.bf16.msrb.mxu1 %v2776_v26 }
 0x432   : > { %2307 = vmatpush.bf16.msrb.mxu3 %v2792_v45  ;;  %2295 = vmatpush.bf16.msrb.mxu2 %v2783_v50 }
 0x433   : > { %v1774_v57 = vpop.permute.xlu0 %1773 }
 0x434   : > { %v1740_v39 = vpop.permute.xlu1 %1739  ;;  %1776 = vst.msk [vmem:[#allocation5 + $0x6] sm:$0x1] %vm1702_vm15, %v1774_v57  ;;  %v2799_v57 = vld [vmem:[%s3990_s10 + $0xc8] sm:$0xff] }
 0x435   : > { %1742 = vst.msk [vmem:[#allocation5 + $0x2] sm:$0x1] %vm1668_vm3, %v1740_v39  ;;  %2321 = vmatpush.bf16.msrb.mxu0 %v2799_v57  ;;  %2282 = vmatpush.bf16.msrb.mxu1 %v2775_v37 }
 0x436   : > { %1744 = vst.msk [vmem:[#allocation5 + $0x4] sm:$0x1] %vm1668_vm3, %v1740_v39  ;;  %2308 = vmatpush.bf16.msrb.mxu3 %v2791_v58  ;;  %2296 = vmatpush.bf16.msrb.mxu2 %v2782_v52 }
 0x439   : > { %2322 = vmatpush.bf16.msrb.mxu0 %v2798_v38  ;;  %2283 = vmatpush.bf16.msrb.mxu1 %v2774_v51 }
 0x43a   : > { %2309 = vmatpush.bf16.msrb.mxu3 %v2790_v16 }
 0x43b   : > { %v1684_v40 = vpop.permute.xlu0 %1683 }
 0x43c   : > { %v1780_v54 = vpop.permute.xlu1 %1779  ;;  %1686 = vst.msk [vmem:[#allocation5 + $0x1] sm:$0x1] %vm1668_vm3, %v1684_v40 }
 0x43d   : > { %1782 = vst.msk [vmem:[#allocation5 + $0x7] sm:$0x1] %vm1692_vm14, %v1780_v54 }
 0x443   : > { %v1784_v62 = vpop.permute.xlu0 %1783 }
 0x444   : > { %v1752_v24 = vpop.permute.xlu1 %1751  ;;  %1786 = vst.msk [vmem:[#allocation5 + $0x6] sm:$0x1] %vm1715_vm1, %v1784_v62 }
 0x445   : > { %1754 = vst.msk [vmem:[#allocation5 + $0x2] sm:$0x1] %vm1679_vm4, %v1752_v24 }
 0x446   : > { %1756 = vst.msk [vmem:[#allocation5 + $0x4] sm:$0x1] %vm1679_vm4, %v1752_v24  ;;  %vm2410_vm4 = vcmask 0  }
 0x44c   : > { %v1790_v19 = vpop.permute.xlu1 %1789 }
 0x44d   : > { %1792 = vst.msk [vmem:[#allocation5 + $0x7] sm:$0x1] %vm1702_vm15, %v1790_v19  ;;  %vm2335_vm15 = vcmask 516096  }
 0x454   : > { %v1793_v35 = vld [vmem:[#allocation5] sm:$0xff] }
 0x455   : > { %1795 = vst [vmem:[#allocation1] ss:$2 sm:$0xff] %v1793_v35 }
 0x45c   : > { %v1796_v13 = vld.sshfl [vmem:[#allocation1] sm:$0xff pattern:$0x75316420]  ;;  %v1797_v23 = vld.sshfl [vmem:[#allocation1 + $0x8] sm:$0xff pattern:$0x75316420] }
 0x45d   : > { %v1800_v36 = vpack.c.bf16 %v1796_v13, %v1796_v13  ;;  %v1801_v30 = vpack.c.bf16 %v1797_v23, %v1797_v23 }
 0x45f   : > { %1938 = vmatmul.bf16.vlgmr.msra.gmra.mxu2 %v1800_v36  ;;  %1951 = vmatmul.bf16.vlgmr.msra.gmra.mxu3 %v1801_v30  ;;  %v2809_v30 = vld [vmem:[%s3993_s13 + $0x18] sm:$0xff] }
 0x460   : > { %2382 = vmatpush.bf16.msra.mxu1 %v2809_v30 }
 0x464   : > { %2383 = vmatpush.bf16.msra.mxu1 %v2808_v25 }
 0x468   : > { %2384 = vmatpush.bf16.msra.mxu1 %v2807_v32 }
 0x4e2   : > { %v1939_v53 = vpop.f32.mrf.mxu2  ;;  %v1952_v56 = vpop.f32.mrf.mxu3 }
 0x4e3   : > { %v1953_v15 = vadd.f32 %v1952_v56, %v1939_v53  ;;  %v2806_v53 = vld [vmem:[%s3993_s13] sm:$0xff] }
 0x4e4   : > { %2385 = vmatpush.bf16.msra.mxu1 %v2806_v53 }
 0x4e5   : > { %v1960_v63 = vmul.f32 %v2838_v5, %v1953_v15 }
 0x4e7   : > { %v1965_v34 = vadd.f32 %v2839_v59, %v1960_v63 }
 0x4e9   : > { %vm1966_vm6 = vcmp.ge.f32.partialorder %v1965_v34, 0.0  ;;  %v1967_v7 = vmul.f32 0.2, %v1965_v34 }
 0x4ea   : > { %v1941_v41 = vpop.f32.mrf.mxu2  ;;  %v1954_v43 = vpop.f32.mrf.mxu3 }
 0x4eb   : > { %v1968_v6 = vsel %vm1966_vm6, %v1965_v34, %v1967_v7  ;;  %v2328_v7 = vld [vmem:[%s3991_s11] sm:$0x1] }
 0x4ec   : > { %1970 = vst.msk [vmem:[#allocation6] sm:$0xf] %vm1969_vm7, %v1968_v6  ;;  %v2330_v43 = vld [vmem:[%s3992_s12] sm:$0x1] }
 0x4f3   : > { %v1994_v27 = vld [vmem:[#allocation6 + $0x2] sm:$0x1]  ;;  %v1985_v3 = vld [vmem:[#allocation6 + $0x1] sm:$0x1]  ;;  %v1976_v21 = vld [vmem:[#allocation6] sm:$0x1] }
 0x4f4   : > { %1996 = vrot.lane.b32.xlu0 %v1994_v27, %s2854_s22  ;;  %1987 = vrot.lane.b32.xlu1 %v1985_v3, %s2860_s27  ;;  %v2000_v4 = vld [vmem:[#allocation6 + $0x3] sm:$0x1] }
 0x4f5   : > { %1978 = vrot.lane.b32.xlu2 %v1976_v21, %s2854_s22 }
 0x4fd   : > { %2002 = vrot.lane.b32.xlu2 %v2000_v4, %s2860_s27 }
 0x54f   : > { %v1979_v39 = vpop.permute.xlu2 %1978 }
 0x550   : > { %1984 = vst.msk [vmem:[#allocation7 + $0x1] sm:$0x1] %vm1983_vm10, %v1979_v39 }
 0x557   : > { %v2003_v54 = vpop.permute.xlu2 %2002 }
 0x566   : > { %v1997_v0 = vpop.permute.xlu0 %1996  ;;  %v1988_v40 = vpop.permute.xlu1 %1987 }
 0x567   : > { %1999 = vst.msk [vmem:[#allocation7 + $0x2] sm:$0x1] %vm1983_vm10, %v1997_v0 }
 0x568   : > { %2005 = vst.msk [vmem:[#allocation7 + $0x2] sm:$0x1] %vm1992_vm13, %v2003_v54 }
 0x569   : > { %1993 = vst.msk [vmem:[#allocation7 + $0x1] sm:$0x1] %vm1992_vm13, %v1988_v40 }
 0x570   : > { %v2006_v1 = vld [vmem:[#allocation7] sm:$0xf] }
 0x571   : > { %v2008_v60 = vperm.slane %v2006_v1, 0  ;;  %v2009_v62 = vperm.slane %v2006_v1, 1  ;;  %v2010_v24 = vperm.slane %v2006_v1, 2  ;;  %v2011_v19 = vperm.slane %v2006_v1, 3 }
 0x573   : > { %v2016_v35 = vpack.c.bf16 %v2008_v60, %v2008_v60  ;;  %v2017_v13 = vpack.c.bf16 %v2009_v62, %v2009_v62  ;;  %v2018_v23 = vpack.c.bf16 %v2010_v24, %v2010_v24  ;;  %v2019_v36 = vpack.c.bf16 %v2011_v19, %v2011_v19 }
 0x575   : > { %2284 = vmatmul.bf16.vlgmr.msrb.gmra.mxu1 %v2016_v35  ;;  %2297 = vmatmul.bf16.vlgmr.msrb.gmra.mxu2 %v2017_v13 }
 0x576   : > { %2310 = vmatmul.bf16.vlgmr.msrb.gmra.mxu3 %v2018_v23  ;;  %2323 = vmatmul.bf16.vlgmr.msrb.gmra.mxu0 %v2019_v36 }
 0x5f2   : > { %v2285_v42 = vpop.f32.mrf.mxu1 }
 0x5f3   : > { %v2324_v5 = vpop.f32.mrf.mxu0 }
 0x5f8   : > { %v2298_v56 = vpop.f32.mrf.mxu2 }
 0x5f9   : > { %v2299_v15 = vadd.f32 %v2298_v56, %v2285_v42  ;;  %v2311_v59 = vpop.f32.mrf.mxu3 }
 0x5fa   : > { %v2287_v31 = vpop.f32.mrf.mxu1 }
 0x5fb   : > { %v2312_v63 = vadd.f32 %v2311_v59, %v2299_v15  ;;  %v2326_v34 = vpop.f32.mrf.mxu0 }
 0x5fd   : > { %v2325_v41 = vadd.f32 %v2324_v5, %v2312_v63 }
 0x5ff   : > { %v2329_v6 = vmul.f32 %v2328_v7, %v2325_v41 }
 0x600   : > { %v2300_v27 = vpop.f32.mrf.mxu2 }
 0x601   : > { %v2331_v3 = vadd.f32 %v2330_v43, %v2329_v6  ;;  %v2313_v21 = vpop.f32.mrf.mxu3 }
 0x603   : > { %vm2332_vm14 = vcmp.ge.f32.partialorder %v2331_v3, 0.0  ;;  %v2333_v4 = vmul.f32 0.2, %v2331_v3 }
 0x605   : > { %v2334_v29 = vsel %vm2332_vm14, %v2331_v3, %v2333_v4 }
 0x606   : > { %2336 = vst.msk [vmem:[#allocation8] sm:$0x1] %vm2335_vm15, %v2334_v29 }
 0x60d   : > { %v2337_v46 = vld [vmem:[#allocation8] sm:$0x1] }
 0x60e   : > { %2338 = vst.msk [vmem:[#allocation9] sm:$0x1] %vm2335_vm15, %v2337_v46 }
 0x615   : > { %v2339_v17 = vld [vmem:[#allocation9] sm:$0x1] }
 0x616   : > { %v2340_v18 = vpack.c.bf16 %v2339_v17, %v2339_v17 }
 0x618   : > { %2738 = vmatmul.msk.bf16.vlgmr.msra.gmra.mxu1 %vm2374_vm0, %v2340_v18 }
 0x695   : > { %v2387_v20 = vpop.f32.mrf.mxu1 }
 0x696   : > { %v2388_v22 = vadd.f32 %v2387_v20, %v2349_v28 }
 0x698   : > { %v2739_v49 = vmul.f32 -1.442695, %v2388_v22 }
 0x69a   : > { %2840 = vpow2.f32 %v2739_v49 }
 0x69d   : > { %v2389_v11 = vpop.f32.mrf.mxu1 }
 0x6a0   : > { %v2841_v47 = vpop.eup %2840 }
 0x6a1   : > { %v2394_v8 = vadd.f32 1.0, %v2841_v47 }
 0x6a3   : > { %2842 = vrcp.f32 %v2394_v8  ;;  %v2406_v10 = vand.u32 2147483648, %v2394_v8  ;;  %v2404_v55 = vand.u32 2147483647, %v2394_v8  ;;  %vm2400_vm3 = vweird.f32 %v2394_v8 }
 0x6a5   : > { %v2407_v26 = vor.u32 1.1754944e-38, %v2406_v10  ;;  %vm2405_vm5 = vcmp.eq.f32.partialorder %v2404_v55, 8.507059e+37 }
 0x6a9   : > { %v2843_v2 = vpop.eup %2842 }
 0x6aa   : > { %v2396_v44 = vmul.f32 %v2843_v2, %v2394_v8  ;;  %vm2401_vm1 = vweird.f32 %v2843_v2 }
 0x6ab   : > { %vm2402_vm2 = vmor %vm2400_vm3, %vm2401_vm1 }
 0x6ac   : > { %v2397_v9 = vsub.f32 1.0, %v2396_v44 }
 0x6ae   : > { %v2398_v12 = vmul.f32 %v2843_v2, %v2397_v9 }
 0x6b0   : > { %v2399_v61 = vadd.f32 %v2843_v2, %v2398_v12 }
 0x6b2   : > { %v2403_v48 = vsel %vm2402_vm2, %v2843_v2, %v2399_v61 }
 0x6b3   : > { %v2408_v45 = vsel %vm2405_vm5, %v2407_v26, %v2403_v48 }
 0x6b4   : > { %2411 = vst.msk [vmem:[%s492_s28] sm:$0x1] %vm2410_vm4, %v2408_v45 }
 0x6b5 PF: > { %s27_s20 = sadd.s32 1, %s2851_s20  }
 0x6b6   : > { %p24_p4 = scmp.ge.s32.totalorder %s27_s20, 4  }
 0x6b8   :  { %26 = sbr.rel (!%p24_p4) target bundleno = 3 (0x3), region = 110 }

</bundles_post_ra>
